<compile_context>
chip_gen: v5e
topology: v5e:2x2
jax: 0.10.0
libtpu: 0.0.40
codegen_flags: <defaults>
</compile_context>

<pallas_src>
import numpy as np
import jax
import jax.numpy as jnp
from jax.experimental import pallas as pl
from jax.experimental.pallas import tpu as pltpu

EPS = 1e-5


def enblock_forward(x_ncdhw, params):
    """x_ncdhw: (N, C, D, H, W) float32, PyTorch layout.  Returns same layout."""
    N, C, D, H, W = x_ncdhw.shape
    G = params["groups"]
    Cg = C // G
    S = D * H * W
    WC = W * C                       # lane dim (minor) = w*C + c
    Hp = H + 2                       # rows per D-plane in padded-row space
    RA = D * Hp                      # activation rows in padded-row space
    ROWS_SP = -(-((D + 2) * Hp) // 8) * 8   # padded scratch rows (mult. of 8)
    HALO_LO = Hp + 1                 # rows [0, HALO_LO) never written -> zero
    HALO_HI = Hp - 1 + RA            # rows [HALO_HI, ROWS_SP) never written -> zero
    assert WC % 128 == 0, "lane dim W*C must be a multiple of 128"
    # v6e/v7x: WC = 256 (C=32 or W=16) fills the 256-wide MXU N dimension.

    # ---- lane-dense, padded-row-space activation layout --------------------
    # NCDHW -> NDHWC -> (N, D, H, W*C) -> zero-pad H to H+2 -> (N, D*(H+2), W*C).
    # Rows d*Hp + h are valid for h < H; rows d*Hp + {H, H+1} are the h-halo
    # (exact zeros on input, garbage on output -- sliced off below).
    x = jnp.transpose(x_ncdhw, (0, 2, 3, 4, 1)).astype(jnp.float32)
    x = x.reshape(N, D, H, WC)
    x = jnp.pad(x, ((0, 0), (0, 0), (0, 2), (0, 0))).reshape(N, RA, WC)

    # ---- GroupNorm constants (lane = w*C + c) -------------------------------
    # gmat[i, j] = 1/(S*Cg) iff lanes i, j belong to the same channel group, so
    # [row_sums; row_sq_sums] @ gmat = [mean; E[x^2]] per lane (one tiny matmul).
    lane_g = (np.arange(WC) % C) // Cg
    gmat = (lane_g[:, None] == lane_g[None, :]).astype(np.float32) / float(S * Cg)
    gmat = jnp.asarray(gmat)

    def gn_pack(gamma, beta):
        gl = jnp.tile(gamma.reshape(C), (W,)).reshape(1, WC)
        bl = jnp.tile(beta.reshape(C), (W,)).reshape(1, WC)
        return jnp.concatenate([gl, bl], axis=0).astype(jnp.float32)  # (2, WC)

    gb1 = gn_pack(params["g1"], params["b1"])
    gb2 = gn_pack(params["g2"], params["b2"])

    # ---- conv weights: kh-stacked banded (3, 3*WC, WC) bf16 matrices --------
    # Bstack[kd][kh*WC + wi*C + ci, wo*C + co] = w[co, ci, kd, kh, wi-wo+1] for
    # |wi-wo| <= 1: the kw taps and W zero-padding live in the band structure,
    # the kh taps live in the stacked contraction (K = 3*WC per matmul).
    # v5e note: the band wastes ~W/3 of the MXU MACs; if W grows, move to a
    # K=3C gathered form instead of widening the band.
    def pack_conv(w):
        wt = np.transpose(np.asarray(w, np.float32), (2, 3, 4, 1, 0))  # kd,kh,kw,ci,co
        B = np.zeros((3, 3, W, C, W, C), np.float32)
        for kw in range(3):
            for wo in range(W):
                wi = wo + kw - 1
                if 0 <= wi < W:
                    B[:, :, wi, :, wo, :] = wt[:, :, kw]
        return jnp.asarray(B.reshape(3, 3 * WC, WC), jnp.bfloat16)

    w1 = pack_conv(params["w1"])
    w2 = pack_conv(params["w2"])
    cb1 = jnp.tile(params["cb1"].reshape(C), (W,)).reshape(1, WC).astype(jnp.float32)
    cb2 = jnp.tile(params["cb2"].reshape(C), (W,)).reshape(1, WC).astype(jnp.float32)

    # ------------------------------ kernel -----------------------------------
    def kernel(x_ref, gmat_ref, gb1_ref, w1_ref, cb1_ref,
               gb2_ref, w2_ref, cb2_ref, o_ref, sp_ref):
        # sp_ref: (ROWS_SP, 3*WC) bf16.  Lane block j holds the padded conv
        # input shifted by j rows, so sp_ref[q + kd*Hp, :] carries the 3 kh
        # taps of tap-group kd for output row q (K-stacked contraction).
        # Zero only the d-halo bands; interior rows are fully overwritten by
        # every conv's stores, and the activation's (zeroed) garbage rows land
        # exactly on the h-halo positions.
        sp_ref[0:HALO_LO, :] = jnp.zeros((HALO_LO, 3 * WC), jnp.bfloat16)
        sp_ref[HALO_HI:ROWS_SP, :] = jnp.zeros((ROWS_SP - HALO_HI, 3 * WC),
                                               jnp.bfloat16)

        gmat_v = gmat_ref[...]                                    # (WC, WC) f32
        row = jax.lax.broadcasted_iota(jnp.int32, (RA, 1), 0)
        valid = ((row % Hp) < H).astype(jnp.float32)              # (RA, 1)

        def group_norm_relu(y, gb_ref, mask_stats):
            # y: (RA, WC) f32 in padded-row space.  Single-pass f32 stats via
            # one small matmul giving [mean; E[x^2]] per lane.  Garbage rows
            # are masked out of the stats and zeroed in the output (they then
            # serve as the h-halo zeros for the following conv).
            ym = y * valid if mask_stats else y   # input halos already exact 0
            s = jnp.sum(ym, axis=0, keepdims=True)                # (1, WC)
            ss = jnp.sum(ym * ym, axis=0, keepdims=True)          # (1, WC)
            stats = jnp.dot(jnp.concatenate([s, ss], axis=0), gmat_v,
                            preferred_element_type=jnp.float32)   # (2, WC)
            mean = stats[0:1, :]
            var = stats[1:2, :] - mean * mean
            inv = jax.lax.rsqrt(var + EPS)
            scale = gb_ref[0:1, :] * inv                          # gamma * inv
            shift = gb_ref[1:2, :] - mean * scale                 # beta - mean*scale
            return jnp.maximum(y * scale + shift, 0.0) * valid

        def conv3(a, w_ref, cb_ref):
            # a: (RA, WC) f32 conv input with halo/garbage rows == 0.
            a_bf = a.astype(jnp.bfloat16)                         # cast ONCE
            for j in range(3):                                    # kh lane blocks
                sp_ref[Hp + 1 - j:Hp + 1 - j + RA, j * WC:(j + 1) * WC] = a_bf
            parts = []
            for kd in range(3):                                   # 3 matmuls, K = 3*WC
                lhs = sp_ref[kd * Hp:kd * Hp + RA, :]             # contiguous slab
                parts.append(jnp.dot(lhs, w_ref[kd],
                                     preferred_element_type=jnp.float32))
            return (parts[0] + parts[1]) + (parts[2] + cb_ref[...])

        h = group_norm_relu(x_ref[0], gb1_ref, mask_stats=False)
        h = conv3(h, w1_ref, cb1_ref)
        h = group_norm_relu(h, gb2_ref, mask_stats=True)
        h = conv3(h, w2_ref, cb2_ref)
        o_ref[0] = (h + x_ref[0]).astype(o_ref.dtype)   # residual: re-read x_ref

    # ----------------------------- pallas_call --------------------------------
    act_spec = pl.BlockSpec((1, RA, WC), lambda n: (n, 0, 0))

    def const_spec(shape):
        # Block never changes across the grid -> single pipeline buffer
        # (no re-fetch, half the VMEM footprint; matters most on v7x).
        return pl.BlockSpec(shape, lambda n: (0,) * len(shape),
                            pipeline_mode=pl.Buffered(1))

    out = pl.pallas_call(
        kernel,
        out_shape=jax.ShapeDtypeStruct((N, RA, WC), jnp.float32),
        grid_spec=pltpu.PrefetchScalarGridSpec(
            num_scalar_prefetch=0,
            grid=(N,),
            in_specs=[act_spec,
                      const_spec((WC, WC)),
                      const_spec((2, WC)), const_spec((3, 3 * WC, WC)),
                      const_spec((1, WC)),
                      const_spec((2, WC)), const_spec((3, 3 * WC, WC)),
                      const_spec((1, WC))],
            out_specs=act_spec,
            scratch_shapes=[pltpu.VMEM((ROWS_SP, 3 * WC), jnp.bfloat16)],
        ),
        compiler_params=pltpu.CompilerParams(
            dimension_semantics=("parallel",)),
    )(x, gmat, gb1, w1, cb1, gb2, w2, cb2)

    # Drop the h-halo (garbage) rows and return to NCDHW.
    out = out.reshape(N, D, Hp, W, C)[:, :, :H]
    return jnp.transpose(out, (0, 4, 1, 2, 3))


# ----------------------------- reference (pure JAX) --------------------------
def _reference(x, params):
    G = params["groups"]

    def gn(y, gamma, beta):
        N, C, D, H, W = y.shape
        yg = y.reshape(N, G, C // G, D, H, W)
        mean = yg.mean(axis=(2, 3, 4, 5), keepdims=True)
        var = ((yg - mean) ** 2).mean(axis=(2, 3, 4, 5), keepdims=True)
        yn = ((yg - mean) / jnp.sqrt(var + EPS)).reshape(N, C, D, H, W)
        return yn * gamma[None, :, None, None, None] + beta[None, :, None, None, None]

    def conv(y, w, b):
        o = jax.lax.conv_general_dilated(
            y, w, window_strides=(1, 1, 1), padding=[(1, 1)] * 3,
            dimension_numbers=("NCDHW", "OIDHW", "NCDHW"))
        return o + b[None, :, None, None, None]

    h = jax.nn.relu(gn(x, params["g1"], params["b1"]))
    h = conv(h, params["w1"], params["cb1"])
    h = jax.nn.relu(gn(h, params["g2"], params["b2"]))
    h = conv(h, params["w2"], params["cb2"])
    return h + x


if __name__ == "__main__":
    N, C, D, H, W = 2, 16, 8, 8, 8          # in_c=16 -> GroupNorm groups = 2
    key = jax.random.PRNGKey(0)
    kx, kw1, kb1, kw2, kb2 = jax.random.split(key, 5)

    x = jax.random.normal(kx, (N, C, D, H, W), jnp.float32)
    params = {
        "groups": C // 8,
        # GroupNorm affine params (PyTorch default init: gamma=1, beta=0)
        "g1": jnp.ones((C,), jnp.float32), "b1": jnp.zeros((C,), jnp.float32),
        "g2": jnp.ones((C,), jnp.float32), "b2": jnp.zeros((C,), jnp.float32),
        # Conv3d weights (Cout, Cin, 3, 3, 3) + bias, deterministic synthetic init
        "w1": 0.05 * jax.random.normal(kw1, (C, C, 3, 3, 3), jnp.float32),
        "cb1": 0.05 * jax.random.normal(kb1, (C,), jnp.float32),
        "w2": 0.05 * jax.random.normal(kw2, (C, C, 3, 3, 3), jnp.float32),
        "cb2": 0.05 * jax.random.normal(kb2, (C,), jnp.float32),
    }

    out = enblock_forward(x, params)
    out = jax.block_until_ready(out)

    ref = jax.block_until_ready(_reference(x, params))
    max_err = float(jnp.max(jnp.abs(out - ref)))
    assert out.shape == (N, C, D, H, W)
    # Conv matmul operands run in bf16 (f32 accumulation) -- intentional
    # precision contract, hence a looser tolerance than pure f32.
    assert max_err < 3e-2, f"mismatch vs reference: max abs err = {max_err}"

    print("KERNEL_OK")
</pallas_src>

<mosaic_0001>
module attributes {stable_mosaic.version = 11 : i64} {
  func.func @kernel(%arg0: i32, %arg1: memref<1x80x128xf32, #tpu.memory_space<vmem>>, %arg2: memref<128x128xf32, #tpu.memory_space<vmem>>, %arg3: memref<2x128xf32, #tpu.memory_space<vmem>>, %arg4: memref<3x384x128xbf16, #tpu.memory_space<vmem>>, %arg5: memref<1x128xf32, #tpu.memory_space<vmem>>, %arg6: memref<2x128xf32, #tpu.memory_space<vmem>>, %arg7: memref<3x384x128xbf16, #tpu.memory_space<vmem>>, %arg8: memref<1x128xf32, #tpu.memory_space<vmem>>, %arg9: memref<1x80x128xf32, #tpu.memory_space<vmem>>, %arg10: memref<104x384xbf16, #tpu.memory_space<vmem>>) attributes {dimension_semantics = [#tpu.dimension_semantics<parallel>], iteration_bounds = array<i64: 2>, scalar_prefetch = 0 : i64, scratch_operands = 1 : i64, tpu.core_type = #tpu.core_type<tc>, window_params = [{transform_indices = @transform_0, window_bounds = array<i64: 1, 80, 128>}, {pipeline_mode = #tpu.pipeline_mode<synchronous>, transform_indices = @transform_1, window_bounds = array<i64: 128, 128>}, {pipeline_mode = #tpu.pipeline_mode<synchronous>, transform_indices = @transform_2, window_bounds = array<i64: 2, 128>}, {pipeline_mode = #tpu.pipeline_mode<synchronous>, transform_indices = @transform_3, window_bounds = array<i64: 3, 384, 128>}, {pipeline_mode = #tpu.pipeline_mode<synchronous>, transform_indices = @transform_4, window_bounds = array<i64: 1, 128>}, {pipeline_mode = #tpu.pipeline_mode<synchronous>, transform_indices = @transform_5, window_bounds = array<i64: 2, 128>}, {pipeline_mode = #tpu.pipeline_mode<synchronous>, transform_indices = @transform_6, window_bounds = array<i64: 3, 384, 128>}, {pipeline_mode = #tpu.pipeline_mode<synchronous>, transform_indices = @transform_7, window_bounds = array<i64: 1, 128>}, {transform_indices = @transform_8, window_bounds = array<i64: 1, 80, 128>}]} {
    %cst = arith.constant 0.000000e+00 : bf16
    %0 = vector.broadcast %cst : bf16 to vector<11x384xbf16>
    %c0 = arith.constant 0 : index
    %c0_0 = arith.constant 0 : index
    %1 = vector.load %arg10[%c0, %c0_0] : memref<104x384xbf16, #tpu.memory_space<vmem>>, vector<11x384xbf16>
    tpu.vector_store %arg10[%c0, %c0_0], %0 {strides = array<i32>} : memref<104x384xbf16, #tpu.memory_space<vmem>>, vector<11x384xbf16>,
    %cst_1 = arith.constant 0.000000e+00 : bf16
    %2 = vector.broadcast %cst_1 : bf16 to vector<15x384xbf16>
    %c89 = arith.constant 89 : index
    %c0_2 = arith.constant 0 : index
    %3 = vector.load %arg10[%c89, %c0_2] : memref<104x384xbf16, #tpu.memory_space<vmem>>, vector<15x384xbf16>
    tpu.vector_store %arg10[%c89, %c0_2], %2 {strides = array<i32>} : memref<104x384xbf16, #tpu.memory_space<vmem>>, vector<15x384xbf16>,
    %c0_3 = arith.constant 0 : index
    %c0_4 = arith.constant 0 : index
    %4 = vector.load %arg2[%c0_3, %c0_4] : memref<128x128xf32, #tpu.memory_space<vmem>>, vector<128x128xf32>
    %5 = tpu.iota {dimensions = array<i32: 0>} : vector<80x1xi32>
    %c10_i32 = arith.constant 10 : i32
    %c0_i32 = arith.constant 0 : i32
    %6 = arith.cmpi eq, %c10_i32, %c0_i32 : i32
    %c1_i32 = arith.constant 1 : i32
    %7 = arith.select %6, %c1_i32, %c10_i32 : i32
    %8 = vector.broadcast %7 : i32 to vector<80x1xi32>
    %9 = arith.remsi %5, %8 : vector<80x1xi32>
    %c0_i32_5 = arith.constant 0 : i32
    %10 = vector.broadcast %c0_i32_5 : i32 to vector<80x1xi32>
    %11 = arith.cmpi ne, %9, %10 : vector<80x1xi32>
    %c0_i32_6 = arith.constant 0 : i32
    %12 = vector.broadcast %c0_i32_6 : i32 to vector<80x1xi32>
    %13 = arith.cmpi slt, %9, %12 : vector<80x1xi32>
    %c0_i32_7 = arith.constant 0 : i32
    %14 = arith.cmpi slt, %7, %c0_i32_7 : i32
    %15 = vector.broadcast %14 : i1 to vector<80x1xi1>
    %16 = vector.broadcast %15 : vector<80x1xi1> to vector<80x1xi1>
    %17 = arith.xori %13, %16 : vector<80x1xi1>
    %18 = arith.andi %17, %11 : vector<80x1xi1>
    %19 = vector.broadcast %7 : i32 to vector<80x1xi32>
    %20 = arith.addi %9, %19 : vector<80x1xi32>
    %21 = arith.select %18, %20, %9 : vector<80x1xi1>, vector<80x1xi32>
    %c8_i32 = arith.constant 8 : i32
    %22 = vector.broadcast %c8_i32 : i32 to vector<80x1xi32>
    %23 = arith.cmpi slt, %21, %22 : vector<80x1xi32>
    %24 = arith.extui %23 : vector<80x1xi1> to vector<80x1xi32>
    %25 = arith.sitofp %24 : vector<80x1xi32> to vector<80x1xf32>
    %c0_8 = arith.constant 0 : index
    %c0_9 = arith.constant 0 : index
    %c0_10 = arith.constant 0 : index
    %26 = vector.load %arg1[%c0_8, %c0_9, %c0_10] : memref<1x80x128xf32, #tpu.memory_space<vmem>>, vector<1x80x128xf32>
    %27 = vector.shape_cast %26 : vector<1x80x128xf32> to vector<80x128xf32>
    %cst_11 = arith.constant dense<0.000000e+00> : vector<128xf32>
    %28 = vector.multi_reduction <add>, %27, %cst_11 [0] : vector<80x128xf32> to vector<128xf32>
    %29 = vector.shape_cast %28 : vector<128xf32> to vector<1x128xf32>
    %30 = arith.mulf %27, %27 : vector<80x128xf32>
    %cst_12 = arith.constant dense<0.000000e+00> : vector<128xf32>
    %31 = vector.multi_reduction <add>, %30, %cst_12 [0] : vector<80x128xf32> to vector<128xf32>
    %32 = vector.shape_cast %31 : vector<128xf32> to vector<1x128xf32>
    %33 = tpu.concatenate %29, %32 in 0 : vector<1x128xf32>, vector<1x128xf32> -> vector<2x128xf32>
    %cst_13 = arith.constant dense<0.000000e+00> : vector<2x128xf32>
    %34 = tpu.matmul %33, %4, %cst_13 {dimension_numbers = #tpu.dot_dimension_numbers<[1], [0], [0], [1], [0, 0, 1, 1], [], []>} : vector<2x128xf32>, vector<128x128xf32>, vector<2x128xf32> -> vector<2x128xf32>
    %35 = vector.extract_strided_slice %34 {offsets = [0, 0], sizes = [1, 128], strides = [1, 1]} : vector<2x128xf32> to vector<1x128xf32>
    %36 = vector.extract_strided_slice %34 {offsets = [1, 0], sizes = [1, 128], strides = [1, 1]} : vector<2x128xf32> to vector<1x128xf32>
    %37 = arith.mulf %35, %35 : vector<1x128xf32>
    %38 = arith.subf %36, %37 : vector<1x128xf32>
    %cst_14 = arith.constant 9.99999974E-6 : f32
    %39 = vector.broadcast %cst_14 : f32 to vector<1x128xf32>
    %40 = arith.addf %38, %39 : vector<1x128xf32>
    %41 = math.rsqrt %40 : vector<1x128xf32>
    %c0_15 = arith.constant 0 : index
    %c0_16 = arith.constant 0 : index
    %42 = vector.load %arg3[%c0_15, %c0_16] : memref<2x128xf32, #tpu.memory_space<vmem>>, vector<1x128xf32>
    %43 = arith.mulf %42, %41 : vector<1x128xf32>
    %c1 = arith.constant 1 : index
    %c0_17 = arith.constant 0 : index
    %44 = vector.load %arg3[%c1, %c0_17] : memref<2x128xf32, #tpu.memory_space<vmem>>, vector<1x128xf32>
    %45 = arith.mulf %35, %43 : vector<1x128xf32>
    %46 = arith.subf %44, %45 : vector<1x128xf32>
    %47 = vector.broadcast %43 : vector<1x128xf32> to vector<80x128xf32>
    %48 = arith.mulf %27, %47 : vector<80x128xf32>
    %49 = vector.broadcast %46 : vector<1x128xf32> to vector<80x128xf32>
    %50 = arith.addf %48, %49 : vector<80x128xf32>
    %cst_18 = arith.constant 0.000000e+00 : f32
    %51 = vector.broadcast %cst_18 : f32 to vector<80x128xf32>
    %52 = arith.maximumf %50, %51 : vector<80x128xf32>
    %53 = vector.broadcast %25 : vector<80x1xf32> to vector<80x128xf32>
    %54 = arith.mulf %52, %53 : vector<80x128xf32>
    %55 = arith.truncf %54 : vector<80x128xf32> to vector<80x128xbf16>
    %c11 = arith.constant 11 : index
    %c0_19 = arith.constant 0 : index
    %56 = vector.load %arg10[%c11, %c0_19] : memref<104x384xbf16, #tpu.memory_space<vmem>>, vector<80x128xbf16>
    tpu.vector_store %arg10[%c11, %c0_19], %55 {strides = array<i32>} : memref<104x384xbf16, #tpu.memory_space<vmem>>, vector<80x128xbf16>,
    %c10 = arith.constant 10 : index
    %c128 = arith.constant 128 : index
    %57 = vector.load %arg10[%c10, %c128] : memref<104x384xbf16, #tpu.memory_space<vmem>>, vector<80x128xbf16>
    tpu.vector_store %arg10[%c10, %c128], %55 {strides = array<i32>} : memref<104x384xbf16, #tpu.memory_space<vmem>>, vector<80x128xbf16>,
    %c9 = arith.constant 9 : index
    %c256 = arith.constant 256 : index
    %58 = vector.load %arg10[%c9, %c256] : memref<104x384xbf16, #tpu.memory_space<vmem>>, vector<80x128xbf16>
    tpu.vector_store %arg10[%c9, %c256], %55 {strides = array<i32>} : memref<104x384xbf16, #tpu.memory_space<vmem>>, vector<80x128xbf16>,
    %c0_20 = arith.constant 0 : index
    %c0_21 = arith.constant 0 : index
    %59 = vector.load %arg10[%c0_20, %c0_21] : memref<104x384xbf16, #tpu.memory_space<vmem>>, vector<80x384xbf16>
    %c0_22 = arith.constant 0 : index
    %c0_23 = arith.constant 0 : index
    %c0_24 = arith.constant 0 : index
    %60 = vector.load %arg4[%c0_22, %c0_23, %c0_24] : memref<3x384x128xbf16, #tpu.memory_space<vmem>>, vector<1x384x128xbf16>
    %61 = vector.shape_cast %60 : vector<1x384x128xbf16> to vector<384x128xbf16>
    %cst_25 = arith.constant dense<0.000000e+00> : vector<80x128xf32>
    %62 = tpu.matmul %59, %61, %cst_25 {dimension_numbers = #tpu.dot_dimension_numbers<[1], [0], [0], [1], [0, 0, 1, 1], [], []>} : vector<80x384xbf16>, vector<384x128xbf16>, vector<80x128xf32> -> vector<80x128xf32>
    %c10_26 = arith.constant 10 : index
    %c0_27 = arith.constant 0 : index
    %63 = vector.load %arg10[%c10_26, %c0_27] : memref<104x384xbf16, #tpu.memory_space<vmem>>, vector<80x384xbf16>
    %c1_28 = arith.constant 1 : index
    %c0_29 = arith.constant 0 : index
    %c0_30 = arith.constant 0 : index
    %64 = vector.load %arg4[%c1_28, %c0_29, %c0_30] : memref<3x384x128xbf16, #tpu.memory_space<vmem>>, vector<1x384x128xbf16>
    %65 = vector.shape_cast %64 : vector<1x384x128xbf16> to vector<384x128xbf16>
    %cst_31 = arith.constant dense<0.000000e+00> : vector<80x128xf32>
    %66 = tpu.matmul %63, %65, %cst_31 {dimension_numbers = #tpu.dot_dimension_numbers<[1], [0], [0], [1], [0, 0, 1, 1], [], []>} : vector<80x384xbf16>, vector<384x128xbf16>, vector<80x128xf32> -> vector<80x128xf32>
    %c20 = arith.constant 20 : index
    %c0_32 = arith.constant 0 : index
    %67 = vector.load %arg10[%c20, %c0_32] : memref<104x384xbf16, #tpu.memory_space<vmem>>, vector<80x384xbf16>
    %c2 = arith.constant 2 : index
    %c0_33 = arith.constant 0 : index
    %c0_34 = arith.constant 0 : index
    %68 = vector.load %arg4[%c2, %c0_33, %c0_34] : memref<3x384x128xbf16, #tpu.memory_space<vmem>>, vector<1x384x128xbf16>
    %69 = vector.shape_cast %68 : vector<1x384x128xbf16> to vector<384x128xbf16>
    %cst_35 = arith.constant dense<0.000000e+00> : vector<80x128xf32>
    %70 = tpu.matmul %67, %69, %cst_35 {dimension_numbers = #tpu.dot_dimension_numbers<[1], [0], [0], [1], [0, 0, 1, 1], [], []>} : vector<80x384xbf16>, vector<384x128xbf16>, vector<80x128xf32> -> vector<80x128xf32>
    %71 = arith.addf %62, %66 : vector<80x128xf32>
    %c0_36 = arith.constant 0 : index
    %c0_37 = arith.constant 0 : index
    %72 = vector.load %arg5[%c0_36, %c0_37] : memref<1x128xf32, #tpu.memory_space<vmem>>, vector<1x128xf32>
    %73 = vector.broadcast %72 : vector<1x128xf32> to vector<80x128xf32>
    %74 = arith.addf %70, %73 : vector<80x128xf32>
    %75 = arith.addf %71, %74 : vector<80x128xf32>
    %76 = vector.broadcast %25 : vector<80x1xf32> to vector<80x128xf32>
    %77 = arith.mulf %75, %76 : vector<80x128xf32>
    %cst_38 = arith.constant dense<0.000000e+00> : vector<128xf32>
    %78 = vector.multi_reduction <add>, %77, %cst_38 [0] : vector<80x128xf32> to vector<128xf32>
    %79 = vector.shape_cast %78 : vector<128xf32> to vector<1x128xf32>
    %80 = arith.mulf %77, %77 : vector<80x128xf32>
    %cst_39 = arith.constant dense<0.000000e+00> : vector<128xf32>
    %81 = vector.multi_reduction <add>, %80, %cst_39 [0] : vector<80x128xf32> to vector<128xf32>
    %82 = vector.shape_cast %81 : vector<128xf32> to vector<1x128xf32>
    %83 = tpu.concatenate %79, %82 in 0 : vector<1x128xf32>, vector<1x128xf32> -> vector<2x128xf32>
    %cst_40 = arith.constant dense<0.000000e+00> : vector<2x128xf32>
    %84 = tpu.matmul %83, %4, %cst_40 {dimension_numbers = #tpu.dot_dimension_numbers<[1], [0], [0], [1], [0, 0, 1, 1], [], []>} : vector<2x128xf32>, vector<128x128xf32>, vector<2x128xf32> -> vector<2x128xf32>
    %85 = vector.extract_strided_slice %84 {offsets = [0, 0], sizes = [1, 128], strides = [1, 1]} : vector<2x128xf32> to vector<1x128xf32>
    %86 = vector.extract_strided_slice %84 {offsets = [1, 0], sizes = [1, 128], strides = [1, 1]} : vector<2x128xf32> to vector<1x128xf32>
    %87 = arith.mulf %85, %85 : vector<1x128xf32>
    %88 = arith.subf %86, %87 : vector<1x128xf32>
    %cst_41 = arith.constant 9.99999974E-6 : f32
    %89 = vector.broadcast %cst_41 : f32 to vector<1x128xf32>
    %90 = arith.addf %88, %89 : vector<1x128xf32>
    %91 = math.rsqrt %90 : vector<1x128xf32>
    %c0_42 = arith.constant 0 : index
    %c0_43 = arith.constant 0 : index
    %92 = vector.load %arg6[%c0_42, %c0_43] : memref<2x128xf32, #tpu.memory_space<vmem>>, vector<1x128xf32>
    %93 = arith.mulf %92, %91 : vector<1x128xf32>
    %c1_44 = arith.constant 1 : index
    %c0_45 = arith.constant 0 : index
    %94 = vector.load %arg6[%c1_44, %c0_45] : memref<2x128xf32, #tpu.memory_space<vmem>>, vector<1x128xf32>
    %95 = arith.mulf %85, %93 : vector<1x128xf32>
    %96 = arith.subf %94, %95 : vector<1x128xf32>
    %97 = vector.broadcast %93 : vector<1x128xf32> to vector<80x128xf32>
    %98 = arith.mulf %75, %97 : vector<80x128xf32>
    %99 = vector.broadcast %96 : vector<1x128xf32> to vector<80x128xf32>
    %100 = arith.addf %98, %99 : vector<80x128xf32>
    %cst_46 = arith.constant 0.000000e+00 : f32
    %101 = vector.broadcast %cst_46 : f32 to vector<80x128xf32>
    %102 = arith.maximumf %100, %101 : vector<80x128xf32>
    %103 = vector.broadcast %25 : vector<80x1xf32> to vector<80x128xf32>
    %104 = arith.mulf %102, %103 : vector<80x128xf32>
    %105 = arith.truncf %104 : vector<80x128xf32> to vector<80x128xbf16>
    %c11_47 = arith.constant 11 : index
    %c0_48 = arith.constant 0 : index
    %106 = vector.load %arg10[%c11_47, %c0_48] : memref<104x384xbf16, #tpu.memory_space<vmem>>, vector<80x128xbf16>
    tpu.vector_store %arg10[%c11_47, %c0_48], %105 {strides = array<i32>} : memref<104x384xbf16, #tpu.memory_space<vmem>>, vector<80x128xbf16>,
    %c10_49 = arith.constant 10 : index
    %c128_50 = arith.constant 128 : index
    %107 = vector.load %arg10[%c10_49, %c128_50] : memref<104x384xbf16, #tpu.memory_space<vmem>>, vector<80x128xbf16>
    tpu.vector_store %arg10[%c10_49, %c128_50], %105 {strides = array<i32>} : memref<104x384xbf16, #tpu.memory_space<vmem>>, vector<80x128xbf16>,
    %c9_51 = arith.constant 9 : index
    %c256_52 = arith.constant 256 : index
    %108 = vector.load %arg10[%c9_51, %c256_52] : memref<104x384xbf16, #tpu.memory_space<vmem>>, vector<80x128xbf16>
    tpu.vector_store %arg10[%c9_51, %c256_52], %105 {strides = array<i32>} : memref<104x384xbf16, #tpu.memory_space<vmem>>, vector<80x128xbf16>,
    %c0_53 = arith.constant 0 : index
    %c0_54 = arith.constant 0 : index
    %109 = vector.load %arg10[%c0_53, %c0_54] : memref<104x384xbf16, #tpu.memory_space<vmem>>, vector<80x384xbf16>
    %c0_55 = arith.constant 0 : index
    %c0_56 = arith.constant 0 : index
    %c0_57 = arith.constant 0 : index
    %110 = vector.load %arg7[%c0_55, %c0_56, %c0_57] : memref<3x384x128xbf16, #tpu.memory_space<vmem>>, vector<1x384x128xbf16>
    %111 = vector.shape_cast %110 : vector<1x384x128xbf16> to vector<384x128xbf16>
    %cst_58 = arith.constant dense<0.000000e+00> : vector<80x128xf32>
    %112 = tpu.matmul %109, %111, %cst_58 {dimension_numbers = #tpu.dot_dimension_numbers<[1], [0], [0], [1], [0, 0, 1, 1], [], []>} : vector<80x384xbf16>, vector<384x128xbf16>, vector<80x128xf32> -> vector<80x128xf32>
    %c10_59 = arith.constant 10 : index
    %c0_60 = arith.constant 0 : index
    %113 = vector.load %arg10[%c10_59, %c0_60] : memref<104x384xbf16, #tpu.memory_space<vmem>>, vector<80x384xbf16>
    %c1_61 = arith.constant 1 : index
    %c0_62 = arith.constant 0 : index
    %c0_63 = arith.constant 0 : index
    %114 = vector.load %arg7[%c1_61, %c0_62, %c0_63] : memref<3x384x128xbf16, #tpu.memory_space<vmem>>, vector<1x384x128xbf16>
    %115 = vector.shape_cast %114 : vector<1x384x128xbf16> to vector<384x128xbf16>
    %cst_64 = arith.constant dense<0.000000e+00> : vector<80x128xf32>
    %116 = tpu.matmul %113, %115, %cst_64 {dimension_numbers = #tpu.dot_dimension_numbers<[1], [0], [0], [1], [0, 0, 1, 1], [], []>} : vector<80x384xbf16>, vector<384x128xbf16>, vector<80x128xf32> -> vector<80x128xf32>
    %c20_65 = arith.constant 20 : index
    %c0_66 = arith.constant 0 : index
    %117 = vector.load %arg10[%c20_65, %c0_66] : memref<104x384xbf16, #tpu.memory_space<vmem>>, vector<80x384xbf16>
    %c2_67 = arith.constant 2 : index
    %c0_68 = arith.constant 0 : index
    %c0_69 = arith.constant 0 : index
    %118 = vector.load %arg7[%c2_67, %c0_68, %c0_69] : memref<3x384x128xbf16, #tpu.memory_space<vmem>>, vector<1x384x128xbf16>
    %119 = vector.shape_cast %118 : vector<1x384x128xbf16> to vector<384x128xbf16>
    %cst_70 = arith.constant dense<0.000000e+00> : vector<80x128xf32>
    %120 = tpu.matmul %117, %119, %cst_70 {dimension_numbers = #tpu.dot_dimension_numbers<[1], [0], [0], [1], [0, 0, 1, 1], [], []>} : vector<80x384xbf16>, vector<384x128xbf16>, vector<80x128xf32> -> vector<80x128xf32>
    %121 = arith.addf %112, %116 : vector<80x128xf32>
    %c0_71 = arith.constant 0 : index
    %c0_72 = arith.constant 0 : index
    %122 = vector.load %arg8[%c0_71, %c0_72] : memref<1x128xf32, #tpu.memory_space<vmem>>, vector<1x128xf32>
    %123 = vector.broadcast %122 : vector<1x128xf32> to vector<80x128xf32>
    %124 = arith.addf %120, %123 : vector<80x128xf32>
    %125 = arith.addf %121, %124 : vector<80x128xf32>
    %c0_73 = arith.constant 0 : index
    %c0_74 = arith.constant 0 : index
    %c0_75 = arith.constant 0 : index
    %126 = vector.load %arg1[%c0_73, %c0_74, %c0_75] : memref<1x80x128xf32, #tpu.memory_space<vmem>>, vector<1x80x128xf32>
    %127 = vector.shape_cast %126 : vector<1x80x128xf32> to vector<80x128xf32>
    %128 = arith.addf %125, %127 : vector<80x128xf32>
    %c0_76 = arith.constant 0 : index
    %c0_77 = arith.constant 0 : index
    %c0_78 = arith.constant 0 : index
    %129 = vector.load %arg9[%c0_76, %c0_77, %c0_78] : memref<1x80x128xf32, #tpu.memory_space<vmem>>, vector<1x80x128xf32>
    %130 = vector.shape_cast %129 : vector<1x80x128xf32> to vector<80x128xf32>
    %131 = vector.shape_cast %128 : vector<80x128xf32> to vector<1x80x128xf32>
    tpu.vector_store %arg9[%c0_76, %c0_77, %c0_78], %131 {strides = array<i32>} : memref<1x80x128xf32, #tpu.memory_space<vmem>>, vector<1x80x128xf32>,
    return
  }
  func.func @transform_0(%arg0: i32) -> (i32, i32, i32) {
    %c0_i32 = arith.constant 0 : i32
    %c0_i32_0 = arith.constant 0 : i32
    %c0_i32_1 = arith.constant 0 : i32
    return %arg0, %c0_i32, %c0_i32_0 : i32, i32, i32
  }
  func.func @transform_1(%arg0: i32) -> (i32, i32) {
    %c0_i32 = arith.constant 0 : i32
    %c0_i32_0 = arith.constant 0 : i32
    %c0_i32_1 = arith.constant 0 : i32
    return %c0_i32, %c0_i32_0 : i32, i32
  }
  func.func @transform_2(%arg0: i32) -> (i32, i32) {
    %c0_i32 = arith.constant 0 : i32
    %c0_i32_0 = arith.constant 0 : i32
    %c0_i32_1 = arith.constant 0 : i32
    return %c0_i32, %c0_i32_0 : i32, i32
  }
  func.func @transform_3(%arg0: i32) -> (i32, i32, i32) {
    %c0_i32 = arith.constant 0 : i32
    %c0_i32_0 = arith.constant 0 : i32
    %c0_i32_1 = arith.constant 0 : i32
    %c0_i32_2 = arith.constant 0 : i32
    return %c0_i32, %c0_i32_0, %c0_i32_1 : i32, i32, i32
  }
  func.func @transform_4(%arg0: i32) -> (i32, i32) {
    %c0_i32 = arith.constant 0 : i32
    %c0_i32_0 = arith.constant 0 : i32
    %c0_i32_1 = arith.constant 0 : i32
    return %c0_i32, %c0_i32_0 : i32, i32
  }
  func.func @transform_5(%arg0: i32) -> (i32, i32) {
    %c0_i32 = arith.constant 0 : i32
    %c0_i32_0 = arith.constant 0 : i32
    %c0_i32_1 = arith.constant 0 : i32
    return %c0_i32, %c0_i32_0 : i32, i32
  }
  func.func @transform_6(%arg0: i32) -> (i32, i32, i32) {
    %c0_i32 = arith.constant 0 : i32
    %c0_i32_0 = arith.constant 0 : i32
    %c0_i32_1 = arith.constant 0 : i32
    %c0_i32_2 = arith.constant 0 : i32
    return %c0_i32, %c0_i32_0, %c0_i32_1 : i32, i32, i32
  }
  func.func @transform_7(%arg0: i32) -> (i32, i32) {
    %c0_i32 = arith.constant 0 : i32
    %c0_i32_0 = arith.constant 0 : i32
    %c0_i32_1 = arith.constant 0 : i32
    return %c0_i32, %c0_i32_0 : i32, i32
  }
  func.func @transform_8(%arg0: i32) -> (i32, i32, i32) {
    %c0_i32 = arith.constant 0 : i32
    %c0_i32_0 = arith.constant 0 : i32
    %c0_i32_1 = arith.constant 0 : i32
    return %arg0, %c0_i32, %c0_i32_0 : i32, i32, i32
  }
}

</mosaic_0001>

<bundles_post_ra>
// kernel: tpu_custom_call.1
= control target key start
LH: loop header
LB: loop body
LE: loop exit
PB: predicated region body
PF: predicated region fallthrough
CT: control target
= control target key end

     0   :  { %s7332_s0 = inlined_call_operand.hbm [shape: f32[2,80,128], index: 0, kind: input, shape index: {}]   ;;  %s7333_s1 = inlined_call_operand.hbm [shape: f32[128,128], index: 1, kind: input, shape index: {}]   ;;  %s7334_s2 = inlined_call_operand.hbm [shape: f32[2,128], index: 2, kind: input, shape index: {}]   ;;  %s7335_s3 = inlined_call_operand.hbm [shape: bf16[3,384,128], index: 3, kind: input, shape index: {}]   ;;  %s7336_s4 = inlined_call_operand.vmem [shape: f32[1,128], index: 4, kind: input, shape index: {}]   ;;  %s7337_s5 = inlined_call_operand.vmem [shape: f32[2,128], index: 5, kind: input, shape index: {}]   ;;  %s7338_s6 = inlined_call_operand.hbm [shape: bf16[3,384,128], index: 6, kind: input, shape index: {}]   ;;  %s7339_s7 = inlined_call_operand.vmem [shape: f32[1,128], index: 7, kind: input, shape index: {}]   ;;  %s7340_s8 = inlined_call_operand.hbm [shape: f32[2,80,128], index: 8, kind: output, shape index: {}]  }
   0x1   :  { %7382 = sst [smem:[#allocation38_spill]] %s7333_s1 }
   0x2   :  { %7383 = sst [smem:[#allocation39_spill]] %s7334_s2 }
   0x3   :  { %7384 = sst [smem:[#allocation40_spill]] %s7335_s3 }
   0x4   :  { %7385 = sst [smem:[#allocation41_spill]] %s7338_s6 }
   0x5   :  { %13 = vsyncpa [#allocation4], 0 }
   0x6   :  { %15 = vsyncpa [#allocation4 + $0x1], 0 }
   0x7   :  { %16 = vsyncpa [#allocation7], 0 }
   0x8   :  { %17 = vsyncpa [#allocation10], 0 }
   0x9   :  { %18 = vsyncpa [#allocation5], 0 }
   0xa   :  { %20 = vsyncpa [#allocation5 + $0x1], 0  ;;  %s5593_s27 = smov 0   ;;  %s5595_s28 = smov 0  }
   0xb   :  { %s5597_s29 = smov 0   ;;  %s5599_s30 = smov 0  }
   0xc LB: > { %s5614_s9 = sadd.s32 4294967295, %s5534_s30   ;;  %s4242_s10 = sadd.s32 4294967294, %s5534_s30   ;;  %s5534_s30 = sphi %s5599_s30, %s7493_s30   ;;  %s5530_s29 = sphi %s5597_s29, %s7492_s29   ;;  %s5526_s28 = sphi %s5595_s28, %s7491_s28   ;;  %s5522_s27 = sphi %s5593_s27, %s7490_s27  }
   0xd   : > { %p46_p0 = scmp.ne.s32.totalorder %s5526_s28, %s5522_s27  ;;  %p47_p1 = scmp.eq.s32.totalorder %s5614_s9, 0 }
   0xe   : > { %p217_p2 = scmp.eq.s32.totalorder %s5614_s9, 1  ;;  %p223_p3 = scmp.eq.s32.totalorder %s4242_s10, 1 }
   0xf   : > { %p5623_p4 = por %p47_p1, %p46_p0  ;;  %p4243_p5 = scmp.ge.s32.totalorder %s5534_s30, 1 }
  0x10   : > { %p5628_p6 = por %p223_p3, %p46_p0  ;;  %p230_p7 = scmp.lt.s32.totalorder %s5534_s30, 3 }
  0x11   : > { %s7388_s1 = sld [smem:[#allocation38_spill]]  ;;  %s5536_s17 = smov [#allocation6]  }
  0x12   : > { %p5636_p8 = pnand %p4243_p5, %p230_p7  ;;  %s243_s18 = sshll.u32 %s5536_s17, 4  ;;  %s244_s18 = int_to_ptr.vmem [resolvable:$true] %s243_s18 }
  0x13   : > { %s7391_s3 = sld [smem:[#allocation40_spill]]  ;;  %s7341_s23 = smov 128  }
  0x14   : > { %p5208_p9 = pneg %p5636_p8  ;;  %s7342_s24 = smov 8  }
  0x15   : > { %s5539_s25 = smov [#allocation9]   ;;  %s5540_s10 = smov 64  }
  0x16   : > { %p5644_p10 = pnand %p5208_p9, %p47_p1  ;;  %s269_s26 = sshll.u32 %s5539_s25, 4  ;;  %s270_s26 = int_to_ptr.vmem [resolvable:$true] %s269_s26 }
  0x17   : > { %s241_s15 = sshll.u32 %s7388_s1, 4  ;;  %s5541_s13 = smov 4   ;;  %s242_s15 = int_to_ptr.hbm [resolvable:$true] %s241_s15 }
  0x18   : > { %5211 = dma.hbm_to_vmem [thread:$0]  (!%p5644_p10), %s242_s15, 2048, %s244_s18, [#allocation7], %s7341_s23, %s7341_s23, %s7342_s24  }
  0x19   : > { %s267_s22 = sshll.u32 %s7391_s3, 4  ;;  %s7392_s2 = sld [smem:[#allocation39_spill]]  ;;  %s268_s22 = int_to_ptr.hbm [resolvable:$true] %s267_s22 }
  0x1a   : > { %5217 = dma.hbm_to_vmem [thread:$0]  (!%p5644_p10), %s268_s22, 9216, %s270_s26, [#allocation10], %s5540_s10, %s5540_s10, %s5541_s13  }
  0x1b   : > { %s5542_s15 = smov [#allocation8]   ;;  %s7393_s6 = sld [smem:[#allocation41_spill]] }
  0x1c   : > { %s258_s18 = sshll.u32 %s5542_s15, 4  ;;  %s5543_s22 = smov [#allocation11]   ;;  %s259_s18 = int_to_ptr.vmem [resolvable:$true] %s258_s18 }
  0x1d   : > { %s289_s26 = sshll.u32 %s5543_s22, 4  ;;  %s5670_s14 = sadd.s32 1, %s5534_s30   ;;  %s290_s26 = int_to_ptr.vmem [resolvable:$true] %s289_s26 }
  0x1e   : > { %s33_s17 = sadd.s32 1, %s5530_s29  ;;  %s30_s15 = ssub.s32 %s5534_s30, %s5670_s14 }
  0x1f   : > { %s256_s20 = sshll.u32 %s7392_s2, 4  ;;  %p40_p12 = scmp.ne.s32.totalorder %s5530_s29, %s5526_s28  ;;  %s257_s20 = int_to_ptr.hbm [resolvable:$true] %s256_s20 }
  0x20   : > { %5214 = dma.hbm_to_vmem [thread:$0]  (!%p5644_p10), %s257_s20, 32, %s259_s18, [#allocation7]  }
  0x21   : > { %s287_s23 = sshll.u32 %s7393_s6, 4  ;;  %p31_p13 = scmp.eq.s32.totalorder %s30_s15, 0  ;;  %s288_s23 = int_to_ptr.hbm [resolvable:$true] %s287_s23 }
  0x22   : > { %5220 = dma.hbm_to_vmem [thread:$0]  (!%p5644_p10), %s288_s23, 9216, %s290_s26, [#allocation10], %s5540_s10, %s5540_s10, %s5541_s13  }
  0x23   : > { %p41_p0 = scmp.eq.s32.totalorder %s5534_s30, 0  ;;  %p5680_p3 = por %p217_p2, %p40_p12 }
  0x24   : > { %p5233_p5 = scmp.lt.s32.totalorder %s5534_s30, 2  ;;  %s306_s18 = sand.u32 1, %s5530_s29  }
  0x25   : > { %s5686_s20 = scalar_select %p31_p13, %s5530_s29, %s33_s17  }
  0x26   : > { %p42_p7 = por %p41_p0, %p40_p12  ;;  %s5184_s19 = smul.u32 80, %s306_s18 }
  0x27   : > { %s5185_s23 = smul.u32 80, %s5534_s30  ;;  %s307_s17 = scalar_lea.sflag [#allocation4], %s306_s18 }
  0x28   : > { %p5690_p9 = pnand %p5233_p5, %p42_p7  ;;  %s310_s26 = scalar_lea.vmem [#allocation3], %s5184_s19 }
  0x29   : > { %s315_s22 = scalar_lea.hbm %s7332_s0, %s5185_s23  ;;  %s318_s15 = sshll.u32 %s310_s26, 4  ;;  %s319_s15 = int_to_ptr.vmem [resolvable:$true] %s318_s15 }
  0x2a   : > { %s316_s24 = sshll.u32 %s315_s22, 4  ;;  %p5434_p10 = pneg %p5690_p9  ;;  %s317_s24 = int_to_ptr.hbm [resolvable:$true] %s316_s24 }
  0x2b   : > { %s5430_s1 = sshra.s32 %s317_s24, 4  ;;  %s5437_s13 = scalar_lea.hbm %s7332_s0, 160  ;;  %s5431_s1 = int_to_ptr.hbm [resolvable:$true] %s5430_s1 }
  0x2c   : > { %s5432_s2 = scalar_lea.hbm %s5431_s1, 80  ;;  %p5438_p0 = scmp.lt.s32.totalorder %s5431_s1, %s7332_s0 }
  0x2d   : > { %p5433_p2 = scmp.ne.s32.totalorder %s5431_s1, %s5432_s2  ;;  %p5439_p5 = scmp.lt.s32.totalorder %s5437_s13, %s5432_s2 }
  0x2f   : > { %p5435_p12 = pnand %p5434_p10, %p5433_p2  ;;  %p5440_p7 = por %p5439_p5, %p5438_p0 }
  0x31   : > { %p5436_p13 = pneg %p5435_p12 }
  0x33   : > { %p5441_p11 = pnand %p5440_p7, %p5436_p13 }
  0x35   : > { %5444 = shalt.err (!%p5441_p11)
}
  0x36   : > { %s7396_s18 = smov 8   ;;  %s7397_s19 = smov 128  }
  0x37   : > { %5224 = dma.hbm_to_vmem [thread:$0]  (!%p5690_p9), %s317_s24, 1280, %s319_s15, %s307_s17, %s7397_s19, %s7397_s19, %s7396_s18  }
  0x38   : > { %330 = sbr.rel (%p5636_p8) target bundleno = 1286 (0x506), region = 52 }
  0x3d   : > { %s5713_s3 = sand.u32 1, %s5526_s28  }
  0x3e   : > { %s5186_s1 = smul.u32 80, %s5713_s3  ;;  %s333_s2 = scalar_lea.sflag [#allocation4], %s5713_s3 }
  0x40   : > { %s5719_s6 = scalar_lea.vmem [#allocation3], %s5186_s1 }
  0x41   : > { %5505 = dma.done.wait (%p5623_p4), %s333_s2, 1280  }
  0x42   : > { %5507 = vsyncadd (%p5623_p4), %s333_s2, 4294966016 }
  0x43   : > { %5509 = dma.done.wait (%p47_p1), [#allocation7], 2080  }
  0x44   : > { %5511 = vsyncadd (%p47_p1), [#allocation7], 4294965216 }
  0x45   : > { %5513 = dma.done.wait (%p47_p1), [#allocation10], 18432  }
  0x46   : > { %5515 = vsyncadd (%p47_p1), [#allocation10], 4294948864  ;;  %v436_v0 = vld [vmem:[#allocation6 + $0x78] sm:$0xff]  ;;  %v435_v1 = vld [vmem:[#allocation6 + $0x70] sm:$0xff]  ;;  %vm7343_vm0 = vcmask 1040384   ;;  %vm393_vm9 = vcmask 1041408  }
  0x47   : > { %870 = vmatpush.msra.mxu0 %v436_v0  ;;  %v434_v2 = vld [vmem:[#allocation6 + $0x68] sm:$0xff]  ;;  %v433_v3 = vld [vmem:[#allocation6 + $0x60] sm:$0xff]  ;;  %v432_v6 = vld [vmem:[#allocation6 + $0x58] sm:$0xff]  ;;  %vm394_vm10 = vsmask.f32 1280  ;;  %vm396_vm11 = vcmask 1045508  }
  0x48   : > { %v5734_v4 = vld [vmem:[%s5719_s6] sm:$0xff]  ;;  %v5737_v5 = vld [vmem:[%s5719_s6 + $0x8] sm:$0xff]  ;;  %v5740_v7 = vld [vmem:[%s5719_s6 + $0x10] sm:$0xff]  ;;  %vm397_vm12 = vsmask.f32 5376  ;;  %vm406_vm15 = vcmask 1043456  }
  0x49   : > { %871 = vmatpush.msra.mxu0 %v435_v1  ;;  %v5743_v8 = vld [vmem:[%s5719_s6 + $0x18] sm:$0xff]  ;;  %v828_v9 = vadd.f32 %v5737_v5, %v5734_v4  ;;  %v843_v10 = vmul.f32 %v5734_v4, %v5734_v4  ;;  %v844_v11 = vmul.f32 %v5737_v5, %v5737_v5  ;;  %v845_v12 = vmul.f32 %v5740_v7, %v5740_v7  ;;  %v431_v13 = vld [vmem:[#allocation6 + $0x50] sm:$0xff]  ;;  %v5760_v19 = vld [vmem:[%s5719_s6 + $0x28] sm:$0xff]  ;;  %s7257_s13 = scalar_lea.vmem [#allocation12], %s5186_s1  ;;  %s5187_s25 = smul.u32 80, %s5614_s9 }
  0x4a   : > { %v5754_v14 = vld [vmem:[%s5719_s6 + $0x20] sm:$0xff]  ;;  %v846_v16 = vmul.f32 %v5743_v8, %v5743_v8  ;;  %v430_v18 = vld [vmem:[#allocation6 + $0x48] sm:$0xff]  ;;  %v824_v24 = vld [vmem:[%s5719_s6 + $0x30] sm:$0xff]  ;;  %v848_v26 = vmul.f32 %v5760_v19, %v5760_v19  ;;  %s4128_s1 = sshll.u32 %s7257_s13, 4  ;;  %s4116_s9 = scalar_lea.sflag [#allocation5], %s5713_s3  ;;  %s4129_s1 = int_to_ptr.vmem [resolvable:$true] %s4128_s1 }
  0x4b   : > { %872 = vmatpush.msra.mxu0 %v434_v2  ;;  %v829_v15 = vadd.f32 %v828_v9, %v5740_v7  ;;  %v853_v17 = vadd.f32 %v844_v11, %v843_v10  ;;  %v847_v21 = vmul.f32 %v5754_v14, %v5754_v14  ;;  %v429_v23 = vld [vmem:[#allocation6 + $0x40] sm:$0xff]  ;;  %v428_v28 = vld [vmem:[#allocation6 + $0x38] sm:$0xff]  ;;  %v849_v31 = vmul.f32 %v824_v24, %v824_v24  ;;  %v427_v33 = vld [vmem:[#allocation6 + $0x30] sm:$0xff]  ;;  %s4127_s19 = scalar_lea.hbm %s7340_s8, %s5187_s25  ;;  %s5480_s22 = scalar_lea.hbm %s7340_s8, 160 }
  0x4c   : > { %v825_v29 = vld [vmem:[%s5719_s6 + $0x38] sm:$0xff]  ;;  %v826_v34 = vld [vmem:[%s5719_s6 + $0x40] sm:$0xff]  ;;  %v827_v39 = vld [vmem:[%s5719_s6 + $0x48] sm:$0xff]  ;;  %s4130_s2 = sshll.u32 %s4127_s19, 4  ;;  %s4131_s2 = int_to_ptr.hbm [resolvable:$true] %s4130_s2 }
  0x4d   : > { %873 = vmatpush.msra.mxu0 %v433_v3  ;;  %v830_v20 = vadd.f32 %v829_v15, %v5743_v8  ;;  %v854_v22 = vadd.f32 %v853_v17, %v845_v12  ;;  %v850_v36 = vmul.f32 %v825_v29, %v825_v29  ;;  %v426_v38 = vld [vmem:[#allocation6 + $0x28] sm:$0xff]  ;;  %v851_v41 = vmul.f32 %v826_v34, %v826_v34  ;;  %v425_v43 = vld [vmem:[#allocation6 + $0x20] sm:$0xff]  ;;  %v424_v47 = vld [vmem:[#allocation6 + $0x18] sm:$0xff]  ;;  %s5474_s11 = sshra.s32 %s4131_s2, 4  ;;  %s5475_s11 = int_to_ptr.hbm [resolvable:$true] %s5474_s11 }
  0x4e   : > { %v852_v45 = vmul.f32 %v827_v39, %v827_v39  ;;  %v423_v50 = vld [vmem:[#allocation6 + $0x10] sm:$0xff]  ;;  %v422_v53 = vld [vmem:[#allocation6 + $0x8] sm:$0xff]  ;;  %v421_v56 = vld [vmem:[#allocation6] sm:$0xff]  ;;  %v437_v3 = vlaneseq  ;;  %s5476_s16 = scalar_lea.hbm %s5475_s11, 80  ;;  %p5481_p11 = scmp.lt.s32.totalorder %s5475_s11, %s7340_s8 }
  0x4f   : > { %874 = vmatpush.msra.mxu0 %v432_v6  ;;  %v831_v25 = vadd.f32 %v830_v20, %v5754_v14  ;;  %v855_v27 = vadd.f32 %v854_v22, %v846_v16  ;;  %p5477_p1 = scmp.ne.s32.totalorder %s5475_s11, %s5476_s16  ;;  %p5482_p9 = scmp.lt.s32.totalorder %s5480_s22, %s5476_s16 }
  0x50   : > { %v5774_v6 = vshrl.u32 %v437_v3, 7 }
  0x51   : > { %875 = vmatpush.msra.mxu0 %v431_v13  ;;  %v832_v30 = vadd.f32 %v831_v25, %v5760_v19  ;;  %v856_v32 = vadd.f32 %v855_v27, %v847_v21  ;;  %p5478_p4 = pnand %p5477_p1, %p5680_p3  ;;  %p5483_p2 = por %p5482_p9, %p5481_p11 }
  0x52   : > { %v5777_v9 = vadd.s32 8, %v5774_v6  ;;  %v5780_v10 = vadd.s32 16, %v5774_v6  ;;  %v5783_v11 = vadd.s32 24, %v5774_v6  ;;  %v451_v12 = vand.u32 65535, %v5774_v6 }
  0x53   : > { %876 = vmatpush.msra.mxu0 %v430_v18  ;;  %v833_v35 = vadd.f32 %v832_v30, %v824_v24  ;;  %v857_v37 = vadd.f32 %v856_v32, %v848_v26  ;;  %v452_v16 = vshrl.u32 %v5774_v6, 16  ;;  %p5479_p8 = pneg %p5478_p4 }
  0x54   : > { %v480_v13 = vand.u32 65535, %v5777_v9  ;;  %v509_v15 = vand.u32 65535, %v5780_v10  ;;  %v455_v17 = vmul.u32 52428, %v451_v12  ;;  %v481_v18 = vshrl.u32 %v5777_v9, 16 }
  0x55   : > { %877 = vmatpush.msra.mxu0 %v429_v23  ;;  %v834_v40 = vadd.f32 %v833_v35, %v825_v29  ;;  %v858_v42 = vadd.f32 %v857_v37, %v849_v31  ;;  %v510_v21 = vshrl.u32 %v5780_v10, 16  ;;  %v538_v23 = vand.u32 65535, %v5783_v11  ;;  %p5484_p10 = pnand %p5483_p2, %p5479_p8 }
  0x56   : > { %v484_v20 = vmul.u32 52428, %v480_v13  ;;  %v5791_v22 = vmul.u32 52428, %v509_v15  ;;  %v539_v24 = vshrl.u32 %v5783_v11, 16  ;;  %v454_v25 = vmul.u32 52429, %v451_v12 }
  0x57   : > { %878 = vmatpush.msra.mxu0 %v428_v28  ;;  %v835_v44 = vadd.f32 %v834_v40, %v826_v34  ;;  %v859_v46 = vadd.f32 %v858_v42, %v850_v36  ;;  %v456_v26 = vmul.u32 52429, %v452_v16  ;;  %v458_v27 = vshll.u32 %v455_v17, 16 }
  0x58   : > { %v483_v28 = vmul.u32 52429, %v480_v13  ;;  %v485_v29 = vmul.u32 52429, %v481_v18  ;;  %v487_v30 = vshll.u32 %v484_v20, 16  ;;  %v512_v31 = vmul.u32 52429, %v509_v15 }
  0x59   : > { %879 = vmatpush.msra.mxu0 %v427_v33  ;;  %v836_v48 = vadd.f32 %v835_v44, %v827_v39  ;;  %v860_v49 = vadd.f32 %v859_v46, %v851_v41  ;;  %v5795_v32 = vmul.u32 52429, %v510_v21  ;;  %v457_v33 = vmul.u32 52428, %v452_v16 }
  0x5a   : > { %v460_v34 = vshll.u32 %v456_v26, 16  ;;  %vm462_vm1 = vc.u32 %v454_v25, %v458_v27  ;;  %v5544_v35 = vmov 0   ;;  %v464_v37 = vadd.s32 %v458_v27, %v454_v25  ;;  %v4997_v25 = vld [vmem:[#allocation9 + $0x30] sm:$0xff] }
  0x5b   : > { %880 = vmatpush.msra.mxu0 %v426_v38  ;;  %v837_v51 = vrot.slane %v836_v48, 4  ;;  %v861_v52 = vadd.f32 %v860_v49, %v852_v45  ;;  %391 = vst [vmem:[#allocation2] sm:$0xff] %v5544_v35  ;;  %v463_v36 = vsel %vm462_vm1, 1, %v5544_v35  ;;  %v486_v38 = vmul.u32 52428, %v481_v18 }
  0x5c   : > { %v489_v39 = vshll.u32 %v485_v29, 16  ;;  %v465_v40 = vadd.s32 %v463_v36, %v457_v33  ;;  %392 = vst [vmem:[#allocation2 + $0x8] sm:$0xf] %v5544_v35  ;;  %vm491_vm2 = vc.u32 %v483_v28, %v487_v30  ;;  %v493_v41 = vadd.s32 %v487_v30, %v483_v28  ;;  %v5022_v33 = vld [vmem:[#allocation9 + $0xf8] sm:$0xff] }
  0x5d   : > { %881 = vmatpush.msra.mxu0 %v425_v43  ;;  %v838_v54 = vadd.f32 %v837_v51, %v836_v48  ;;  %v862_v55 = vrot.slane %v861_v52, 4  ;;  %v5800_v42 = vmul.u32 52428, %v538_v23  ;;  %vm466_vm3 = vc.u32 %v464_v37, %v460_v34  ;;  %419 = vst [vmem:[#allocation2 + $0x90] sm:$0xff] %v5544_v35  ;;  %v5030_v34 = vld [vmem:[#allocation9 + $0x138] sm:$0xff]  ;;  %1618 = vmatpush.bf16.msra.mxu1 %v5022_v33 }
  0x5e   : > { %v492_v43 = vsel %vm491_vm2, 1, %v5544_v35  ;;  %v515_v44 = vmul.u32 52428, %v510_v21  ;;  %v516_v45 = vshll.u32 %v5791_v22, 16  ;;  %v459_v46 = vshrl.u32 %v455_v17, 16  ;;  %420 = vst [vmem:[#allocation2 + $0x98] sm:$0xf] %v5544_v35  ;;  %1652 = vmatpush.bf16.msra.mxu2 %v5030_v34 }
  0x5f   : > { %882 = vmatpush.msra.mxu0 %v424_v47  ;;  %v839_v57 = vrot.slane %v838_v54, 2  ;;  %v863_v58 = vadd.f32 %v862_v55, %v861_v52  ;;  %v467_v47 = vsel %vm466_vm3, 1, %v5544_v35  ;;  %v494_v48 = vadd.s32 %v492_v43, %v486_v38  ;;  %vm5857_vm3 = vmand %vm393_vm9, %vm394_vm10 }
  0x60   : > { %v518_v49 = vshll.u32 %v5795_v32, 16  ;;  %v488_v51 = vshrl.u32 %v484_v20, 16  ;;  %vm495_vm4 = vc.u32 %v493_v41, %v489_v39  ;;  %vm520_vm5 = vc.u32 %v512_v31, %v516_v45  ;;  %v5037_v41 = vld [vmem:[#allocation9 + $0x170] sm:$0xff] }
  0x61   : > { %883 = vmatpush.msra.mxu0 %v423_v50  ;;  %v840_v59 = vadd.f32 %v839_v57, %v838_v54  ;;  %v864_v60 = vrot.slane %v863_v58, 2  ;;  %v469_v50 = vadd.s32 %v467_v47, %v465_v40  ;;  %v461_v52 = vshrl.u32 %v456_v26, 16  ;;  %v4996_v40 = vld [vmem:[#allocation9 + $0x28] sm:$0xff] }
  0x62   : > { %v496_v54 = vsel %vm495_vm4, 1, %v5544_v35  ;;  %v521_v57 = vsel %vm520_vm5, 1, %v5544_v35  ;;  %v544_v12 = vmul.u32 52428, %v539_v24  ;;  %v519_v30 = vshrl.u32 %v5795_v32, 16  ;;  %v5029_v32 = vld [vmem:[#allocation9 + $0x130] sm:$0xff]  ;;  %vm5863_vm5 = vmand %vm396_vm11, %vm397_vm12 }
  0x63   : > { %884 = vmatpush.msra.mxu0 %v422_v53  ;;  %v841_v61 = vrot.slane %v840_v59, 1  ;;  %v865_v62 = vadd.f32 %v864_v60, %v863_v58  ;;  %v490_v53 = vshrl.u32 %v485_v29, 16  ;;  %v470_v55 = vadd.s32 %v469_v50, %v459_v46  ;;  %1653 = vmatpush.bf16.msra.mxu2 %v5029_v32  ;;  %v5033_v32 = vld [vmem:[#allocation9 + $0x150] sm:$0xff] }
  0x64   : > { %v522_v58 = vadd.s32 %v516_v45, %v512_v31  ;;  %v541_v60 = vmul.u32 52429, %v538_v23  ;;  %v5820_v23 = vadd.s32 32, %v5774_v6  ;;  %v546_v36 = vshrl.u32 %v5800_v42, 16 }
  0x65   : > { %885 = vmatpush.msra.mxu0 %v421_v56  ;;  %v842_v63 = vadd.f32 %v841_v61, %v840_v59  ;;  %v866_v0 = vrot.slane %v865_v62, 1  ;;  %v498_v56 = vadd.s32 %v496_v54, %v494_v48  ;;  %v523_v59 = vadd.s32 %v521_v57, %v515_v44  ;;  %v5021_v44 = vld [vmem:[#allocation9 + $0xf0] sm:$0xff]  ;;  %v5020_v57 = vld [vmem:[#allocation9 + $0xe8] sm:$0xff] }
  0x66   : > { %v5810_v61 = vmul.u32 52429, %v539_v24  ;;  %vm524_vm6 = vc.u32 %v522_v58, %v518_v49  ;;  %v5038_v24 = vld [vmem:[#allocation9 + $0x178] sm:$0xff]  ;;  %v567_v38 = vand.u32 65535, %v5820_v23  ;;  %v568_v43 = vshrl.u32 %v5820_v23, 16  ;;  %1619 = vmatpush.bf16.msra.mxu1 %v5021_v44  ;;  %v5028_v58 = vld [vmem:[#allocation9 + $0x128] sm:$0xff] }
  0x67   : > { %v867_v1 = vadd.f32 %v866_v0, %v865_v62  ;;  %v4998_v62 = vld [vmem:[#allocation9 + $0x38] sm:$0xff]  ;;  %v499_v0 = vadd.s32 %v498_v56, %v488_v51  ;;  %v525_v3 = vsel %vm524_vm6, 1, %v5544_v35  ;;  %1686 = vmatpush.bf16.msra.mxu3 %v5038_v24  ;;  %v5036_v51 = vld [vmem:[#allocation9 + $0x168] sm:$0xff]  ;;  %vm407_vm1 = vsmask.f32 7938  ;;  %1654 = vmatpush.bf16.msra.mxu2 %v5028_v58  ;;  %v5025_v58 = vld [vmem:[#allocation9 + $0x110] sm:$0xff] }
  0x68   : > { %v547_v13 = vshll.u32 %v5810_v61, 16  ;;  %1975 = vmatpush.bf16.msrb.mxu0 %v4998_v62  ;;  %v527_v17 = vadd.s32 %v525_v3, %v523_v59  ;;  %v548_v46 = vshrl.u32 %v5810_v61, 16  ;;  %v5839_v54 = vmul.u32 52429, %v567_v38  ;;  %v4994_v61 = vld [vmem:[#allocation9 + $0x18] sm:$0xff]  ;;  %v5035_v62 = vld [vmem:[#allocation9 + $0x160] sm:$0xff] }
  0x69   : > { %v869_v2 = vsel %vm7343_vm0, %v842_v63, %v867_v1  ;;  %v471_v63 = vadd.s32 %v470_v55, %v461_v52  ;;  %v545_v1 = vshll.u32 %v5800_v42, 16  ;;  %v500_v16 = vadd.s32 %v499_v0, %v490_v53  ;;  %v4995_v42 = vld [vmem:[#allocation9 + $0x20] sm:$0xff]  ;;  %v400_v3 = vld [vmem:[#allocation2 + $0xc] sm:$0x33] }
  0x6a   : > { %886 = vmatmul.f32.vlgmr.msra.gmra.mxu0 %v869_v2  ;;  %v517_v2 = vshrl.u32 %v5791_v22, 16  ;;  %v5837_v53 = vadd.s32 40, %v5774_v6  ;;  %v5841_v55 = vmul.u32 52428, %v567_v38  ;;  %v5846_v56 = vmul.u32 52429, %v568_v43  ;;  %1620 = vmatpush.bf16.msra.mxu1 %v5020_v57  ;;  %v5026_v38 = vld [vmem:[#allocation9 + $0x118] sm:$0xff] }
  0x6b   : > { %v472_v15 = vshrl.u32 %v471_v63, 3  ;;  %vm549_vm7 = vc.u32 %v541_v60, %v545_v1  ;;  %v551_v21 = vadd.s32 %v545_v1, %v541_v60  ;;  %v501_v26 = vshrl.u32 %v500_v16, 3  ;;  %1687 = vmatpush.bf16.msra.mxu3 %v5037_v41  ;;  %v5019_v1 = vld [vmem:[#allocation9 + $0xe0] sm:$0xff] }
  0x6c   : > { %v550_v20 = vsel %vm549_vm7, 1, %v5544_v35  ;;  %1976 = vmatpush.bf16.msrb.mxu0 %v4997_v25  ;;  %v528_v31 = vadd.s32 %v527_v17, %v517_v2  ;;  %vm409_vm4 = vcmask 1047556   ;;  %vm410_vm6 = vsmask.f32 7954 }
  0x6d   : > { %v552_v27 = vadd.s32 %v550_v20, %v544_v12  ;;  %vm553_vm8 = vc.u32 %v551_v21, %v547_v13  ;;  %v473_v29 = vmul.u32 10, %v472_v15  ;;  %v502_v45 = vmul.u32 10, %v501_v26  ;;  %v403_v12 = vld [vmem:[#allocation2 + $0x14] sm:$0x3]  ;;  %v5027_v15 = vld [vmem:[#allocation9 + $0x120] sm:$0xff] }
  0x6e   : > { %v554_v37 = vsel %vm553_vm8, 1, %v5544_v35  ;;  %v529_v50 = vadd.s32 %v528_v31, %v519_v30  ;;  %v404_v17 = vsel %vm5857_vm3, 0, %v403_v12  ;;  %vm399_vm8 = vmor %vm5863_vm5, %vm5857_vm3  ;;  %v574_v26 = vshll.u32 %v5841_v55, 16  ;;  %1621 = vmatpush.bf16.msra.mxu1 %v5019_v1  ;;  %1655 = vmatpush.bf16.msra.mxu2 %v5027_v15  ;;  %v5032_v12 = vld [vmem:[#allocation9 + $0x148] sm:$0xff] }
  0x6f   : > { %v556_v47 = vadd.s32 %v554_v37, %v552_v27  ;;  %v5834_v49 = vsub.s32 %v5774_v6, %v473_v29  ;;  %v5849_v59 = vsub.s32 %v5777_v9, %v502_v45  ;;  %1688 = vmatpush.bf16.msra.mxu3 %v5036_v51  ;;  %v7398_v9 = vmov 0  ;;  %405 = vst [vmem:[#allocation2 + $0x14] sm:$0x3] %v404_v17  ;;  %v5018_v37 = vld [vmem:[#allocation9 + $0xd8] sm:$0xff] }
  0x70   : > { %1977 = vmatpush.bf16.msrb.mxu0 %v4996_v40  ;;  %v530_v0 = vshrl.u32 %v529_v50, 3  ;;  %v7399_v9 = vsel %vm5857_vm3, 4294967295, %v7398_v9  ;;  %v401_v29 = vsel %vm399_vm8, 0, %v400_v3  ;;  %v573_v31 = vmul.u32 52428, %v568_v43  ;;  %v4992_v40 = vld [vmem:[#allocation9 + $0x8] sm:$0xff] }
  0x71   : > { %v557_v52 = vadd.s32 %v556_v47, %v546_v36  ;;  %vm738_vm13 = vcmp.ne.s32.totalorder %v5834_v49, 0  ;;  %vm748_vm14 = vcmp.lt.s32.totalorder %v5834_v49, 0  ;;  %v768_v63 = vadd.s32 10, %v5834_v49  ;;  %7400 = vst [vmem:[#allocation17_spill] sm:$0xff] %v7399_v9 }
  0x72   : > { %v531_v13 = vmul.u32 10, %v530_v0  ;;  %vm739_vm7 = vcmp.ne.s32.totalorder %v5849_v59, 0  ;;  %vm749_vm9 = vcmp.lt.s32.totalorder %v5849_v59, 0  ;;  %v5881_v24 = vadd.s32 10, %v5849_v59  ;;  %vm758_vm12 = vmand %vm748_vm14, %vm738_vm13  ;;  %402 = vst [vmem:[#allocation2 + $0xc] sm:$0x33] %v401_v29  ;;  %1622 = vmatpush.bf16.msra.mxu1 %v5018_v37  ;;  %1656 = vmatpush.bf16.msra.mxu2 %v5026_v38 }
  0x73   : > { %v558_v60 = vadd.s32 %v557_v52, %v548_v46  ;;  %1689 = vmatpush.bf16.msra.mxu3 %v5035_v62  ;;  %v778_v30 = vsel %vm758_vm12, %v768_v63, %v5834_v49  ;;  %v575_v33 = vshrl.u32 %v5841_v55, 16  ;;  %v576_v34 = vshll.u32 %v5846_v56, 16  ;;  %v413_v46 = vld [vmem:[#allocation2 + $0x84] sm:$0xff] }
  0x74   : > { %1978 = vmatpush.bf16.msrb.mxu0 %v4995_v42  ;;  %v5877_v25 = vsub.s32 %v5780_v10, %v531_v13  ;;  %vm788_vm13 = vcmp.lt.s32.totalorder %v778_v30, 8  ;;  %v5545_v41 = vmov 0.0   ;;  %v7405_v45 = vmov 0  ;;  %v4991_v62 = vld [vmem:[#allocation9] sm:$0xff]  ;;  %v5016_v29 = vld [vmem:[#allocation9 + $0xc8] sm:$0xff] }
  0x75   : > { %v559_v2 = vshrl.u32 %v558_v60, 3  ;;  %v5911_v43 = vsel %vm788_vm13, 1.0, %v5545_v41  ;;  %v580_v47 = vadd.s32 %v574_v26, %v5839_v54  ;;  %vm5927_vm13 = vmand %vm409_vm4, %vm410_vm6  ;;  %v597_v52 = vshrl.u32 %v5837_v53, 16  ;;  %v5024_v30 = vld [vmem:[#allocation9 + $0x108] sm:$0xff] }
  0x76   : > { %vm740_vm14 = vcmp.ne.s32.totalorder %v5877_v25, 0  ;;  %vm750_vm12 = vcmp.lt.s32.totalorder %v5877_v25, 0  ;;  %v770_v49 = vadd.s32 10, %v5877_v25  ;;  %vm759_vm4 = vmand %vm749_vm9, %vm739_vm7  ;;  %1657 = vmatpush.bf16.msra.mxu2 %v5025_v58 }
  0x77   : > { %v560_v20 = vmul.u32 10, %v559_v2  ;;  %vm5954_vm6 = vmand %vm750_vm12, %vm740_vm14  ;;  %v779_v15 = vsel %vm759_vm4, %v5881_v24, %v5849_v59  ;;  %v5960_v17 = vmul.u32 52429, %v597_v52  ;;  %v5979_v24 = vadd.s32 56, %v5774_v6 }
  0x78   : > { %1979 = vmatpush.bf16.msrb.mxu0 %v4994_v61  ;;  %v5940_v61 = vadd.s32 48, %v5774_v6  ;;  %vm5973_vm9 = vcmp.lt.s32.totalorder %v779_v15, 8  ;;  %vm1078_vm12 = vcmask 1043457  }
  0x79   : > { %v5892_v10 = vsub.s32 %v5783_v11, %v560_v20  ;;  %v577_v11 = vshrl.u32 %v5846_v56, 16  ;;  %v5997_v38 = vsel %vm5973_vm9, 1.0, %v5545_v41 }
  0x7a   : > { %1658 = vmatpush.bf16.msra.mxu2 %v5024_v30 }
  0x7b   : > { %vm741_vm8 = vcmp.ne.s32.totalorder %v5892_v10, 0  ;;  %vm751_vm0 = vcmp.lt.s32.totalorder %v5892_v10, 0  ;;  %v771_v50 = vadd.s32 10, %v5892_v10 }
  0x7c   : > { %vm5966_vm7 = vmand %vm751_vm0, %vm741_vm8 }
  0xe7   : > { %v5816_v18 = vpop.f32.mrf.mxu0 }
  0xe8   : > { %v890_v22 = vmul.f32 %v5816_v18, %v5816_v18 }
  0xea   : > { %v892_v28 = vrot.slane %v890_v22, 7  ;;  %v4993_v22 = vld [vmem:[#allocation9 + $0x10] sm:$0xff] }
  0xeb   : > { %1980 = vmatpush.bf16.msrb.mxu0 %v4993_v22  ;;  %v780_v22 = vsel %vm5954_vm6, %v770_v49, %v5877_v25  ;;  %v781_v25 = vsel %vm5966_vm7, %v771_v50, %v5892_v10  ;;  %v625_v50 = vand.u32 65535, %v5940_v61  ;;  %vm966_vm7 = vsmask.f32 5392 }
  0xec   : > { %v894_v39 = vsub.f32 %v5816_v18, %v892_v28  ;;  %v5034_v28 = vld [vmem:[#allocation9 + $0x158] sm:$0xff]  ;;  %vm790_vm0 = vcmp.lt.s32.totalorder %v780_v22, 8  ;;  %vm5987_vm14 = vcmp.lt.s32.totalorder %v781_v25, 8 }
  0xed   : > { %1690 = vmatpush.bf16.msra.mxu3 %v5034_v28  ;;  %v906_v28 = vld [vmem:[#allocation8] sm:$0x1]  ;;  %v6000_v10 = vsel %vm790_vm0, 1.0, %v5545_v41  ;;  %v6009_v42 = vsel %vm5987_vm14, 1.0, %v5545_v41  ;;  %v6018_v58 = vmul.u32 52429, %v625_v50  ;;  %vm1107_vm0 = vcmask 1044484  }
  0xee   : > { %v5831_v48 = vadd.f32 1e-05, %v894_v39  ;;  %v605_v39 = vshll.u32 %v5960_v17, 16  ;;  %7418 = vst [vmem:[#allocation19_spill] sm:$0xff] %v6009_v42 }
  0xef   : > { %1981 = vmatpush.bf16.msrb.mxu0 %v4992_v40 }
  0xf0   : > { %5285 = vrsqrt.f32 %v5831_v48  ;;  %vm902_vm2 = vweird.f32 %v5831_v48 }
  0xf1   : > { %1691 = vmatpush.bf16.msra.mxu3 %v5033_v32 }
  0xf3   : > { %1982 = vmatpush.bf16.msrb.mxu0 %v4991_v62 }
  0xf5   : > { %1692 = vmatpush.bf16.msra.mxu3 %v5032_v12 }
  0xf6   : > { %v5870_v21 = vpop.eup %5285 }
  0xf7   : > { %v897_v27 = vmul.f32 %v5870_v21, %v5831_v48  ;;  %vm903_vm11 = vweird.f32 %v5870_v21  ;;  %v596_v48 = vand.u32 65535, %v5837_v53 }
  0xf8   : > { %vm5906_vm5 = vmor %vm902_vm2, %vm903_vm11  ;;  %vm578_vm11 = vc.u32 %v5839_v54, %v574_v26  ;;  %v5017_v54 = vld [vmem:[#allocation9 + $0xd0] sm:$0xff] }
  0xf9   : > { %v898_v36 = vmul.f32 %v5870_v21, %v897_v27  ;;  %vm5918_vm2 = vmand %vm406_vm15, %vm407_vm1  ;;  %v579_v51 = vsel %vm578_vm11, 1, %v5544_v35  ;;  %vm582_vm1 = vc.u32 %v580_v47, %v576_v34  ;;  %v599_v1 = vmul.u32 52429, %v596_v48  ;;  %1623 = vmatpush.bf16.msra.mxu1 %v5017_v54  ;;  %v5015_v47 = vld [vmem:[#allocation9 + $0xc0] sm:$0xff] }
  0xfa   : > { %v7406_v45 = vsel %vm5918_vm2, 4294967295, %v7405_v45  ;;  %vm412_vm15 = vmor %vm5927_vm13, %vm5918_vm2  ;;  %v581_v60 = vadd.s32 %v579_v51, %v573_v31  ;;  %v583_v0 = vsel %vm582_vm1, 1, %v5544_v35  ;;  %v5947_v2 = vmul.u32 52428, %v596_v48  ;;  %v5023_v48 = vld [vmem:[#allocation9 + $0x100] sm:$0xff] }
  0xfb   : > { %v899_v44 = vmul.f32 0.5, %v898_v36  ;;  %7407 = vst [vmem:[#allocation18_spill] sm:$0xff] %v7406_v45  ;;  %v414_v63 = vsel %vm412_vm15, 0, %v413_v46  ;;  %v602_v31 = vmul.u32 52428, %v597_v52  ;;  %v5031_v46 = vld [vmem:[#allocation9 + $0x140] sm:$0xff]  ;;  %v626_v51 = vshrl.u32 %v5940_v61, 16  ;;  %1659 = vmatpush.bf16.msra.mxu2 %v5023_v48 }
  0xfc   : > { %415 = vst [vmem:[#allocation2 + $0x84] sm:$0xff] %v414_v63  ;;  %v585_v16 = vadd.s32 %v583_v0, %v581_v60  ;;  %v603_v59 = vshll.u32 %v5947_v2, 16  ;;  %v604_v37 = vshrl.u32 %v5947_v2, 16  ;;  %1693 = vmatpush.bf16.msra.mxu3 %v5031_v46  ;;  %v6020_v60 = vmul.u32 52428, %v625_v50 }
  0xfd   : > { %v900_v57 = vsub.f32 1.5, %v899_v44  ;;  %v911_v44 = vld [vmem:[#allocation8 + $0x1] sm:$0x1]  ;;  %1624 = vmatpush.bf16.msra.mxu1 %v5016_v29  ;;  %v6026_v0 = vmul.u32 52429, %v626_v51  ;;  %v6038_v15 = vmul.u32 52428, %v626_v51 }
  0xfe   : > { %v609_v32 = vadd.s32 %v603_v59, %v599_v1  ;;  %v633_v20 = vshrl.u32 %v6020_v60, 16  ;;  %vm1079_vm11 = vsmask.f32 7942  ;;  %vm1160_vm13 = vsmask.f32 256 }
  0xff   : > { %v901_v3 = vmul.f32 %v5870_v21, %v900_v57  ;;  %v606_v57 = vshrl.u32 %v5960_v17, 16  ;;  %vm1161_vm15 = vsmask.f32 4368  ;;  %v634_v50 = vshll.u32 %v6026_v0, 16  ;;  %vm6085_vm14 = vmand %vm1078_vm12, %vm1079_vm11 }
 0x100   : > { %vm611_vm8 = vc.u32 %v609_v32, %v605_v39  ;;  %v635_v51 = vshrl.u32 %v6026_v0, 16  ;;  %vm7429_vm12 = vcmask 1040384  }
 0x101   : > { %v905_v27 = vsel %vm5906_vm5, %v5870_v21, %v901_v3  ;;  %v586_v21 = vadd.s32 %v585_v16, %v575_v33  ;;  %vm607_vm5 = vc.u32 %v599_v1, %v603_v59  ;;  %v612_v54 = vsel %vm611_vm8, 1, %v5544_v35  ;;  %1625 = vmatpush.bf16.msra.mxu1 %v5015_v47  ;;  %vm6108_vm8 = vmor %vm394_vm10, %vm966_vm7 }
 0x102   : > { %v908_v34 = vrot.slane %v905_v27, 1  ;;  %v608_v33 = vsel %vm607_vm5, 1, %v5544_v35  ;;  %vm6091_vm5 = vmor %vm1160_vm13, %vm1161_vm15 }
 0x103   : > { %v587_v55 = vadd.s32 %v586_v21, %v577_v11  ;;  %v610_v49 = vadd.s32 %v608_v33, %v602_v31  ;;  %vm6118_vm11 = vmor %vm7429_vm12, %vm1107_vm0 }
 0x104   : > { %v910_v40 = vmul.f32 %v908_v34, %v906_v28 }
 0x105   : > { %v588_v52 = vshrl.u32 %v587_v55, 3  ;;  %v614_v12 = vadd.s32 %v612_v54, %v610_v49 }
 0x106   : > { %v912_v56 = vmul.f32 %v910_v40, %v5816_v18  ;;  %v6014_v11 = vperm.slane %v910_v40, 0 }
 0x107   : > { %v589_v3 = vmul.u32 10, %v588_v52  ;;  %v615_v17 = vadd.s32 %v614_v12, %v604_v37 }
 0x108   : > { %v913_v62 = vsub.f32 %v911_v44, %v912_v56  ;;  %v915_v63 = vmul.f32 %v6014_v11, %v5734_v4  ;;  %v916_v18 = vmul.f32 %v6014_v11, %v5737_v5  ;;  %v917_v1 = vmul.f32 %v6014_v11, %v5740_v7 }
 0x109   : > { %v918_v2 = vmul.f32 %v6014_v11, %v5743_v8  ;;  %v919_v4 = vmul.f32 %v6014_v11, %v5754_v14  ;;  %v920_v5 = vmul.f32 %v6014_v11, %v5760_v19  ;;  %v590_v16 = vsub.s32 %v5820_v23, %v589_v3 }
 0x10a   : > { %v6032_v13 = vperm.slane %v913_v62, 0  ;;  %v632_v7 = vshll.u32 %v6020_v60, 16  ;;  %v616_v19 = vadd.s32 %v615_v17, %v606_v57  ;;  %v7420_v17 = vmov 0 }
 0x10b   : > { %vm742_vm1 = vcmp.ne.s32.totalorder %v590_v16, 0  ;;  %vm752_vm4 = vcmp.lt.s32.totalorder %v590_v16, 0  ;;  %v772_v23 = vadd.s32 10, %v590_v16  ;;  %v7421_v17 = vsel %vm6085_vm14, 4294967295, %v7420_v17 }
 0x10c   : > { %v926_v8 = vadd.f32 %v6032_v13, %v915_v63  ;;  %v927_v22 = vadd.f32 %v6032_v13, %v916_v18  ;;  %v928_v14 = vadd.f32 %v6032_v13, %v917_v1  ;;  %v929_v26 = vadd.f32 %v6032_v13, %v918_v2  ;;  %vm762_vm6 = vmand %vm752_vm4, %vm742_vm1  ;;  %v1213_v1 = vld [vmem:[#allocation2 + $0x14] sm:$0xf]  ;;  %7422 = vst [vmem:[#allocation21_spill] sm:$0xff] %v7421_v17 }
 0x10d   : > { %v617_v30 = vshrl.u32 %v616_v19, 3  ;;  %v782_v25 = vsel %vm762_vm6, %v772_v23, %v590_v16  ;;  %v6048_v31 = vadd.f32 %v6032_v13, %v919_v4  ;;  %v6051_v34 = vadd.f32 %v6032_v13, %v920_v5  ;;  %v5006_v2 = vld [vmem:[#allocation9 + $0x78] sm:$0xff]  ;;  %v1081_v4 = vld [vmem:[#allocation2 + $0xc] sm:$0xe] }
 0x10e   : > { %v936_v59 = vmax.f32 %v926_v8, 0.0  ;;  %v937_v27 = vmax.f32 %v927_v22, 0.0  ;;  %v938_v28 = vmax.f32 %v928_v14, 0.0  ;;  %v939_v29 = vmax.f32 %v929_v26, 0.0  ;;  %2009 = vmatpush.bf16.msrb.mxu1 %v5006_v2  ;;  %v5005_v19 = vld [vmem:[#allocation9 + $0x70] sm:$0xff] }
 0x10f   : > { %v618_v40 = vmul.u32 10, %v617_v30  ;;  %vm792_vm9 = vcmp.lt.s32.totalorder %v782_v25, 8  ;;  %v940_v44 = vmax.f32 %v6048_v31, 0.0  ;;  %v941_v55 = vmax.f32 %v6051_v34, 0.0 }
 0x110   : > { %v946_v36 = vmul.f32 %v5911_v43, %v936_v59  ;;  %v947_v21 = vmul.f32 %v5997_v38, %v937_v27  ;;  %v948_v37 = vmul.f32 %v6000_v10, %v938_v28  ;;  %v949_v39 = vmul.f32 %v6009_v42, %v939_v29 }
 0x111   : > { %v6068_v48 = vsub.s32 %v5837_v53, %v618_v40  ;;  %v6071_v49 = vsel %vm792_vm9, 1.0, %v5545_v41  ;;  %v7423_v23 = vmov 0  ;;  %vm1425_vm4 = vcmask 1046528  }
 0x112   : > { %v6059_v33 = vpack.c.bf16 %v946_v36, %v946_v36  ;;  %v6061_v32 = vpack.c.bf16 %v947_v21, %v947_v21  ;;  %v6063_v46 = vpack.c.bf16 %v948_v37, %v948_v37  ;;  %v6065_v47 = vpack.c.bf16 %v949_v39, %v949_v39  ;;  %7419 = vst [vmem:[#allocation20_spill] sm:$0xff] %v6071_v49 }
 0x113   : > { %v7424_v23 = vsel %vm6091_vm5, 4294967295, %v7423_v23  ;;  %2010 = vmatpush.bf16.msrb.mxu1 %v5005_v19  ;;  %vm743_vm10 = vcmp.ne.s32.totalorder %v6068_v48, 0  ;;  %vm753_vm15 = vcmp.lt.s32.totalorder %v6068_v48, 0  ;;  %vm636_vm6 = vc.u32 %v6018_v58, %v632_v7 }
 0x114   : > { %v969_v56 = vshrl.u32 %v6059_v33, 16  ;;  %v972_v52 = vshll.u32 %v6059_v33, 16  ;;  %v978_v57 = vshrl.u32 %v6061_v32, 16  ;;  %v981_v54 = vshll.u32 %v6061_v32, 16  ;;  %7425 = vst [vmem:[#allocation22_spill] sm:$0xff] %v7424_v23  ;;  %vm763_vm1 = vmand %vm753_vm15, %vm743_vm10 }
 0x115   : > { %v988_v62 = vshrl.u32 %v6063_v46, 16  ;;  %v991_v53 = vshll.u32 %v6063_v46, 16  ;;  %v998_v63 = vshrl.u32 %v6065_v47, 16  ;;  %v1001_v18 = vshll.u32 %v6065_v47, 16 }
 0x116   : > { %v971_v3 = vrot.slane %v969_v56, 6  ;;  %v974_v12 = vrot.slane %v972_v52, 7  ;;  %v983_v5 = vrot.slane %v981_v54, 7  ;;  %v1163_v16 = vrot.slane %v969_v56, 7 }
 0x117   : > { %v993_v8 = vrot.slane %v991_v53, 7  ;;  %v1003_v22 = vrot.slane %v1001_v18, 7  ;;  %v1166_v14 = vrot.slane %v978_v57, 7  ;;  %v1170_v26 = vrot.slane %v988_v62, 7 }
 0x118   : > { %v975_v59 = vor.u32 %v974_v12, %v971_v3  ;;  %v1164_v27 = vor.u32 %v1163_v16, %v972_v52  ;;  %v1165_v28 = vrot.slane %v1163_v16, 4  ;;  %v6095_v29 = vrot.slane %v998_v63, 7 }
 0x119   : > { %v1167_v30 = vor.u32 %v1166_v14, %v981_v54  ;;  %v1169_v25 = vrot.slane %v1166_v14, 4  ;;  %v1171_v36 = vor.u32 %v1170_v26, %v991_v53  ;;  %v1173_v21 = vrot.slane %v1170_v26, 4 }
 0x11a   : > { %v1082_v37 = vsel %vm6085_vm14, %v975_v59, %v1081_v4  ;;  %v1175_v39 = vor.u32 %v6095_v29, %v1001_v18  ;;  %v1214_v40 = vsel %vm5918_vm2, %v1164_v27, %v1213_v1  ;;  %v976_v56 = vrot.slane %v975_v59, 4 }
 0x11b   : > { %1083 = vst [vmem:[#allocation2 + $0xc] sm:$0xe] %v1082_v37  ;;  %v1168_v52 = vsel %vm6091_vm5, %v1165_v28, %v1167_v30  ;;  %v1172_v2 = vsel %vm6091_vm5, %v1169_v25, %v1171_v36  ;;  %v980_v54 = vrot.slane %v978_v57, 6  ;;  %v990_v3 = vrot.slane %v988_v62, 6 }
 0x11c   : > { %v7426_v53 = vmov 0  ;;  %v1176_v18 = vsel %vm6091_vm5, %v1173_v21, %v1175_v39  ;;  %1215 = vst [vmem:[#allocation2 + $0x14] sm:$0xf] %v1214_v40  ;;  %v1000_v1 = vrot.slane %v998_v63, 6  ;;  %v1109_v12 = vrot.slane %v6059_v33, 7 }
 0x11d   : > { %v7427_v53 = vsel %vm6108_vm8, 4294967295, %v7426_v53  ;;  %v1111_v4 = vrot.slane %v6061_v32, 7  ;;  %v7430_v57 = vmov 0  ;;  %1216 = vst [vmem:[#allocation2 + $0x20] sm:$0xf] %v1168_v52  ;;  %v984_v62 = vor.u32 %v983_v5, %v980_v54 }
 0x11e   : > { %7428 = vst [vmem:[#allocation23_spill] sm:$0xff] %v7427_v53  ;;  %v7431_v57 = vsel %vm6118_vm11, 4294967295, %v7430_v57  ;;  %v994_v16 = vor.u32 %v993_v8, %v990_v3  ;;  %v1114_v14 = vrot.slane %v6063_v46, 7  ;;  %v1117_v26 = vrot.slane %v6065_v47, 7  ;;  %v4363_v5 = vld [vmem:[#allocation2] sm:$0xf] }
 0x11f   : > { %7432 = vst [vmem:[#allocation24_spill] sm:$0xff] %v7431_v57  ;;  %v6124_v19 = vor.u32 %v1003_v22, %v1000_v1  ;;  %v1110_v63 = vrot.slane %v1109_v12, 4  ;;  %v1113_v33 = vrot.slane %v1111_v4, 4  ;;  %v985_v32 = vsel %vm6108_vm8, %v976_v56, %v984_v62 }
 0x120   : > { %1217 = vst [vmem:[#allocation2 + $0x2c] sm:$0xf] %v1172_v2  ;;  %v986_v59 = vrot.slane %v984_v62, 4  ;;  %v996_v27 = vrot.slane %v994_v16, 4  ;;  %v1116_v28 = vrot.slane %v1114_v14, 4  ;;  %v773_v8 = vadd.s32 10, %v6068_v48 }
 0x121   : > { %1218 = vst [vmem:[#allocation2 + $0x38] sm:$0xf] %v1176_v18  ;;  %v1112_v46 = vsel %vm6118_vm11, %v1110_v63, %v1111_v4  ;;  %v1115_v47 = vsel %vm6118_vm11, %v1113_v33, %v1114_v14  ;;  %v950_v36 = vmul.f32 %v6071_v49, %v940_v44  ;;  %v1177_v39 = vrot.slane %v6095_v29, 4  ;;  %v5004_v63 = vld [vmem:[#allocation9 + $0x68] sm:$0xff] }
 0x122   : > { %1084 = vst [vmem:[#allocation2 + $0x18] sm:$0xf] %v985_v32  ;;  %v995_v22 = vsel %vm6108_vm8, %v986_v59, %v994_v16  ;;  %v1005_v30 = vsel %vm6108_vm8, %v996_v27, %v6124_v19  ;;  %v1118_v25 = vsel %vm6118_vm11, %v1116_v28, %v1117_v26  ;;  %v4989_v21 = vld [vmem:[#allocation2 + $0x8] sm:$0xf0]  ;;  %v783_v37 = vsel %vm763_vm1, %v773_v8, %v6068_v48 }
 0x123   : > { %1149 = vst [vmem:[#allocation2 + $0x10] sm:$0xe] %v1109_v12  ;;  %v1006_v40 = vrot.slane %v6124_v19, 4  ;;  %v4364_v56 = vor.u32 %v4989_v21, %v4363_v5  ;;  %v1298_v52 = vld [vmem:[#allocation2 + $0x14] sm:$0xe]  ;;  %vm793_vm7 = vcmp.lt.s32.totalorder %v783_v37, 8  ;;  %v960_v31 = vpack.c.bf16 %v950_v36, %v950_v36  ;;  %2011 = vmatpush.bf16.msrb.mxu1 %v5004_v63 }
 0x124   : > { %1085 = vst [vmem:[#allocation2 + $0x24] sm:$0xf] %v995_v22  ;;  %v1119_v2 = vrot.slane %v1117_v26, 4  ;;  %v6153_v44 = vld [vmem:[#allocation2 + $0x20] sm:$0xf]  ;;  %v1376_v54 = vunpack.c.l.b16 %v1298_v52  ;;  %v6156_v48 = vsel %vm793_vm7, 1.0, %v5545_v41  ;;  %v638_v3 = vadd.s32 %v632_v7, %v6018_v58 }
 0x125   : > { %1086 = vst [vmem:[#allocation2 + $0x30] sm:$0xf] %v1005_v30  ;;  %v637_v29 = vsel %vm636_vm6, 1, %v5544_v35  ;;  %1983 = vmatmul.bf16.vlgmr.msrb.gmra.mxu0 %v4364_v56  ;;  %v1379_v1 = vunpack.c.l.b16 %v6153_v44  ;;  %v951_v12 = vmul.f32 %v6156_v48, %v941_v55  ;;  %v1008_v4 = vshrl.u32 %v960_v31, 16 }
 0x126   : > { %1150 = vst [vmem:[#allocation2 + $0x1c] sm:$0xf] %v1112_v46  ;;  %v1011_v62 = vshll.u32 %v960_v31, 16  ;;  %v1120_v26 = vrot.slane %v960_v31, 7  ;;  %v639_v58 = vadd.s32 %v637_v29, %v6038_v15  ;;  %vm6181_vm9 = vc.u32 %v638_v3, %v634_v50 }
 0x127   : > { %7433 = vst [vmem:[#allocation25_spill] sm:$0xff] %v6156_v48  ;;  %v6162_v18 = vld [vmem:[#allocation2 + $0x2c] sm:$0xf]  ;;  %v1409_v33 = vpack.c.b16 %v1379_v1, %v1376_v54  ;;  %v6175_v32 = vpack.c.bf16 %v951_v12, %v951_v12  ;;  %v1178_v59 = vrot.slane %v1008_v4, 7  ;;  %v1010_v27 = vrot.slane %v1008_v4, 6 }
 0x128   : > { %1151 = vst [vmem:[#allocation2 + $0x28] sm:$0xf] %v1115_v47  ;;  %v6168_v16 = vld [vmem:[#allocation2 + $0x38] sm:$0xf]  ;;  %v7355_v14 = vunpack.c.l.b16 %v6162_v18  ;;  %v1013_v34 = vrot.slane %v1011_v62, 7  ;;  %v1121_v28 = vsel %vm6118_vm11, %v1119_v2, %v1120_v26  ;;  %v1122_v8 = vrot.slane %v1120_v26, 4 }
 0x129   : > { %1152 = vst [vmem:[#allocation2 + $0x34] sm:$0xf] %v1118_v25  ;;  %v7350_v7 = vunpack.c.l.b16 %v6168_v16  ;;  %v1432_v46 = vrot.slane %v1409_v33, 1  ;;  %v1018_v30 = vshrl.u32 %v6175_v32, 16  ;;  %v1021_v25 = vshll.u32 %v6175_v32, 16 }
 0x12a   : > { %v1297_v55 = vld [vmem:[#allocation2 + $0xc] sm:$0xee]  ;;  %1153 = vst [vmem:[#allocation2 + $0x40] sm:$0xf] %v1121_v28  ;;  %v1179_v36 = vor.u32 %v1178_v59, %v1011_v62  ;;  %v1181_v37 = vrot.slane %v1178_v59, 4  ;;  %v1014_v56 = vor.u32 %v1013_v34, %v1010_v27  ;;  %v1123_v52 = vrot.slane %v6175_v32, 7 }
 0x12b   : > { %v6189_v15 = vpack.c.b16 %v7350_v7, %v7355_v14  ;;  %v1374_v47 = vunpack.c.l.b16 %v1297_v55  ;;  %v1375_v22 = vunpack.c.h.b16 %v1297_v55  ;;  %v641_v3 = vsel %vm6181_vm9, 1, %v5544_v35 }
 0x12c   : > { %v1180_v29 = vsel %vm6091_vm5, %v1177_v39, %v1179_v36  ;;  %v6213_v63 = vrot.slane %v1018_v30, 7  ;;  %v1023_v59 = vrot.slane %v1021_v25, 7  ;;  %v1015_v28 = vsel %vm6108_vm8, %v1006_v40, %v1014_v56 }
 0x12d   : > { %v1433_v50 = vrot.slane %v6189_v15, 1  ;;  %v6194_v21 = vld [vmem:[#allocation2 + $0x18] sm:$0xff]  ;;  %1219 = vst [vmem:[#allocation2 + $0x44] sm:$0xf] %v1180_v29  ;;  %v1016_v5 = vrot.slane %v1014_v56, 4  ;;  %v1124_v40 = vsel %vm6118_vm11, %v1122_v8, %v1123_v52  ;;  %v643_v56 = vadd.s32 %v641_v3, %v639_v58 }
 0x12e   : > { %v1377_v2 = vunpack.c.l.b16 %v6194_v21  ;;  %v7346_v54 = vunpack.c.h.b16 %v6194_v21  ;;  %v1183_v27 = vor.u32 %v6213_v63, %v1021_v25  ;;  %1087 = vst [vmem:[#allocation2 + $0x3c] sm:$0xf] %v1015_v28  ;;  %v1020_v25 = vrot.slane %v1018_v30, 6 }
 0x12f   : > { %v6197_v31 = vld [vmem:[#allocation2 + $0x24] sm:$0xff]  ;;  %v1434_v12 = vsel %vm1425_vm4, %v1432_v46, %v1433_v50  ;;  %1154 = vst [vmem:[#allocation2 + $0x4c] sm:$0xf] %v1124_v40  ;;  %v644_v30 = vadd.s32 %v643_v56, %v633_v20 }
 0x130   : > { %v6209_v4 = vld [vmem:[#allocation2 + $0x30] sm:$0xff]  ;;  %v1380_v62 = vunpack.c.l.b16 %v6197_v31  ;;  %v7345_v26 = vunpack.c.h.b16 %v6197_v31  ;;  %1694 = vmatmul.bf16.vlgmr.msra.gmra.mxu3 %v1434_v12  ;;  %v1407_v33 = vpack.c.b16 %v1377_v2, %v1374_v47  ;;  %v1408_v55 = vpack.c.b16 %v7346_v54, %v1375_v22 }
 0x131   : > { %v1383_v39 = vunpack.c.l.b16 %v6209_v4  ;;  %v7344_v34 = vunpack.c.h.b16 %v6209_v4  ;;  %v1184_v19 = vsel %vm6091_vm5, %v1181_v37, %v1183_v27  ;;  %v5289_v37 = vld [vmem:[%s5719_s6 + $0x30] sm:$0xff]  ;;  %v645_v20 = vadd.s32 %v644_v30, %v635_v51 }
 0x132   : > { %v1426_v36 = vrot.slane %v1407_v33, 1  ;;  %v1429_v22 = vrot.slane %v1408_v55, 1  ;;  %1220 = vst [vmem:[#allocation2 + $0x50] sm:$0xf] %v1184_v19  ;;  %v654_v33 = vand.u32 65535, %v5979_v24  ;;  %v655_v55 = vshrl.u32 %v5979_v24, 16 }
 0x133   : > { %v6226_v46 = vpack.c.b16 %v1383_v39, %v1380_v62  ;;  %v6232_v47 = vpack.c.b16 %v7344_v34, %v7345_v26  ;;  %v1804_v28 = vpack.c.b16 %v1380_v62, %v1377_v2  ;;  %v6244_v34 = vor.u32 %v1023_v59, %v1020_v25  ;;  %v5290_v19 = vld [vmem:[%s5719_s6 + $0x38] sm:$0xff] }
 0x134   : > { %v921_v58 = vmul.f32 %v5289_v37, %v6014_v11  ;;  %v657_v27 = vmul.u32 52429, %v654_v33  ;;  %v658_v2 = vmul.u32 52428, %v654_v33  ;;  %v6256_v62 = vld [vmem:[#allocation2 + $0x44] sm:$0xf]  ;;  %v659_v59 = vmul.u32 52429, %v655_v55 }
 0x135   : > { %v1427_v29 = vrot.slane %v6226_v46, 1  ;;  %v1430_v12 = vrot.slane %v6232_v47, 1  ;;  %v1025_v60 = vsel %vm6108_vm8, %v1016_v5, %v6244_v34  ;;  %1988 = vmatmul.bf16.gmra.mxu0 %v1804_v28  ;;  %v6265_v40 = vld [vmem:[#allocation2 + $0x3c] sm:$0xff]  ;;  %v646_v56 = vshrl.u32 %v645_v20, 3 }
 0x136   : > { %1088 = vst [vmem:[#allocation2 + $0x48] sm:$0xf] %v1025_v60  ;;  %v661_v25 = vshll.u32 %v658_v2, 16  ;;  %v663_v33 = vshll.u32 %v659_v59, 16  ;;  %v932_v37 = vadd.f32 %v6032_v13, %v921_v58  ;;  %v7348_v0 = vunpack.c.l.b16 %v6256_v62 }
 0x137   : > { %v1428_v8 = vsel %vm1425_vm4, %v1426_v36, %v1427_v29  ;;  %v1431_v3 = vsel %vm1425_vm4, %v1429_v22, %v1430_v12  ;;  %v922_v36 = vmul.f32 %v5290_v19, %v6014_v11  ;;  %v660_v22 = vmul.u32 52428, %v655_v55 }
 0x138   : > { %1626 = vmatmul.bf16.vlgmr.msra.gmra.mxu1 %v1428_v8  ;;  %1660 = vmatmul.bf16.vlgmr.msra.gmra.mxu2 %v1431_v3  ;;  %v1386_v51 = vunpack.c.l.b16 %v6265_v40  ;;  %vm665_vm0 = vc.u32 %v657_v27, %v661_v25  ;;  %v667_v5 = vadd.s32 %v661_v25, %v657_v27  ;;  %v647_v28 = vmul.u32 10, %v646_v56 }
 0x139   : > { %v6269_v8 = vadd.f32 %v6032_v13, %v922_v36  ;;  %v6273_v30 = vld [vmem:[#allocation2 + $0x50] sm:$0xf]  ;;  %v662_v55 = vshrl.u32 %v658_v2, 16  ;;  %v664_v3 = vshrl.u32 %v659_v59, 16  ;;  %v666_v60 = vsel %vm665_vm0, 1, %v5544_v35 }
 0x13a   : > { %v7347_v20 = vunpack.c.l.b16 %v6273_v30  ;;  %v7352_v58 = vunpack.c.h.b16 %v6265_v40  ;;  %v668_v19 = vadd.s32 %v666_v60, %v660_v22  ;;  %vm669_vm12 = vc.u32 %v667_v5, %v663_v33 }
 0x13b   : > { %v648_v36 = vsub.s32 %v5940_v61, %v647_v28  ;;  %v670_v26 = vsel %vm669_vm12, 1, %v5544_v35  ;;  %v942_v54 = vmax.f32 %v932_v37, 0.0  ;;  %v943_v27 = vmax.f32 %v6269_v8, 0.0 }
 0x13c   : > { %v6285_v2 = vpack.c.b16 %v7347_v20, %v7348_v0  ;;  %v1807_v59 = vpack.c.b16 %v1386_v51, %v1383_v39  ;;  %v672_v25 = vadd.s32 %v670_v26, %v668_v19  ;;  %v6290_v22 = vadd.s32 64, %v5774_v6 }
 0x13d   : > { %v6292_v56 = vld [vmem:[#allocation2 + $0x48] sm:$0xff]  ;;  %vm744_vm10 = vcmp.ne.s32.totalorder %v648_v36, 0  ;;  %vm754_vm15 = vcmp.lt.s32.totalorder %v648_v36, 0  ;;  %v774_v35 = vadd.s32 10, %v648_v36  ;;  %v1185_v61 = vrot.slane %v6213_v63, 4 }
 0x13e   : > { %v7349_v33 = vrot.slane %v6285_v2, 1  ;;  %v1389_v37 = vunpack.c.l.b16 %v6292_v56  ;;  %v7351_v5 = vunpack.c.h.b16 %v6292_v56  ;;  %v673_v28 = vadd.s32 %v672_v25, %v662_v55  ;;  %vm764_vm1 = vmand %vm754_vm15, %vm744_vm10 }
 0x13f   : > { %v784_v39 = vsel %vm764_vm1, %v774_v35, %v648_v36  ;;  %v6299_v26 = vadd.s32 72, %v5774_v6  ;;  %v683_v60 = vand.u32 65535, %v6290_v22  ;;  %v684_v19 = vshrl.u32 %v6290_v22, 16 }
 0x140   : > { %v1440_v20 = vsel %vm1425_vm4, %v1433_v50, %v7349_v33  ;;  %v6310_v0 = vpack.c.b16 %v1389_v37, %v1386_v51  ;;  %v6316_v6 = vpack.c.b16 %v7351_v5, %v7352_v58  ;;  %v674_v55 = vadd.s32 %v673_v28, %v664_v3 }
 0x141   : > { %1699 = vmatmul.bf16.gmra.mxu3 %v1440_v20  ;;  %vm794_vm6 = vcmp.lt.s32.totalorder %v784_v39, 8  ;;  %v686_v36 = vmul.u32 52429, %v683_v60  ;;  %v6318_v25 = vmul.u32 52428, %v683_v60  ;;  %v6320_v35 = vmul.u32 52429, %v684_v19 }
 0x142   : > { %v7354_v15 = vrot.slane %v6310_v0, 1  ;;  %v7353_v50 = vrot.slane %v6316_v6, 1  ;;  %v675_v51 = vshrl.u32 %v674_v55, 3  ;;  %v6325_v33 = vsel %vm794_vm6, 1.0, %v5545_v41 }
 0x143   : > { %7436 = vst [vmem:[#allocation26_spill] sm:$0xff] %v6325_v33  ;;  %v952_v7 = vmul.f32 %v6325_v33, %v942_v54  ;;  %v1026_v5 = vrot.slane %v6244_v34, 4  ;;  %v689_v3 = vmul.u32 52428, %v684_v19  ;;  %v690_v20 = vshll.u32 %v6318_v25, 16 }
 0x144   : > { %v1436_v28 = vsel %vm1425_vm4, %v1427_v29, %v7354_v15  ;;  %v1438_v39 = vsel %vm1425_vm4, %v1430_v12, %v7353_v50  ;;  %v676_v60 = vmul.u32 10, %v675_v51  ;;  %v692_v54 = vshll.u32 %v6320_v35, 16  ;;  %v6344_v29 = vld [vmem:[#allocation2] sm:$0xff]  ;;  %v5002_v15 = vld [vmem:[#allocation9 + $0x58] sm:$0xff] }
 0x145   : > { %v962_v34 = vpack.c.bf16 %v952_v7, %v952_v7  ;;  %v1125_v19 = vrot.slane %v1123_v52, 4  ;;  %vm694_vm7 = vc.u32 %v686_v36, %v690_v20  ;;  %v696_v55 = vadd.s32 %v690_v20, %v686_v36  ;;  %1993 = vmatmul.bf16.gmra.mxu0 %v1807_v59  ;;  %v5069_v52 = vld [vmem:[#allocation9 + $0x1f8] sm:$0xff] }
 0x146   : > { %v677_v46 = vsub.s32 %v5979_v24, %v676_v60  ;;  %v695_v47 = vsel %vm694_vm7, 1, %v6344_v29  ;;  %v712_v12 = vand.u32 65535, %v6299_v26  ;;  %v713_v51 = vshrl.u32 %v6299_v26, 16  ;;  %2381 = vmatpush.bf16.msra.mxu0 %v5069_v52 }
 0x147   : > { %v1028_v58 = vshrl.u32 %v962_v34, 16  ;;  %v1126_v7 = vrot.slane %v962_v34, 7  ;;  %v697_v50 = vadd.s32 %v695_v47, %v689_v3  ;;  %vm6349_vm12 = vc.u32 %v696_v55, %v692_v54 }
 0x148   : > { %1631 = vmatmul.bf16.gmra.mxu1 %v1436_v28  ;;  %1665 = vmatmul.bf16.gmra.mxu2 %v1438_v39  ;;  %v1031_v28 = vshll.u32 %v962_v34, 16  ;;  %v5003_v39 = vld [vmem:[#allocation9 + $0x60] sm:$0xff]  ;;  %vm745_vm9 = vcmp.ne.s32.totalorder %v677_v46, 0  ;;  %vm755_vm0 = vcmp.lt.s32.totalorder %v677_v46, 0  ;;  %v775_v32 = vadd.s32 10, %v677_v46 }
 0x149   : > { %vm765_vm10 = vmand %vm755_vm0, %vm745_vm9  ;;  %v6353_v36 = vrot.slane %v1028_v58, 7  ;;  %2012 = vmatpush.bf16.msrb.mxu1 %v5003_v39  ;;  %v1030_v20 = vrot.slane %v1028_v58, 6  ;;  %v1127_v60 = vsel %vm6118_vm11, %v1125_v19, %v1126_v7  ;;  %v691_v3 = vshrl.u32 %v6318_v25, 16 }
 0x14a   : > { %v1033_v24 = vrot.slane %v1031_v28, 7  ;;  %v785_v34 = vsel %vm765_vm10, %v775_v32, %v677_v46  ;;  %1155 = vst [vmem:[#allocation2 + $0x58] sm:$0xf] %v1127_v60  ;;  %v699_v54 = vsel %vm6349_vm12, 1, %v6344_v29  ;;  %v716_v55 = vmul.u32 52428, %v712_v12 }
 0x14b   : > { %vm795_vm15 = vcmp.lt.s32.totalorder %v785_v34, 8  ;;  %v1187_v47 = vor.u32 %v6353_v36, %v1031_v28  ;;  %v693_v58 = vshrl.u32 %v6320_v35, 16  ;;  %v701_v19 = vadd.s32 %v699_v54, %v697_v50  ;;  %v416_v35 = vld [vmem:[#allocation2 + $0x8c] sm:$0xf] }
 0x14c   : > { %v1034_v14 = vor.u32 %v1033_v24, %v1030_v20  ;;  %v6364_v39 = vsel %vm795_vm15, 1.0, %v5545_v41  ;;  %v715_v46 = vmul.u32 52429, %v712_v12  ;;  %v717_v32 = vmul.u32 52429, %v713_v51 }
 0x14d   : > { %7439 = vst [vmem:[#allocation27_spill] sm:$0xff] %v6364_v39  ;;  %v953_v25 = vmul.f32 %v6364_v39, %v943_v27  ;;  %v1188_v52 = vsel %vm6091_vm5, %v1185_v61, %v1187_v47  ;;  %2013 = vmatpush.bf16.msrb.mxu1 %v5002_v15  ;;  %v702_v59 = vadd.s32 %v701_v19, %v691_v3  ;;  %v718_v24 = vmul.u32 52428, %v713_v51 }
 0x14e   : > { %v1035_v28 = vsel %vm6108_vm8, %v1026_v5, %v1034_v14  ;;  %1221 = vst [vmem:[#allocation2 + $0x5c] sm:$0xf] %v1188_v52  ;;  %v719_v50 = vshll.u32 %v716_v55, 16  ;;  %v721_v12 = vshll.u32 %v717_v32, 16  ;;  %v1189_v8 = vrot.slane %v6353_v36, 4 }
 0x14f   : > { %v6375_v20 = vpack.c.bf16 %v953_v25, %v953_v25  ;;  %v1036_v27 = vrot.slane %v1034_v14, 4  ;;  %1089 = vst [vmem:[#allocation2 + $0x54] sm:$0xf] %v1035_v28  ;;  %v1128_v63 = vrot.slane %v1126_v7, 4  ;;  %v703_v60 = vadd.s32 %v702_v59, %v693_v58  ;;  %v5292_v14 = vld [vmem:[%s5719_s6 + $0x40] sm:$0xff] }
 0x150   : > { %vm723_vm1 = vc.u32 %v715_v46, %v719_v50  ;;  %v725_v61 = vadd.s32 %v719_v50, %v715_v46  ;;  %v417_v5 = vsel %vm5918_vm2, 0, %v416_v35  ;;  %v923_v7 = vmul.f32 %v5292_v14, %v6014_v11 }
 0x151   : > { %v1038_v15 = vshrl.u32 %v6375_v20, 16  ;;  %v1041_v51 = vshll.u32 %v6375_v20, 16  ;;  %v1129_v34 = vrot.slane %v6375_v20, 7  ;;  %v724_v3 = vsel %vm723_vm1, 1, %v6344_v29  ;;  %418 = vst [vmem:[#allocation2 + $0x8c] sm:$0xf] %v417_v5 }
 0x152   : > { %v704_v36 = vshrl.u32 %v703_v60, 3  ;;  %v726_v54 = vadd.s32 %v724_v3, %v718_v24  ;;  %vm727_vm6 = vc.u32 %v725_v61, %v721_v12  ;;  %v720_v52 = vshrl.u32 %v716_v55, 16  ;;  %v5293_v5 = vld [vmem:[%s5719_s6 + $0x48] sm:$0xff] }
 0x153   : > { %v1043_v47 = vrot.slane %v1041_v51, 7  ;;  %v6386_v58 = vrot.slane %v1038_v15, 7  ;;  %v1040_v19 = vrot.slane %v1038_v15, 6  ;;  %v1130_v46 = vsel %vm6118_vm11, %v1128_v63, %v1129_v34 }
 0x154   : > { %1156 = vst [vmem:[#allocation2 + $0x64] sm:$0xf] %v1130_v46  ;;  %v705_v25 = vmul.u32 10, %v704_v36  ;;  %v728_v28 = vsel %vm727_vm6, 1, %v6344_v29  ;;  %v934_v50 = vadd.f32 %v6032_v13, %v923_v7  ;;  %v722_v60 = vshrl.u32 %v717_v32, 16 }
 0x155   : > { %v1191_v35 = vor.u32 %v6386_v58, %v1041_v51  ;;  %v6392_v59 = vor.u32 %v1043_v47, %v1040_v19  ;;  %v730_v24 = vadd.s32 %v728_v28, %v726_v54  ;;  %v1244_v61 = vld [vmem:[#allocation2 + $0x5c] sm:$0xf]  ;;  %v924_v15 = vmul.f32 %v5293_v5, %v6014_v11  ;;  %v5068_v5 = vld [vmem:[#allocation9 + $0x1f0] sm:$0xff] }
 0x156   : > { %v6395_v12 = vld [vmem:[#allocation2 + $0x54] sm:$0xff]  ;;  %v706_v20 = vsub.s32 %v6290_v22, %v705_v25  ;;  %v944_v32 = vmax.f32 %v934_v50, 0.0  ;;  %v1394_v54 = vunpack.c.l.b16 %v1244_v61  ;;  %v1193_v46 = vrot.slane %v6386_v58, 4  ;;  %2382 = vmatpush.bf16.msra.mxu0 %v5068_v5 }
 0x157   : > { %v1192_v63 = vsel %vm6091_vm5, %v1189_v8, %v1191_v35  ;;  %v1045_v29 = vsel %vm6108_vm8, %v1036_v27, %v6392_v59  ;;  %v1392_v55 = vunpack.c.l.b16 %v6395_v12  ;;  %v731_v51 = vadd.s32 %v730_v24, %v720_v52 }
 0x158   : > { %1222 = vst [vmem:[#allocation2 + $0x68] sm:$0xf] %v1192_v63  ;;  %vm746_vm7 = vcmp.ne.s32.totalorder %v706_v20, 0  ;;  %vm756_vm9 = vcmp.lt.s32.totalorder %v706_v20, 0  ;;  %v776_v3 = vadd.s32 10, %v706_v20  ;;  %v935_v27 = vadd.f32 %v6032_v13, %v924_v15  ;;  %v5061_v15 = vld [vmem:[#allocation9 + $0x1b8] sm:$0xff] }
 0x159   : > { %1090 = vst [vmem:[#allocation2 + $0x60] sm:$0xf] %v1045_v29  ;;  %v1810_v22 = vpack.c.b16 %v1392_v55, %v1389_v37  ;;  %vm766_vm0 = vmand %vm756_vm9, %vm746_vm7  ;;  %v732_v8 = vadd.s32 %v731_v51, %v722_v60  ;;  %v7441_v37 = vunpack.c.l.b16 %v6162_v18  ;;  %v1393_v52 = vunpack.c.h.b16 %v6395_v12  ;;  %2347 = vmatpush.bf16.msrb.mxu3 %v5061_v15  ;;  %v1226_v12 = vld [vmem:[#allocation2 + $0x8c] sm:$0x1] }
 0x15a   : > { %v786_v36 = vsel %vm766_vm0, %v776_v3, %v706_v20  ;;  %v945_v19 = vmax.f32 %v935_v27, 0.0  ;;  %v7442_v35 = vunpack.c.l.b16 %v6168_v16  ;;  %v7443_v24 = vunpack.c.l.b16 %v6256_v62  ;;  %v5014_v3 = vld [vmem:[#allocation9 + $0xb8] sm:$0xff] }
 0x15b   : > { %1998 = vmatmul.bf16.gmra.mxu0 %v1810_v22  ;;  %vm796_vm12 = vcmp.lt.s32.totalorder %v786_v36, 8  ;;  %v733_v14 = vshrl.u32 %v732_v8, 3  ;;  %v6418_v25 = vpack.c.b16 %v7441_v37, %v1379_v1  ;;  %v7444_v20 = vunpack.c.l.b16 %v6273_v30  ;;  %2043 = vmatpush.bf16.msrb.mxu2 %v5014_v3  ;;  %v5060_v37 = vld [vmem:[#allocation9 + $0x1b0] sm:$0xff] }
 0x15c   : > { %v6410_v11 = vsel %vm796_vm12, 1.0, %v5545_v41  ;;  %v6427_v50 = vpack.c.b16 %v7443_v24, %v7442_v35  ;;  %v1046_v60 = vrot.slane %v6392_v59, 4  ;;  %v1131_v63 = vrot.slane %v1129_v34, 4 }
 0x15d   : > { %7440 = vst [vmem:[#allocation28_spill] sm:$0xff] %v6410_v11  ;;  %v954_v7 = vmul.f32 %v6410_v11, %v944_v32  ;;  %v734_v47 = vmul.u32 10, %v733_v14  ;;  %v6431_v58 = vpack.c.b16 %v1394_v54, %v7444_v20  ;;  %v7445_v35 = vrot.slane %v6285_v2, 1  ;;  %2348 = vmatpush.bf16.msrb.mxu3 %v5060_v37 }
 0x15e   : > { %v7447_v5 = vrot.slane %v6310_v0, 1  ;;  %v7448_v15 = vrot.slane %v6316_v6, 1  ;;  %v5066_v6 = vld [vmem:[#allocation9 + $0x1e0] sm:$0xff]  ;;  %vm7454_vm7 = vcmask 1040384  }
 0x15f   : > { %v6420_v13 = vld [vmem:[#allocation2 + $0x68] sm:$0xf]  ;;  %v964_v28 = vpack.c.bf16 %v954_v7, %v954_v7  ;;  %v735_v1 = vsub.s32 %v6299_v26, %v734_v47  ;;  %v5001_v26 = vld [vmem:[#allocation9 + $0x50] sm:$0xff]  ;;  %vm6508_vm9 = vmand %vm7454_vm7, %vm1160_vm13  ;;  %vm2154_vm13 = vcmask 1045504  }
 0x160   : > { %v1397_v44 = vunpack.c.l.b16 %v6420_v13  ;;  %v6434_v18 = vld [vmem:[#allocation2 + $0x60] sm:$0xff]  ;;  %2014 = vmatpush.bf16.msrb.mxu1 %v5001_v26  ;;  %v5056_v13 = vld [vmem:[#allocation9 + $0x190] sm:$0xff]  ;;  %vm7479_vm0 = vmmov %vm7454_vm7 }
 0x161   : > { %v1395_v61 = vunpack.c.l.b16 %v6434_v18  ;;  %v1396_v16 = vunpack.c.h.b16 %v6434_v18  ;;  %v1048_v62 = vshrl.u32 %v964_v28, 16  ;;  %v1051_v29 = vshll.u32 %v964_v28, 16  ;;  %v5067_v47 = vld [vmem:[#allocation9 + $0x1e8] sm:$0xff] }
 0x162   : > { %v6442_v30 = vpack.c.b16 %v1397_v44, %v1394_v54  ;;  %vm747_vm10 = vcmp.ne.s32.totalorder %v735_v1, 0  ;;  %vm757_vm15 = vcmp.lt.s32.totalorder %v735_v1, 0  ;;  %v777_v51 = vadd.s32 10, %v735_v1  ;;  %2383 = vmatpush.bf16.msra.mxu0 %v5067_v47 }
 0x163   : > { %v6446_v34 = vpack.c.b16 %v1395_v61, %v1392_v55  ;;  %v6452_v59 = vpack.c.b16 %v1396_v16, %v1393_v52  ;;  %vm767_vm1 = vmand %vm757_vm15, %vm747_vm10  ;;  %v1053_v22 = vrot.slane %v1051_v29, 7  ;;  %v6454_v32 = vrot.slane %v1048_v62, 7 }
 0x164   : > { %v1445_v8 = vrot.slane %v6442_v30, 1  ;;  %v787_v36 = vsel %vm767_vm1, %v777_v51, %v735_v1  ;;  %v1050_v27 = vrot.slane %v1048_v62, 6  ;;  %v1132_v54 = vrot.slane %v964_v28, 7  ;;  %v5013_v1 = vld [vmem:[#allocation9 + $0xb0] sm:$0xff]  ;;  %v5000_v62 = vld [vmem:[#allocation9 + $0x48] sm:$0xff] }
 0x165   : > { %v1441_v55 = vrot.slane %v6446_v34, 1  ;;  %v1443_v14 = vrot.slane %v6452_v59, 1  ;;  %vm797_vm6 = vcmp.lt.s32.totalorder %v787_v36, 8  ;;  %v1195_v7 = vor.u32 %v6454_v32, %v1051_v29  ;;  %v5059_v36 = vld [vmem:[#allocation9 + $0x1a8] sm:$0xff]  ;;  %2044 = vmatpush.bf16.msrb.mxu2 %v5013_v1  ;;  %2015 = vmatpush.bf16.msrb.mxu1 %v5000_v62  ;;  %v5294_v34 = vld [vmem:[#allocation6 + $0x78] sm:$0xff] }
 0x166   : > { %v1446_v24 = vsel %vm1425_vm4, %v7445_v35, %v1445_v8  ;;  %v6466_v20 = vsel %vm797_vm6, 1.0, %v5545_v41  ;;  %v1054_v28 = vor.u32 %v1053_v22, %v1050_v27  ;;  %v1133_v0 = vsel %vm6118_vm11, %v1131_v63, %v1132_v54  ;;  %2384 = vmatpush.bf16.msra.mxu0 %v5066_v6  ;;  %2349 = vmatpush.bf16.msrb.mxu3 %v5059_v36 }
 0x167   : > { %7446 = vst [vmem:[#allocation29_spill] sm:$0xff] %v6466_v20  ;;  %1704 = vmatmul.bf16.gmra.mxu3 %v1446_v24  ;;  %v1442_v29 = vsel %vm1425_vm4, %v7447_v5, %v1441_v55  ;;  %v1444_v2 = vsel %vm1425_vm4, %v7448_v15, %v1443_v14  ;;  %v955_v51 = vmul.f32 %v6466_v20, %v945_v19  ;;  %v1134_v22 = vrot.slane %v1132_v54, 4  ;;  %v5012_v19 = vld [vmem:[#allocation9 + $0xa8] sm:$0xff]  ;;  %v5058_v15 = vld [vmem:[#allocation9 + $0x1a0] sm:$0xff] }
 0x168   : > { %v1196_v41 = vsel %vm6091_vm5, %v1193_v46, %v1195_v7  ;;  %1636 = vmatmul.bf16.gmra.mxu1 %v1442_v29  ;;  %1670 = vmatmul.bf16.gmra.mxu2 %v1444_v2  ;;  %v1055_v3 = vsel %vm6108_vm8, %v1046_v60, %v1054_v28  ;;  %1157 = vst [vmem:[#allocation2 + $0x70] sm:$0xf] %v1133_v0  ;;  %v7449_v46 = vunpack.c.h.b16 %v6194_v21  ;;  %v7450_v27 = vunpack.c.h.b16 %v6197_v31  ;;  %v1093_v0 = vld [vmem:[#allocation2 + $0x84] sm:$0x3] }
 0x169   : > { %1223 = vst [vmem:[#allocation2 + $0x74] sm:$0xf] %v1196_v41  ;;  %v965_v26 = vpack.c.bf16 %v955_v51, %v955_v51  ;;  %v7451_v60 = vunpack.c.h.b16 %v6209_v4  ;;  %v7452_v63 = vunpack.c.h.b16 %v6265_v40  ;;  %v1197_v24 = vrot.slane %v6454_v32, 4  ;;  %v5065_v40 = vld [vmem:[#allocation9 + $0x1d8] sm:$0xff]  ;;  %2045 = vmatpush.bf16.msrb.mxu2 %v5012_v19  ;;  %v5064_v19 = vld [vmem:[#allocation9 + $0x1d0] sm:$0xff] }
 0x16a   : > { %1091 = vst [vmem:[#allocation2 + $0x6c] sm:$0xf] %v1055_v3  ;;  %v6489_v7 = vpack.c.b16 %v7450_v27, %v7449_v46  ;;  %v1056_v1 = vrot.slane %v1054_v28, 4  ;;  %v7453_v62 = vunpack.c.h.b16 %v6292_v56  ;;  %v7455_v32 = vmov 0  ;;  %v5011_v56 = vld [vmem:[#allocation9 + $0xa0] sm:$0xff]  ;;  %2385 = vmatpush.bf16.msra.mxu0 %v5065_v40  ;;  %2350 = vmatpush.bf16.msrb.mxu3 %v5058_v15  ;;  %v5057_v46 = vld [vmem:[#allocation9 + $0x198] sm:$0xff] }
 0x16b   : > { %v6495_v35 = vpack.c.b16 %v7452_v63, %v7451_v60  ;;  %v1058_v54 = vshrl.u32 %v965_v26, 16  ;;  %v1061_v47 = vshll.u32 %v965_v26, 16  ;;  %v1135_v37 = vrot.slane %v965_v26, 7  ;;  %v5055_v15 = vld [vmem:[#allocation9 + $0x188] sm:$0xff] }
 0x16c   : > { %v6502_v21 = vpack.c.b16 %v1393_v52, %v7453_v62  ;;  %v7456_v32 = vsel %vm6508_vm9, 4294967295, %v7455_v32 }
 0x16d   : > { %v1063_v31 = vrot.slane %v1061_v47, 7  ;;  %v1198_v5 = vrot.slane %v1058_v54, 7  ;;  %v1060_v29 = vrot.slane %v1058_v54, 6  ;;  %v1136_v4 = vsel %vm6118_vm11, %v1134_v22, %v1135_v37  ;;  %7457 = vst [vmem:[#allocation30_spill] sm:$0xff] %v7456_v32  ;;  %2046 = vmatpush.bf16.msrb.mxu2 %v5011_v56  ;;  %v5010_v54 = vld [vmem:[#allocation9 + $0x98] sm:$0xff]  ;;  %v5008_v56 = vld [vmem:[#allocation9 + $0x88] sm:$0xff] }
 0x16e   : > { %1158 = vst [vmem:[#allocation2 + $0x7c] sm:$0xf] %v1136_v4  ;;  %v1137_v52 = vrot.slane %v1135_v37, 4  ;;  %2386 = vmatpush.bf16.msra.mxu0 %v5064_v19  ;;  %2351 = vmatpush.bf16.msrb.mxu3 %v5057_v46  ;;  %v5042_v4 = vld [vmem:[#allocation2 + $0x34] sm:$0xf]  ;;  %v5054_v19 = vld [vmem:[#allocation9 + $0x180] sm:$0xff] }
 0x16f   : > { %v1199_v28 = vor.u32 %v1198_v5, %v1061_v47  ;;  %v1064_v51 = vor.u32 %v1063_v31, %v1060_v29  ;;  %v1201_v41 = vrot.slane %v1198_v5, 4  ;;  %v5063_v31 = vld [vmem:[#allocation9 + $0x1c8] sm:$0xff]  ;;  %v5039_v5 = vld [vmem:[#allocation2 + $0x1c] sm:$0xc] }
 0x170   : > { %v1248_v2 = vld [vmem:[#allocation2 + $0x74] sm:$0xf]  ;;  %1159 = vst [vmem:[#allocation2 + $0x88] sm:$0x1] %v1137_v52  ;;  %v4473_v29 = vld [vmem:[#allocation2 + $0x24] sm:$0xf0] }
 0x171   : > { %v1400_v3 = vunpack.c.l.b16 %v1248_v2  ;;  %v1200_v26 = vsel %vm6091_vm5, %v1197_v24, %v1199_v28  ;;  %v1065_v22 = vsel %vm6108_vm8, %v1056_v1, %v1064_v51  ;;  %v1247_v6 = vld [vmem:[#allocation2 + $0x6c] sm:$0xff]  ;;  %v1227_v36 = vsel %vm6508_vm9, %v1201_v41, %v1226_v12  ;;  %v4999_v24 = vld [vmem:[#allocation9 + $0x40] sm:$0xff]  ;;  %2047 = vmatpush.bf16.msrb.mxu2 %v5010_v54 }
 0x172   : > { %v1066_v27 = vrot.slane %v1064_v51, 4  ;;  %1224 = vst [vmem:[#allocation2 + $0x80] sm:$0xf] %v1200_v26  ;;  %v1398_v60 = vunpack.c.l.b16 %v1247_v6  ;;  %v1399_v63 = vunpack.c.h.b16 %v1247_v6  ;;  %2016 = vmatpush.bf16.msrb.mxu1 %v4999_v24  ;;  %2387 = vmatpush.bf16.msra.mxu0 %v5063_v31  ;;  %v4485_v12 = vld [vmem:[#allocation2 + $0x3c] sm:$0xf0]  ;;  %v4476_v51 = vor.u32 %v5039_v5, %v4473_v29 }
 0x173   : > { %v6520_v47 = vpack.c.b16 %v1400_v3, %v1397_v44  ;;  %1092 = vst [vmem:[#allocation2 + $0x78] sm:$0xf] %v1065_v22  ;;  %v5009_v44 = vld [vmem:[#allocation9 + $0x90] sm:$0xff]  ;;  %2352 = vmatpush.bf16.msrb.mxu3 %v5056_v13  ;;  %v4488_v26 = vor.u32 %v5042_v4, %v4485_v12  ;;  %v5007_v46 = vld [vmem:[#allocation9 + $0x80] sm:$0xff] }
 0x174   : > { %v1094_v37 = vsel %vm5857_vm3, %v1066_v27, %v1093_v0  ;;  %v1813_v1 = vpack.c.b16 %v1398_v60, %v1395_v61  ;;  %1228 = vst [vmem:[#allocation2 + $0x8c] sm:$0x1] %v1227_v36  ;;  %v6528_v62 = vpack.c.b16 %v1399_v63, %v1396_v16  ;;  %v5062_v61 = vld [vmem:[#allocation9 + $0x1c0] sm:$0xff]  ;;  %v2158_v54 = vrot.slane %v4476_v51, 2  ;;  %v5045_v4 = vld [vmem:[#allocation2 + $0x4c] sm:$0xf] }
 0x175   : > { %1095 = vst [vmem:[#allocation2 + $0x84] sm:$0x3] %v1094_v37  ;;  %2048 = vmatpush.bf16.msrb.mxu2 %v5009_v44  ;;  %v2159_v37 = vrot.slane %v4488_v26, 2  ;;  %v5296_v44 = vld [vmem:[#allocation6 + $0x68] sm:$0xff] }
 0x176   : > { %2003 = vmatmul.bf16.gmra.mxu0 %v1813_v1  ;;  %v5077_v1 = vld [vmem:[#allocation9 + $0x238] sm:$0xff]  ;;  %v5075_v26 = vld [vmem:[#allocation9 + $0x228] sm:$0xff] }
 0x177   : > { %2388 = vmatpush.bf16.msra.mxu0 %v5062_v61  ;;  %2353 = vmatpush.bf16.msrb.mxu3 %v5055_v15  ;;  %v2160_v59 = vsel %vm2154_vm13, %v2158_v54, %v2159_v37  ;;  %v5297_v61 = vld [vmem:[#allocation6 + $0x60] sm:$0xff]  ;;  %v5303_v54 = vld [vmem:[#allocation6 + $0x30] sm:$0xff] }
 0x178   : > { %2415 = vmatpush.bf16.msra.mxu1 %v5077_v1  ;;  %v5048_v1 = vld [vmem:[#allocation2 + $0x64] sm:$0xf] }
 0x179   : > { %v1300_v40 = vld [vmem:[#allocation2 + $0x80] sm:$0xf]  ;;  %2049 = vmatpush.bf16.msrb.mxu2 %v5008_v56 }
 0x17a   : > { %v1403_v18 = vunpack.c.l.b16 %v1300_v40  ;;  %v1299_v16 = vld [vmem:[#allocation2 + $0x78] sm:$0xff] }
 0x17b   : > { %v1401_v52 = vunpack.c.l.b16 %v1299_v16  ;;  %v1402_v28 = vunpack.c.h.b16 %v1299_v16  ;;  %2354 = vmatpush.bf16.msrb.mxu3 %v5054_v19  ;;  %v4497_v40 = vld [vmem:[#allocation2 + $0x54] sm:$0xf0]  ;;  %v5301_v19 = vld [vmem:[#allocation6 + $0x40] sm:$0xff] }
 0x17c   : > { %v1421_v2 = vpack.c.b16 %v1403_v18, %v1400_v3  ;;  %v1301_v24 = vld [vmem:[#allocation2 + $0x84] sm:$0x11]  ;;  %v5298_v18 = vld [vmem:[#allocation6 + $0x58] sm:$0xff]  ;;  %v4500_v12 = vor.u32 %v5045_v4, %v4497_v40 }
 0x17d   : > { %v1419_v41 = vpack.c.b16 %v1401_v52, %v1398_v60  ;;  %v1420_v0 = vpack.c.b16 %v1402_v28, %v1399_v63  ;;  %v1302_v63 = vld [vmem:[#allocation2 + $0x8c] sm:$0x1]  ;;  %2050 = vmatpush.bf16.msrb.mxu2 %v5007_v46  ;;  %v1405_v31 = vunpack.c.h.b16 %v1301_v24  ;;  %v4471_v46 = vld [vmem:[#allocation2 + $0x18] sm:$0xc] }
 0x17e   : > { %v1451_v22 = vrot.slane %v1421_v2, 1  ;;  %v1406_v30 = vunpack.c.l.b16 %v1302_v63  ;;  %v5299_v52 = vld [vmem:[#allocation6 + $0x50] sm:$0xff]  ;;  %v5300_v2 = vld [vmem:[#allocation6 + $0x48] sm:$0xff]  ;;  %v5302_v63 = vld [vmem:[#allocation6 + $0x38] sm:$0xff] }
 0x17f   : > { %v1447_v6 = vrot.slane %v1419_v41, 1  ;;  %v1449_v36 = vrot.slane %v1420_v0, 1  ;;  %v1423_v29 = vpack.c.b16 %v1405_v31, %v1405_v31  ;;  %v2166_v0 = vrot.slane %v4500_v12, 2  ;;  %v4988_v31 = vld [vmem:[#allocation2 + $0x4] sm:$0xf] }
 0x180   : > { %v1452_v27 = vsel %vm1425_vm4, %v1445_v8, %v1451_v22  ;;  %v5076_v8 = vld [vmem:[#allocation9 + $0x230] sm:$0xff]  ;;  %v1424_v13 = vpack.c.b16 %v1406_v30, %v1406_v30  ;;  %v4495_v12 = vld [vmem:[#allocation2 + $0x48] sm:$0xf] }
 0x181   : > { %1709 = vmatmul.bf16.gmra.mxu3 %v1452_v27  ;;  %v1448_v3 = vsel %vm1425_vm4, %v1441_v55, %v1447_v6  ;;  %v1450_v60 = vsel %vm1425_vm4, %v1443_v14, %v1449_v36  ;;  %2510 = vmatpush.msra.mxu2 %v5294_v34  ;;  %v1404_v55 = vunpack.c.l.b16 %v1301_v24  ;;  %v5295_v14 = vld [vmem:[#allocation6 + $0x70] sm:$0xff]  ;;  %v1455_v56 = vrot.slane %v1423_v29, 1  ;;  %v5040_v27 = vld [vmem:[#allocation2 + $0x20] sm:$0xf0] }
 0x182   : > { %1641 = vmatmul.bf16.gmra.mxu1 %v1448_v3  ;;  %1675 = vmatmul.bf16.gmra.mxu2 %v1450_v60  ;;  %v1457_v15 = vrot.slane %v1424_v13, 1  ;;  %v4483_v3 = vld [vmem:[#allocation2 + $0x30] sm:$0xf]  ;;  %v5043_v60 = vld [vmem:[#allocation2 + $0x38] sm:$0xf0]  ;;  %v5304_v24 = vld [vmem:[#allocation6 + $0x28] sm:$0xff] }
 0x183   : > { %2511 = vmatpush.msra.mxu2 %v5295_v14  ;;  %2416 = vmatpush.bf16.msra.mxu1 %v5076_v8  ;;  %v1422_v5 = vpack.c.b16 %v1404_v55, %v1404_v55  ;;  %v1456_v41 = vsel %vm1425_vm4, %v1449_v36, %v1455_v56  ;;  %v4484_v36 = vor.u32 %v5043_v60, %v4483_v3  ;;  %v4509_v30 = vld [vmem:[#allocation2 + $0x6c] sm:$0xf0]  ;;  %v5305_v8 = vld [vmem:[#allocation6 + $0x20] sm:$0xff]  ;;  %v4371_v14 = vld [vmem:[#allocation2 + $0x8] sm:$0xf] }
 0x184   : > { %v1458_v28 = vsel %vm1425_vm4, %v1451_v22, %v1457_v15  ;;  %v2167_v22 = vsel %vm2154_vm13, %v2159_v37, %v2166_v0  ;;  %v4990_v13 = vld [vmem:[#allocation2 + $0x10] sm:$0xf0]  ;;  %v4512_v37 = vor.u32 %v5048_v1, %v4509_v30  ;;  %v5074_v15 = vld [vmem:[#allocation9 + $0x220] sm:$0xff] }
 0x185   : > { %2512 = vmatpush.msra.mxu2 %v5296_v44  ;;  %v1453_v16 = vrot.slane %v1422_v5, 1  ;;  %v2156_v55 = vrot.slane %v4484_v36, 2  ;;  %v5306_v44 = vld [vmem:[#allocation6 + $0x18] sm:$0xff]  ;;  %v5307_v5 = vld [vmem:[#allocation6 + $0x10] sm:$0xff]  ;;  %v4372_v40 = vor.u32 %v4990_v13, %v4371_v14  ;;  %v5309_v56 = vld [vmem:[#allocation6] sm:$0xff] }
 0x186   : > { %2389 = vmatmul.bf16.vlgmr.msra.gmra.mxu0 %v2160_v59  ;;  %v4365_v59 = vld [vmem:[#allocation2 + $0xc] sm:$0xf0] }
 0x187   : > { %2513 = vmatpush.msra.mxu2 %v5297_v61  ;;  %v1454_v51 = vsel %vm1425_vm4, %v1447_v6, %v1453_v16  ;;  %2417 = vmatpush.bf16.msra.mxu1 %v5075_v26  ;;  %v4472_v6 = vor.u32 %v5040_v27, %v4471_v46  ;;  %v4368_v4 = vor.u32 %v4988_v31, %v4365_v59  ;;  %v2172_v61 = vrot.slane %v4512_v37, 2  ;;  %v5073_v16 = vld [vmem:[#allocation9 + $0x218] sm:$0xff]  ;;  %v5072_v3 = vld [vmem:[#allocation9 + $0x210] sm:$0xff]  ;;  %v5070_v37 = vld [vmem:[#allocation9 + $0x200] sm:$0xff] }
 0x188   : > { %v1740_v36 = vld [vmem:[#allocation2 + $0x90] sm:$0x33] }
 0x189   : > { %2514 = vmatpush.msra.mxu2 %v5298_v18  ;;  %v2155_v34 = vrot.slane %v4472_v6, 2  ;;  %v5308_v18 = vld [vmem:[#allocation6 + $0x8] sm:$0xff] }
 0x18b   : > { %2515 = vmatpush.msra.mxu2 %v5299_v52  ;;  %v2157_v29 = vsel %vm2154_vm13, %v2155_v34, %v2156_v55  ;;  %2418 = vmatpush.bf16.msra.mxu1 %v5074_v15  ;;  %v5046_v52 = vld [vmem:[#allocation2 + $0x50] sm:$0xf0] }
 0x18d   : > { %2516 = vmatpush.msra.mxu2 %v5300_v2  ;;  %v4496_v2 = vor.u32 %v5046_v52, %v4495_v12 }
 0x18f   : > { %2517 = vmatpush.msra.mxu2 %v5301_v19  ;;  %2419 = vmatpush.bf16.msra.mxu1 %v5073_v16  ;;  %v2164_v26 = vrot.slane %v4496_v2, 2 }
 0x191   : > { %1714 = vmatmul.bf16.gmra.mxu3 %v1458_v28  ;;  %2518 = vmatpush.msra.mxu2 %v5302_v63  ;;  %v2173_v28 = vsel %vm2154_vm13, %v2166_v0, %v2172_v61  ;;  %v2165_v46 = vsel %vm2154_vm13, %v2156_v55, %v2164_v26  ;;  %v4507_v0 = vld [vmem:[#allocation2 + $0x60] sm:$0xf]  ;;  %v5049_v63 = vld [vmem:[#allocation2 + $0x68] sm:$0xf0] }
 0x192   : > { %1646 = vmatmul.bf16.gmra.mxu1 %v1454_v51  ;;  %1680 = vmatmul.bf16.gmra.mxu2 %v1456_v41  ;;  %v5051_v51 = vld [vmem:[#allocation2 + $0x7c] sm:$0xf]  ;;  %v4521_v41 = vld [vmem:[#allocation2 + $0x84] sm:$0xf0] }
 0x193   : > { %2519 = vmatpush.msra.mxu2 %v5303_v54  ;;  %v4524_v19 = vor.u32 %v5051_v51, %v4521_v41  ;;  %2420 = vmatpush.bf16.msra.mxu1 %v5072_v3 }
 0x195   : > { %2520 = vmatpush.msra.mxu2 %v5304_v24  ;;  %v2178_v27 = vrot.slane %v4524_v19, 2  ;;  %v4508_v24 = vor.u32 %v5049_v63, %v4507_v0  ;;  %v5041_v19 = vld [vmem:[#allocation2 + $0x28] sm:$0xf0] }
 0x196   : > { %2394 = vmatmul.bf16.gmra.mxu0 %v2167_v22  ;;  %v5071_v22 = vld [vmem:[#allocation9 + $0x208] sm:$0xff] }
 0x197   : > { %2521 = vmatpush.msra.mxu2 %v5305_v8  ;;  %v2179_v54 = vsel %vm2154_vm13, %v2172_v61, %v2178_v27  ;;  %2421 = vmatpush.bf16.msra.mxu1 %v5071_v22  ;;  %v2134_v8 = vunpack.c.h.b16 %v1740_v36 }
 0x199   : > { %2522 = vmatpush.msra.mxu2 %v5306_v44  ;;  %v4519_v44 = vld [vmem:[#allocation2 + $0x78] sm:$0xf] }
 0x19b   : > { %2523 = vmatpush.msra.mxu2 %v5307_v5  ;;  %2422 = vmatpush.bf16.msra.mxu1 %v5070_v37  ;;  %v5052_v5 = vld [vmem:[#allocation2 + $0x80] sm:$0xf0] }
 0x19d   : > { %2524 = vmatpush.msra.mxu2 %v5308_v18 }
 0x19f   : > { %2525 = vmatpush.msra.mxu2 %v5309_v56 }
 0x1a1   : > { %2355 = vmatmul.bf16.vlgmr.msrb.gmra.mxu3 %v2157_v29 }
 0x1a2   : > { %2017 = vmatmul.bf16.vlgmr.msrb.gmra.mxu1 %v4368_v4  ;;  %2051 = vmatmul.bf16.vlgmr.msrb.gmra.mxu2 %v4372_v40  ;;  %v4520_v4 = vor.u32 %v5052_v5, %v4519_v44  ;;  %v1984_v2 = vpop.f32.mrf.mxu0 }
 0x1a4   : > { %v2176_v56 = vrot.slane %v4520_v4, 2 }
 0x1a6   : > { %2399 = vmatmul.bf16.gmra.mxu0 %v2173_v28 }
 0x1aa   : > { %v6576_v22 = vpop.f32.mrf.mxu0 }
 0x1b1   : > { %2360 = vmatmul.bf16.gmra.mxu3 %v2165_v46  ;;  %v5044_v46 = vld [vmem:[#allocation2 + $0x40] sm:$0xf0] }
 0x1b2   : > { %2022 = vmatmul.bf16.gmra.mxu1 %v6489_v7  ;;  %2056 = vmatmul.bf16.gmra.mxu2 %v6418_v25  ;;  %v2170_v7 = vrot.slane %v4508_v24, 2  ;;  %v2152_v25 = vpack.c.b16 %v2134_v8, %v2134_v8 }
 0x1b3   : > { %v1695_v6 = vpop.f32.mrf.mxu3 }
 0x1b4   : > { %v2171_v31 = vsel %vm2154_vm13, %v2164_v26, %v2170_v7  ;;  %v2184_v13 = vrot.slane %v2152_v25, 2  ;;  %v2177_v12 = vsel %vm2154_vm13, %v2170_v7, %v2176_v56  ;;  %v4503_v7 = vld [vmem:[#allocation2 + $0x50] sm:$0xf]  ;;  %v5047_v25 = vld [vmem:[#allocation2 + $0x58] sm:$0xf0] }
 0x1b5   : > { %v1627_v60 = vpop.f32.mrf.mxu1 }
 0x1b6   : > { %2404 = vmatmul.bf16.gmra.mxu0 %v2179_v54  ;;  %v2185_v29 = vsel %vm2154_vm13, %v2178_v27, %v2184_v13 }
 0x1bb   : > { %v1661_v1 = vpop.f32.mrf.mxu2  ;;  %v6555_v59 = vpop.f32.mrf.mxu3 }
 0x1bc   : > { %v1662_v30 = vadd.f32 %v1661_v1, %v1627_v60 }
 0x1bd   : > { %v6552_v55 = vpop.f32.mrf.mxu1 }
 0x1be   : > { %v6550_v34 = vadd.f32 %v1695_v6, %v1662_v30  ;;  %v1989_v30 = vpop.f32.mrf.mxu0 }
 0x1c1   : > { %2365 = vmatmul.bf16.gmra.mxu3 %v2171_v31  ;;  %v4504_v31 = vor.u32 %v5047_v25, %v4503_v7 }
 0x1c2   : > { %2027 = vmatmul.bf16.gmra.mxu1 %v6495_v35  ;;  %2061 = vmatmul.bf16.gmra.mxu2 %v6427_v50  ;;  %v2133_v50 = vunpack.c.l.b16 %v1740_v36 }
 0x1c3   : > { %v6557_v14 = vpop.f32.mrf.mxu2  ;;  %v2168_v37 = vrot.slane %v4504_v31, 2 }
 0x1c4   : > { %v1700_v18 = vpop.f32.mrf.mxu3  ;;  %v2151_v35 = vpack.c.b16 %v2133_v50, %v2133_v50  ;;  %v1664_v17 = vadd.f32 %v6557_v14, %v6552_v55 }
 0x1c5   : > { %v1632_v40 = vpop.f32.mrf.mxu1 }
 0x1c6   : > { %2409 = vmatmul.bf16.gmra.mxu0 %v2185_v29  ;;  %v2182_v52 = vrot.slane %v2151_v35, 2  ;;  %v6583_v44 = vpop.f32.mrf.mxu0 }
 0x1c8   : > { %v2183_v51 = vsel %vm2154_vm13, %v2176_v56, %v2182_v52 }
 0x1cb   : > { %v1666_v61 = vpop.f32.mrf.mxu2 }
 0x1cc   : > { %v1667_v15 = vadd.f32 %v1666_v61, %v1632_v40  ;;  %v6574_v26 = vpop.f32.mrf.mxu3 }
 0x1cd   : > { %v6567_v28 = vpop.f32.mrf.mxu1 }
 0x1ce   : > { %v6562_v16 = vadd.f32 %v1700_v18, %v1667_v15  ;;  %v4515_v15 = vld [vmem:[#allocation2 + $0x68] sm:$0xf]  ;;  %v5050_v18 = vld [vmem:[#allocation2 + $0x70] sm:$0xf0] }
 0x1cf   : > { %v4516_v35 = vor.u32 %v5050_v18, %v4515_v15 }
 0x1d0   : > { %v1990_v15 = vadd.f32 %v1989_v30, %v6562_v16 }
 0x1d1   : > { %2370 = vmatmul.bf16.gmra.mxu3 %v2177_v12  ;;  %v1994_v12 = vpop.f32.mrf.mxu0 }
 0x1d2   : > { %2032 = vmatmul.bf16.gmra.mxu1 %v6502_v21  ;;  %2066 = vmatmul.bf16.gmra.mxu2 %v6431_v58  ;;  %v4479_v21 = vld [vmem:[#allocation2 + $0x20] sm:$0xc]  ;;  %v4491_v58 = vld [vmem:[#allocation2 + $0x38] sm:$0xf] }
 0x1d3   : > { %v6570_v41 = vpop.f32.mrf.mxu2  ;;  %v4480_v3 = vor.u32 %v5041_v19, %v4479_v21  ;;  %v4492_v60 = vor.u32 %v5044_v46, %v4491_v58  ;;  %v2174_v21 = vrot.slane %v4516_v35, 2 }
 0x1d4   : > { %v1669_v48 = vadd.f32 %v6570_v41, %v6567_v28 }
 0x1d5   : > { %v2161_v54 = vrot.slane %v4480_v3, 2  ;;  %v2162_v6 = vrot.slane %v4492_v60, 2  ;;  %v2175_v58 = vsel %vm2154_vm13, %v2168_v37, %v2174_v21  ;;  %v4527_v60 = vld [vmem:[#allocation2 + $0x80] sm:$0xf] }
 0x1d6   : > { %v1703_v42 = vadd.f32 %v6574_v26, %v1669_v48 }
 0x1d7   : > { %v2169_v29 = vsel %vm2154_vm13, %v2162_v6, %v2168_v37  ;;  %v1741_v37 = vld [vmem:[#allocation2 + $0x98] sm:$0x3] }
 0x1d9   : > { %v6593_v46 = vpop.f32.mrf.mxu0 }
 0x1e1   : > { %2375 = vmatmul.bf16.gmra.mxu3 %v2183_v51 }
 0x1e2   : > { %2037 = vmatmul.bf16.gmra.mxu1 %v6528_v62  ;;  %2071 = vmatmul.bf16.gmra.mxu2 %v6520_v47  ;;  %v2163_v62 = vsel %vm2154_vm13, %v2161_v54, %v2162_v6 }
 0x1e5   : > { %v1637_v27 = vpop.f32.mrf.mxu1 }
 0x1ea   : > { %v1705_v36 = vpop.f32.mrf.mxu3 }
 0x1eb   : > { %v1671_v0 = vpop.f32.mrf.mxu2 }
 0x1ec   : > { %v1672_v63 = vadd.f32 %v1671_v0, %v1637_v27  ;;  %v5053_v0 = vld [vmem:[#allocation2 + $0x88] sm:$0xf0] }
 0x1ed   : > { %v1639_v47 = vpop.f32.mrf.mxu1 }
 0x1ee   : > { %v1706_v24 = vadd.f32 %v1705_v36, %v1672_v63  ;;  %v4528_v36 = vor.u32 %v5053_v0, %v4527_v60 }
 0x1f2   : > { %2423 = vmatmul.bf16.vlgmr.msra.gmra.mxu1 %v2163_v62  ;;  %v6581_v13 = vpop.f32.mrf.mxu3  ;;  %v1999_v62 = vpop.f32.mrf.mxu0 }
 0x1f3   : > { %v1673_v1 = vpop.f32.mrf.mxu2 }
 0x1f4   : > { %v6579_v8 = vadd.f32 %v1673_v1, %v1639_v47  ;;  %v2180_v47 = vrot.slane %v4528_v36, 2  ;;  %v1985_v1 = vadd.f32 %v1984_v2, %v6550_v34 }
 0x1f6   : > { %v2181_v31 = vsel %vm2154_vm13, %v2174_v21, %v2180_v47  ;;  %v1708_v28 = vadd.f32 %v6581_v13, %v6579_v8 }
 0x1ff   : > { %v1642_v5 = vpop.f32.mrf.mxu1 }
 0x202   : > { %2428 = vmatmul.bf16.gmra.mxu1 %v2169_v29  ;;  %v6601_v29 = vpop.f32.mrf.mxu0 }
 0x204   : > { %v1710_v4 = vpop.f32.mrf.mxu3 }
 0x205   : > { %v1676_v40 = vpop.f32.mrf.mxu2 }
 0x206   : > { %v1677_v61 = vadd.f32 %v1676_v40, %v1642_v5  ;;  %v2135_v5 = vunpack.c.l.b16 %v1741_v37 }
 0x207   : > { %v6586_v56 = vpop.f32.mrf.mxu1 }
 0x208   : > { %v1711_v50 = vadd.f32 %v1710_v4, %v1677_v61  ;;  %v2153_v40 = vpack.c.b16 %v2135_v5, %v2135_v5 }
 0x20a   : > { %v2186_v61 = vrot.slane %v2153_v40, 2  ;;  %v2004_v35 = vpop.f32.mrf.mxu0 }
 0x20c   : > { %v6588_v52 = vpop.f32.mrf.mxu3  ;;  %v2187_v34 = vsel %vm2154_vm13, %v2180_v47, %v2186_v61 }
 0x20d   : > { %v6590_v51 = vpop.f32.mrf.mxu2 }
 0x20f   : > { %v1647_v19 = vpop.f32.mrf.mxu1 }
 0x212   : > { %2433 = vmatmul.bf16.gmra.mxu1 %v2175_v58  ;;  %v1995_v58 = vadd.f32 %v1994_v12, %v1706_v24  ;;  %v6617_v30 = vpop.f32.mrf.mxu0 }
 0x213   : > { %7459 = vst [vmem:[#allocation32_spill] sm:$0xff] %v6617_v30  ;;  %v1698_v30 = vadd.f32 %v6555_v59, %v1664_v17 }
 0x214   : > { %v1715_v63 = vpop.f32.mrf.mxu3 }
 0x215   : > { %v1681_v27 = vpop.f32.mrf.mxu2  ;;  %v1987_v14 = vadd.f32 %v6576_v22, %v1698_v30  ;;  %v1992_v30 = vadd.f32 %v6583_v44, %v1703_v42  ;;  %v1997_v42 = vadd.f32 %v6593_v46, %v1708_v28 }
 0x216   : > { %v1682_v3 = vadd.f32 %v1681_v27, %v1647_v19 }
 0x217   : > { %v6595_v54 = vpop.f32.mrf.mxu1 }
 0x218   : > { %v1716_v6 = vadd.f32 %v1715_v63, %v1682_v3  ;;  %v2000_v63 = vadd.f32 %v1999_v62, %v1711_v50 }
 0x21a   : > { %v2005_v2 = vadd.f32 %v2004_v35, %v1716_v6 }
 0x21c   : > { %v6615_v0 = vpop.f32.mrf.mxu3 }
 0x21d   : > { %7458 = vst [vmem:[#allocation31_spill] sm:$0xff] %v6615_v0  ;;  %v6619_v36 = vpop.f32.mrf.mxu2 }
 0x21f   : > { %v2018_v7 = vpop.f32.mrf.mxu1 }
 0x220   : > { %v6598_v25 = vadd.f32 %v2018_v7, %v1985_v1  ;;  %v2390_v7 = vpop.f32.mrf.mxu0 }
 0x222   : > { %2438 = vmatmul.bf16.gmra.mxu1 %v2181_v31 }
 0x224   : > { %v2356_v6 = vpop.f32.mrf.mxu3 }
 0x225   : > { %v2052_v24 = vpop.f32.mrf.mxu2 }
 0x227   : > { %v6603_v4 = vpop.f32.mrf.mxu1 }
 0x228   : > { %v2392_v5 = vpop.f32.mrf.mxu0 }
 0x22c   : > { %v2358_v12 = vpop.f32.mrf.mxu3 }
 0x22d   : > { %v2054_v40 = vpop.f32.mrf.mxu2 }
 0x22f   : > { %v2023_v18 = vpop.f32.mrf.mxu1 }
 0x230   : > { %v6606_v19 = vadd.f32 %v2023_v18, %v1990_v15  ;;  %v2395_v62 = vpop.f32.mrf.mxu0 }
 0x232   : > { %2443 = vmatmul.bf16.gmra.mxu1 %v2187_v34 }
 0x234   : > { %v2361_v50 = vpop.f32.mrf.mxu3 }
 0x235   : > { %v2057_v15 = vpop.f32.mrf.mxu2 }
 0x237   : > { %v6609_v21 = vpop.f32.mrf.mxu1 }
 0x238   : > { %v2026_v13 = vadd.f32 %v6609_v21, %v1992_v30 }
 0x23c   : > { %v2363_v35 = vpop.f32.mrf.mxu3 }
 0x23f   : > { %v2028_v27 = vpop.f32.mrf.mxu1 }
 0x240   : > { %v6611_v3 = vadd.f32 %v2028_v27, %v1995_v58  ;;  %v2397_v58 = vpop.f32.mrf.mxu0  ;;  %v2059_v27 = vpop.f32.mrf.mxu2 }
 0x247   : > { %v6613_v60 = vpop.f32.mrf.mxu1 }
 0x248   : > { %v2400_v9 = vpop.f32.mrf.mxu0  ;;  %v2062_v32 = vpop.f32.mrf.mxu2  ;;  %v2031_v21 = vadd.f32 %v6613_v60, %v1997_v42  ;;  %v5111_v42 = vld [vmem:[#allocation11 + $0xf0] sm:$0xff] }
 0x24f   : > { %v2033_v16 = vpop.f32.mrf.mxu1 }
 0x250   : > { %v6621_v1 = vadd.f32 %v2033_v16, %v2000_v63  ;;  %v2366_v63 = vpop.f32.mrf.mxu3 }
 0x252   : > { %7460 = vst [vmem:[#allocation33_spill] sm:$0xff] %v6621_v1 }
 0x257   : > { %v6623_v47 = vpop.f32.mrf.mxu1 }
 0x258   : > { %7461 = vst [vmem:[#allocation34_spill] sm:$0xff] %v6623_v47  ;;  %v2368_v57 = vpop.f32.mrf.mxu3 }
 0x25f   : > { %v2038_v31 = vpop.f32.mrf.mxu1 }
 0x260   : > { %v6625_v37 = vadd.f32 %v2038_v31, %v2005_v2  ;;  %v2402_v2 = vpop.f32.mrf.mxu0  ;;  %v2064_v31 = vpop.f32.mrf.mxu2 }
 0x261   : > { %v2371_v23 = vpop.f32.mrf.mxu3 }
 0x262   : > { %7462 = vst [vmem:[#allocation35_spill] sm:$0xff] %v6625_v37 }
 0x267   : > { %v6627_v61 = vpop.f32.mrf.mxu1 }
 0x268   : > { %7463 = vst [vmem:[#allocation36_spill] sm:$0xff] %v6627_v61  ;;  %v2405_v20 = vpop.f32.mrf.mxu0  ;;  %v6631_v11 = vpop.f32.mrf.mxu2  ;;  %v6636_v61 = vld [vmem:[%s7336_s4] ss:$0 sm:$0xff] }
 0x269   : > { %7464 = vst [vmem:[#allocation37_spill] sm:$0xff] %v6631_v11  ;;  %v2359_v33 = vadd.f32 %v6636_v61, %v2358_v12  ;;  %v2373_v37 = vpop.f32.mrf.mxu3  ;;  %v2357_v0 = vadd.f32 %v6636_v61, %v2356_v6  ;;  %v2362_v55 = vadd.f32 %v6636_v61, %v2361_v50  ;;  %v2364_v47 = vadd.f32 %v6636_v61, %v2363_v35 }
 0x26a   : > { %v2021_v11 = vadd.f32 %v6603_v4, %v1987_v14  ;;  %v2367_v41 = vadd.f32 %v6636_v61, %v2366_v63  ;;  %v2369_v4 = vadd.f32 %v6636_v61, %v2368_v57 }
 0x26b   : > { %v2393_v49 = vadd.f32 %v2392_v5, %v2359_v33  ;;  %v2391_v17 = vadd.f32 %v2390_v7, %v2357_v0  ;;  %v2396_v12 = vadd.f32 %v2395_v62, %v2362_v55  ;;  %v1679_v33 = vadd.f32 %v6590_v51, %v6586_v56 }
 0x26c   : > { %v2055_v22 = vadd.f32 %v2054_v40, %v2021_v11  ;;  %v2053_v0 = vadd.f32 %v2052_v24, %v6598_v25  ;;  %v2058_v7 = vadd.f32 %v2057_v15, %v6606_v19  ;;  %v2372_v5 = vadd.f32 %v6636_v61, %v2371_v23 }
 0x26d   : > { %v2401_v11 = vadd.f32 %v2400_v9, %v2367_v41  ;;  %v1713_v51 = vadd.f32 %v6588_v52, %v1679_v33  ;;  %v2060_v25 = vadd.f32 %v2059_v27, %v2026_v13  ;;  %v2374_v19 = vadd.f32 %v6636_v61, %v2373_v37 }
 0x26e   : > { %v2403_v24 = vadd.f32 %v2402_v2, %v2369_v4  ;;  %v2063_v9 = vadd.f32 %v2062_v32, %v6611_v3  ;;  %v2406_v40 = vadd.f32 %v2405_v20, %v2372_v5  ;;  %v2065_v15 = vadd.f32 %v2064_v31, %v2031_v21  ;;  %v7465_v20 = vld [vmem:[#allocation33_spill] sm:$0xff]  ;;  %v7468_v31 = vld [vmem:[#allocation19_spill] sm:$0xff] }
 0x26f   : > { %v2424_v18 = vpop.f32.mrf.mxu1  ;;  %v7472_v5 = vld [vmem:[#allocation25_spill] sm:$0xff] }
 0x270   : > { %v2407_v6 = vpop.f32.mrf.mxu0  ;;  %v2069_v50 = vpop.f32.mrf.mxu2  ;;  %v2425_v48 = vadd.f32 %v2424_v18, %v2391_v17  ;;  %v2002_v18 = vadd.f32 %v6601_v29, %v1713_v51  ;;  %v7466_v27 = vld [vmem:[#allocation37_spill] sm:$0xff] }
 0x271   : > { %v2376_v62 = vpop.f32.mrf.mxu3  ;;  %v2408_v3 = vadd.f32 %v2407_v6, %v2374_v19  ;;  %v2068_v29 = vadd.f32 %v7466_v27, %v7465_v20  ;;  %v7469_v6 = vld [vmem:[#allocation20_spill] sm:$0xff] }
 0x272   : > { %v6663_v44 = vadd.f32 %v2425_v48, %v2053_v0  ;;  %v2377_v35 = vadd.f32 %v6636_v61, %v2376_v62 }
 0x274   : > { %v2459_v37 = vmul.f32 %v5911_v43, %v6663_v44 }
 0x277   : > { %v2426_v34 = vpop.f32.mrf.mxu1 }
 0x278   : > { %v2427_v59 = vadd.f32 %v2426_v34, %v2393_v49  ;;  %v2398_v49 = vadd.f32 %v2397_v58, %v2364_v47  ;;  %v2410_v60 = vpop.f32.mrf.mxu0  ;;  %v2072_v34 = vpop.f32.mrf.mxu2 }
 0x279   : > { %v2378_v41 = vpop.f32.mrf.mxu3  ;;  %v2411_v33 = vadd.f32 %v2410_v60, %v2377_v35 }
 0x27a   : > { %v6657_v8 = vadd.f32 %v2427_v59, %v2055_v22  ;;  %v2484_v59 = vmul.f32 %v2459_v37, %v2459_v37  ;;  %v7470_v22 = vld [vmem:[#allocation31_spill] sm:$0xff] }
 0x27c   : > { %v2460_v23 = vmul.f32 %v5997_v38, %v6657_v8 }
 0x27e   : > { %v2485_v63 = vmul.f32 %v2460_v23, %v2460_v23 }
 0x27f   : > { %v2429_v16 = vpop.f32.mrf.mxu1 }
 0x280   : > { %v2430_v26 = vadd.f32 %v2429_v16, %v2396_v12  ;;  %v7467_v16 = vld [vmem:[#allocation34_spill] sm:$0xff]  ;;  %v2469_v12 = vadd.f32 %v2460_v23, %v2459_v37  ;;  %v2494_v4 = vadd.f32 %v2485_v63, %v2484_v59  ;;  %v7474_v23 = vld [vmem:[#allocation32_spill] sm:$0xff]  ;;  %v7475_v37 = vld [vmem:[#allocation27_spill] sm:$0xff] }
 0x281   : > { %v2036_v2 = vadd.f32 %v7467_v16, %v2002_v18 }
 0x282   : > { %v6665_v57 = vadd.f32 %v2430_v26, %v2058_v7  ;;  %v7471_v26 = vld [vmem:[#allocation35_spill] sm:$0xff]  ;;  %v5112_v7 = vld [vmem:[#allocation11 + $0xf8] sm:$0xff] }
 0x283   : > { %v2073_v30 = vadd.f32 %v2072_v34, %v7471_v26  ;;  %3245 = vmatpush.bf16.msra.mxu3 %v5112_v7 }
 0x287   : > { %v2431_v53 = vpop.f32.mrf.mxu1  ;;  %3246 = vmatpush.bf16.msra.mxu3 %v5111_v42 }
 0x288   : > { %v2432_v56 = vadd.f32 %v2431_v53, %v2398_v49 }
 0x28a   : > { %v6672_v52 = vadd.f32 %v2432_v56, %v2060_v25 }
 0x28c   : > { %v2462_v55 = vmul.f32 %v7468_v31, %v6672_v52 }
 0x28e   : > { %v2487_v13 = vmul.f32 %v2462_v55, %v2462_v55 }
 0x28f   : > { %v2434_v45 = vpop.f32.mrf.mxu1 }
 0x290   : > { %v2435_v47 = vadd.f32 %v2434_v45, %v2401_v11  ;;  %v2461_v45 = vmul.f32 %v6000_v10, %v6665_v57  ;;  %v2379_v11 = vadd.f32 %v6636_v61, %v2378_v41 }
 0x292   : > { %v6680_v58 = vadd.f32 %v2435_v47, %v2063_v9  ;;  %v2486_v28 = vmul.f32 %v2461_v45, %v2461_v45  ;;  %v2470_v49 = vadd.f32 %v2469_v12, %v2461_v45  ;;  %v7473_v47 = vld [vmem:[#allocation26_spill] sm:$0xff]  ;;  %v2412_v9 = vpop.f32.mrf.mxu0  ;;  %v7476_v45 = vld [vmem:[#allocation36_spill] sm:$0xff] }
 0x293   : > { %v2413_v35 = vadd.f32 %v2412_v9, %v2379_v11 }
 0x294   : > { %v2495_v51 = vadd.f32 %v2494_v4, %v2486_v28  ;;  %v2471_v25 = vadd.f32 %v2470_v49, %v2462_v55 }
 0x297   : > { %v2436_v39 = vpop.f32.mrf.mxu1 }
 0x298   : > { %v2437_v46 = vadd.f32 %v2436_v39, %v2403_v24  ;;  %v1684_v39 = vadd.f32 %v6619_v36, %v6595_v54  ;;  %v2463_v54 = vmul.f32 %v7469_v6, %v6680_v58 }
 0x29a   : > { %v6689_v14 = vadd.f32 %v2437_v46, %v2065_v15  ;;  %v1718_v48 = vadd.f32 %v7470_v22, %v1684_v39  ;;  %v2488_v19 = vmul.f32 %v2463_v54, %v2463_v54  ;;  %v2074_v46 = vpop.f32.mrf.mxu2  ;;  %v2472_v15 = vadd.f32 %v2471_v25, %v2463_v54  ;;  %v7477_v39 = vld [vmem:[#allocation28_spill] sm:$0xff]  ;;  %v7478_v54 = vld [vmem:[#allocation29_spill] sm:$0xff] }
 0x29c   : > { %v2464_v62 = vmul.f32 %v7472_v5, %v6689_v14 }
 0x29e   : > { %v2489_v18 = vmul.f32 %v2464_v62, %v2464_v62 }
 0x29f   : > { %v2439_v1 = vpop.f32.mrf.mxu1 }
 0x2a0   : > { %v2440_v32 = vadd.f32 %v2439_v1, %v2406_v40  ;;  %v2070_v1 = vadd.f32 %v2069_v50, %v2036_v2  ;;  %v2496_v40 = vadd.f32 %v2495_v51, %v2487_v13 }
 0x2a2   : > { %v6693_v36 = vadd.f32 %v2440_v32, %v2068_v29  ;;  %v2497_v34 = vadd.f32 %v2496_v40, %v2488_v19  ;;  %v2473_v32 = vadd.f32 %v2472_v15, %v2464_v62 }
 0x2a4   : > { %v2465_v24 = vmul.f32 %v7473_v47, %v6693_v36  ;;  %v2498_v63 = vadd.f32 %v2497_v34, %v2489_v18  ;;  %v5128_v34 = vld [vmem:[#allocation11 + $0x178] sm:$0xff] }
 0x2a5   : > { %3313 = vmatpush.bf16.msrb.mxu2 %v5128_v34 }
 0x2a6   : > { %v2474_v16 = vadd.f32 %v2473_v32, %v2465_v24  ;;  %v5120_v32 = vld [vmem:[#allocation11 + $0x138] sm:$0xff] }
 0x2a7   : > { %v2441_v53 = vpop.f32.mrf.mxu1  ;;  %3279 = vmatpush.bf16.msrb.mxu0 %v5120_v32 }
 0x2a8   : > { %v2442_v17 = vadd.f32 %v2441_v53, %v2408_v3  ;;  %v2007_v53 = vadd.f32 %v7474_v23, %v1718_v48  ;;  %v2490_v3 = vmul.f32 %v2465_v24, %v2465_v24 }
 0x2aa   : > { %v6699_v50 = vadd.f32 %v2442_v17, %v2070_v1  ;;  %v2041_v60 = vadd.f32 %v7476_v45, %v2007_v53  ;;  %v2499_v17 = vadd.f32 %v2498_v63, %v2490_v3  ;;  %v5088_v45 = vld [vmem:[#allocation11 + $0x38] sm:$0xff]  ;;  %v5087_v3 = vld [vmem:[#allocation11 + $0x30] sm:$0xff] }
 0x2ab   : > { %3602 = vmatpush.bf16.msrb.mxu1 %v5088_v45 }
 0x2ac   : > { %v2466_v61 = vmul.f32 %v7475_v37, %v6699_v50  ;;  %v2075_v27 = vadd.f32 %v2074_v46, %v2041_v60 }
 0x2ae   : > { %v2491_v2 = vmul.f32 %v2466_v61, %v2466_v61  ;;  %v2475_v59 = vadd.f32 %v2474_v16, %v2466_v61  ;;  %v5110_v61 = vld [vmem:[#allocation11 + $0xe8] sm:$0xff]  ;;  %v5108_v16 = vld [vmem:[#allocation11 + $0xd8] sm:$0xff] }
 0x2af   : > { %v2444_v0 = vpop.f32.mrf.mxu1  ;;  %3247 = vmatpush.bf16.msra.mxu3 %v5110_v61  ;;  %3603 = vmatpush.bf16.msrb.mxu1 %v5087_v3 }
 0x2b0   : > { %v2445_v56 = vadd.f32 %v2444_v0, %v2411_v33  ;;  %v2500_v1 = vadd.f32 %v2499_v17, %v2491_v2  ;;  %v5086_v2 = vld [vmem:[#allocation11 + $0x28] sm:$0xff] }
 0x2b1   : > { %v5126_v17 = vld [vmem:[#allocation11 + $0x168] sm:$0xff] }
 0x2b2   : > { %v6704_v21 = vadd.f32 %v2445_v56, %v2073_v30 }
 0x2b3   : > { %3604 = vmatpush.bf16.msrb.mxu1 %v5086_v2 }
 0x2b4   : > { %v2467_v20 = vmul.f32 %v7477_v39, %v6704_v21 }
 0x2b6   : > { %v2492_v12 = vmul.f32 %v2467_v20, %v2467_v20  ;;  %v2476_v41 = vadd.f32 %v2475_v59, %v2467_v20  ;;  %v5118_v59 = vld [vmem:[#allocation11 + $0x128] sm:$0xff] }
 0x2b7   : > { %v2446_v29 = vpop.f32.mrf.mxu1 }
 0x2b8   : > { %v2447_v55 = vadd.f32 %v2446_v29, %v2413_v35  ;;  %v2501_v22 = vadd.f32 %v2500_v1, %v2492_v12  ;;  %v5109_v35 = vld [vmem:[#allocation11 + $0xe0] sm:$0xff]  ;;  %v5119_v29 = vld [vmem:[#allocation11 + $0x130] sm:$0xff] }
 0x2b9   : > { %3248 = vmatpush.bf16.msra.mxu3 %v5109_v35  ;;  %3280 = vmatpush.bf16.msrb.mxu0 %v5119_v29  ;;  %v2546_v1 = vld [vmem:[%s7337_s5] sm:$0x1] }
 0x2ba   : > { %v6712_v28 = vadd.f32 %v2447_v55, %v2075_v27  ;;  %v5127_v27 = vld [vmem:[#allocation11 + $0x170] sm:$0xff] }
 0x2bb   : > { %3314 = vmatpush.bf16.msrb.mxu2 %v5127_v27 }
 0x2bc   : > { %v2468_v33 = vmul.f32 %v7478_v54, %v6712_v28 }
 0x2bd   : > { %3249 = vmatpush.bf16.msra.mxu3 %v5108_v16  ;;  %3281 = vmatpush.bf16.msrb.mxu0 %v5118_v59  ;;  %v5114_v16 = vld [vmem:[#allocation11 + $0x108] sm:$0xff] }
 0x2be   : > { %v2477_v48 = vadd.f32 %v2476_v41, %v2468_v33  ;;  %v2493_v26 = vmul.f32 %v2468_v33, %v2468_v33  ;;  %v5107_v41 = vld [vmem:[#allocation11 + $0xd0] sm:$0xff] }
 0x2bf   : > { %3315 = vmatpush.bf16.msrb.mxu2 %v5126_v17 }
 0x2c0   : > { %v2478_v30 = vrot.slane %v2477_v48, 4  ;;  %v2502_v4 = vadd.f32 %v2501_v22, %v2493_v26  ;;  %v5085_v22 = vld [vmem:[#allocation11 + $0x20] sm:$0xff] }
 0x2c1   : > { %v5117_v26 = vld [vmem:[#allocation11 + $0x120] sm:$0xff]  ;;  %3250 = vmatpush.bf16.msra.mxu3 %v5107_v41  ;;  %3605 = vmatpush.bf16.msrb.mxu1 %v5085_v22 }
 0x2c2   : > { %v2479_v49 = vadd.f32 %v2478_v30, %v2477_v48  ;;  %v2503_v0 = vrot.slane %v2502_v4, 4  ;;  %v5125_v48 = vld [vmem:[#allocation11 + $0x160] sm:$0xff]  ;;  %3282 = vmatpush.bf16.msrb.mxu0 %v5117_v26 }
 0x2c3   : > { %3316 = vmatpush.bf16.msrb.mxu2 %v5125_v48  ;;  %v5081_v41 = vld [vmem:[#allocation11] sm:$0xff] }
 0x2c4   : > { %v2480_v7 = vrot.slane %v2479_v49, 2  ;;  %v2504_v13 = vadd.f32 %v2503_v0, %v2502_v4  ;;  %v2551_v4 = vld [vmem:[%s7337_s5 + $0x1] sm:$0x1] }
 0x2c6   : > { %v2481_v62 = vadd.f32 %v2480_v7, %v2479_v49  ;;  %v2505_v56 = vrot.slane %v2504_v13, 2  ;;  %v5106_v49 = vld [vmem:[#allocation11 + $0xc8] sm:$0xff] }
 0x2c7   : > { %3251 = vmatpush.bf16.msra.mxu3 %v5106_v49 }
 0x2c8   : > { %v2482_v11 = vrot.slane %v2481_v62, 1  ;;  %v2506_v51 = vadd.f32 %v2505_v56, %v2504_v13  ;;  %v5084_v13 = vld [vmem:[#allocation11 + $0x18] sm:$0xff] }
 0x2c9   : > { %v5116_v56 = vld [vmem:[#allocation11 + $0x118] sm:$0xff]  ;;  %3606 = vmatpush.bf16.msrb.mxu1 %v5084_v13 }
 0x2ca   : > { %v2507_v42 = vrot.slane %v2506_v51, 1  ;;  %v2483_v25 = vadd.f32 %v2482_v11, %v2481_v62  ;;  %v5124_v62 = vld [vmem:[#allocation11 + $0x158] sm:$0xff]  ;;  %3283 = vmatpush.bf16.msrb.mxu0 %v5116_v56 }
 0x2cb   : > { %3317 = vmatpush.bf16.msrb.mxu2 %v5124_v62  ;;  %v5096_v56 = vld [vmem:[#allocation11 + $0x78] sm:$0xff] }
 0x2cc   : > { %v2508_v19 = vadd.f32 %v2507_v42, %v2506_v51  ;;  %v5105_v42 = vld [vmem:[#allocation11 + $0xc0] sm:$0xff] }
 0x2cd   : > { %3252 = vmatpush.bf16.msra.mxu3 %v5105_v42 }
 0x2ce   : > { %v2509_v24 = vsel %vm7479_vm0, %v2483_v25, %v2508_v19 }
 0x2cf   : > { %2526 = vmatmul.f32.vlgmr.msra.gmra.mxu2 %v2509_v24 }
 0x2d1   : > { %3636 = vmatpush.bf16.msrb.mxu3 %v5096_v56 }
 0x352   : > { %v2527_v23 = vpop.f32.mrf.mxu2 }
 0x353   : > { %v2530_v53 = vmul.f32 %v2527_v23, %v2527_v23 }
 0x355   : > { %v2532_v9 = vrot.slane %v2530_v53, 7 }
 0x357   : > { %v2534_v46 = vsub.f32 %v2527_v23, %v2532_v9 }
 0x359   : > { %v2535_v40 = vadd.f32 1e-05, %v2534_v46 }
 0x35b   : > { %5287 = vrsqrt.f32 %v2535_v40  ;;  %vm2542_vm10 = vweird.f32 %v2535_v40 }
 0x361   : > { %v5288_v15 = vpop.eup %5287 }
 0x362   : > { %v2537_v18 = vmul.f32 %v5288_v15, %v2535_v40  ;;  %vm2543_vm12 = vweird.f32 %v5288_v15 }
 0x363   : > { %vm2544_vm15 = vmor %vm2542_vm10, %vm2543_vm12 }
 0x364   : > { %v2538_v60 = vmul.f32 %v5288_v15, %v2537_v18 }
 0x366   : > { %v2539_v20 = vmul.f32 0.5, %v2538_v60 }
 0x368   : > { %v2540_v63 = vsub.f32 1.5, %v2539_v20 }
 0x36a   : > { %v2541_v55 = vmul.f32 %v5288_v15, %v2540_v63 }
 0x36c   : > { %v2545_v12 = vsel %vm2544_vm15, %v5288_v15, %v2541_v55  ;;  %v5115_v15 = vld [vmem:[#allocation11 + $0x110] sm:$0xff] }
 0x36d   : > { %v2548_v33 = vrot.slane %v2545_v12, 1  ;;  %3284 = vmatpush.bf16.msrb.mxu0 %v5115_v15 }
 0x36f   : > { %v2550_v30 = vmul.f32 %v2548_v33, %v2546_v1 }
 0x371   : > { %v2552_v0 = vmul.f32 %v2550_v30, %v2527_v23  ;;  %v2554_v7 = vperm.slane %v2550_v30, 0  ;;  %v5083_v23 = vld [vmem:[#allocation11 + $0x10] sm:$0xff]  ;;  %3285 = vmatpush.bf16.msrb.mxu0 %v5114_v16  ;;  %v5113_v30 = vld [vmem:[#allocation11 + $0x100] sm:$0xff] }
 0x372   : > { %3607 = vmatpush.bf16.msrb.mxu1 %v5083_v23 }
 0x373   : > { %v2553_v11 = vsub.f32 %v2551_v4, %v2552_v0  ;;  %v2555_v51 = vmul.f32 %v2554_v7, %v6663_v44  ;;  %v2556_v25 = vmul.f32 %v2554_v7, %v6657_v8  ;;  %v2557_v19 = vmul.f32 %v2554_v7, %v6665_v57  ;;  %v5123_v44 = vld [vmem:[#allocation11 + $0x150] sm:$0xff] }
 0x374   : > { %v2558_v24 = vmul.f32 %v2554_v7, %v6672_v52  ;;  %v2559_v9 = vmul.f32 %v2554_v7, %v6680_v58  ;;  %v2560_v46 = vmul.f32 %v2554_v7, %v6689_v14  ;;  %v2561_v40 = vmul.f32 %v2554_v7, %v6693_v36  ;;  %v5082_v36 = vld [vmem:[#allocation11 + $0x8] sm:$0xff]  ;;  %3318 = vmatpush.bf16.msrb.mxu2 %v5123_v44 }
 0x375   : > { %v2565_v53 = vperm.slane %v2553_v11, 0  ;;  %v2562_v57 = vmul.f32 %v2554_v7, %v6699_v50  ;;  %v2563_v52 = vmul.f32 %v2554_v7, %v6704_v21  ;;  %v5122_v50 = vld [vmem:[#allocation11 + $0x148] sm:$0xff]  ;;  %v2564_v21 = vmul.f32 %v2554_v7, %v6712_v28  ;;  %3286 = vmatpush.bf16.msrb.mxu0 %v5113_v30 }
 0x376   : > { %3608 = vmatpush.bf16.msrb.mxu1 %v5082_v36 }
 0x377   : > { %v2566_v18 = vadd.f32 %v2565_v53, %v2555_v51  ;;  %v2567_v61 = vadd.f32 %v2565_v53, %v2556_v25  ;;  %v2568_v8 = vadd.f32 %v2565_v53, %v2557_v19  ;;  %v2569_v45 = vadd.f32 %v2565_v53, %v2558_v24 }
 0x378   : > { %v2570_v60 = vadd.f32 %v2565_v53, %v2559_v9  ;;  %v2571_v35 = vadd.f32 %v2565_v53, %v2560_v46  ;;  %v6732_v58 = vadd.f32 %v2565_v53, %v2561_v40  ;;  %v6734_v32 = vadd.f32 %v2565_v53, %v2562_v57  ;;  %3319 = vmatpush.bf16.msrb.mxu2 %v5122_v50  ;;  %v5095_v9 = vld [vmem:[#allocation11 + $0x70] sm:$0xff] }
 0x379   : > { %v2576_v14 = vmax.f32 %v2566_v18, 0.0  ;;  %v2577_v34 = vmax.f32 %v2567_v61, 0.0  ;;  %v6736_v3 = vadd.f32 %v2565_v53, %v2563_v52  ;;  %v2578_v20 = vmax.f32 %v2568_v8, 0.0  ;;  %v2716_v18 = vld [vmem:[#allocation2 + $0xc] sm:$0xe]  ;;  %3637 = vmatpush.bf16.msrb.mxu3 %v5095_v9 }
 0x37a   : > { %v2579_v27 = vmax.f32 %v2569_v45, 0.0  ;;  %v2580_v29 = vmax.f32 %v2570_v60, 0.0  ;;  %v2581_v63 = vmax.f32 %v2571_v35, 0.0  ;;  %v6743_v12 = vadd.f32 %v2565_v53, %v2564_v21  ;;  %3609 = vmatpush.bf16.msrb.mxu1 %v5081_v41  ;;  %v2842_v52 = vld [vmem:[#allocation2 + $0x14] sm:$0xf] }
 0x37b   : > { %v2586_v2 = vmul.f32 %v5911_v43, %v2576_v14  ;;  %v2587_v55 = vmul.f32 %v5997_v38, %v2577_v34  ;;  %v2588_v17 = vmul.f32 %v6000_v10, %v2578_v20  ;;  %v2582_v1 = vmax.f32 %v6732_v58, 0.0  ;;  %v5121_v43 = vld [vmem:[#allocation11 + $0x140] sm:$0xff] }
 0x37c   : > { %v2589_v59 = vmul.f32 %v7468_v31, %v2579_v27  ;;  %v2583_v33 = vmax.f32 %v6734_v32, 0.0  ;;  %v2584_v28 = vmax.f32 %v6736_v3, 0.0  ;;  %v6753_v38 = vmul.f32 %v7469_v6, %v2580_v29  ;;  %3320 = vmatpush.bf16.msrb.mxu2 %v5121_v43 }
 0x37d   : > { %v6748_v22 = vpack.c.bf16 %v2586_v2, %v2586_v2  ;;  %v6750_v48 = vpack.c.bf16 %v2587_v55, %v2587_v55  ;;  %v6756_v10 = vmul.f32 %v7472_v5, %v2581_v63  ;;  %v6758_v31 = vpack.c.bf16 %v2588_v17, %v2588_v17 }
 0x37e   : > { %v6760_v26 = vpack.c.bf16 %v2589_v59, %v2589_v59  ;;  %v5103_v59 = vld [vmem:[#allocation11 + $0xb0] sm:$0xff] }
 0x37f   : > { %v2607_v4 = vshrl.u32 %v6748_v22, 16  ;;  %v2610_v49 = vshll.u32 %v6748_v22, 16  ;;  %v2616_v0 = vshrl.u32 %v6750_v48, 16  ;;  %v2619_v7 = vshll.u32 %v6750_v48, 16 }
 0x380   : > { %v2626_v6 = vshrl.u32 %v6758_v31, 16  ;;  %v2629_v5 = vshll.u32 %v6758_v31, 16  ;;  %v2636_v13 = vshrl.u32 %v6760_v26, 16  ;;  %v2639_v62 = vshll.u32 %v6760_v26, 16 }
 0x381   : > { %v2609_v11 = vrot.slane %v2607_v4, 6  ;;  %v2612_v51 = vrot.slane %v2610_v49, 7  ;;  %v2792_v42 = vrot.slane %v2607_v4, 7  ;;  %v2795_v25 = vrot.slane %v2616_v0, 7 }
 0x382   : > { %v2799_v19 = vrot.slane %v2626_v6, 7  ;;  %v6770_v24 = vrot.slane %v2636_v13, 7  ;;  %v2618_v53 = vrot.slane %v2616_v0, 6  ;;  %v2621_v23 = vrot.slane %v2619_v7, 7 }
 0x383   : > { %v2613_v46 = vor.u32 %v2612_v51, %v2609_v11  ;;  %v2793_v40 = vor.u32 %v2792_v42, %v2610_v49  ;;  %v2794_v44 = vrot.slane %v2792_v42, 4  ;;  %v2796_v15 = vor.u32 %v2795_v25, %v2619_v7 }
 0x384   : > { %v2798_v61 = vrot.slane %v2795_v25, 4  ;;  %v2800_v8 = vor.u32 %v2799_v19, %v2629_v5  ;;  %v2802_v45 = vrot.slane %v2799_v19, 4  ;;  %v2804_v57 = vor.u32 %v6770_v24, %v2639_v62 }
 0x385   : > { %v2717_v35 = vsel %vm6085_vm14, %v2613_v46, %v2716_v18  ;;  %v2797_v34 = vsel %vm6091_vm5, %v2794_v44, %v2796_v15  ;;  %v2843_v20 = vsel %vm5918_vm2, %v2793_v40, %v2842_v52  ;;  %v2614_v27 = vrot.slane %v2613_v46, 4 }
 0x386   : > { %2718 = vst [vmem:[#allocation2 + $0xc] sm:$0xe] %v2717_v35  ;;  %v2801_v50 = vsel %vm6091_vm5, %v2798_v61, %v2800_v8  ;;  %v2805_v21 = vsel %vm6091_vm5, %v2802_v45, %v2804_v57  ;;  %v2622_v29 = vor.u32 %v2621_v23, %v2618_v53  ;;  %v2628_v63 = vrot.slane %v2626_v6, 6 }
 0x387   : > { %2844 = vst [vmem:[#allocation2 + $0x14] sm:$0xf] %v2843_v20  ;;  %v2631_v16 = vrot.slane %v2629_v5, 7  ;;  %v2638_v2 = vrot.slane %v2636_v13, 6  ;;  %v2641_v55 = vrot.slane %v2639_v62, 7  ;;  %v2741_v17 = vrot.slane %v6748_v22, 7 }
 0x388   : > { %2845 = vst [vmem:[#allocation2 + $0x20] sm:$0xf] %v2797_v34  ;;  %v2623_v41 = vsel %vm6108_vm8, %v2614_v27, %v2622_v29  ;;  %v2624_v43 = vrot.slane %v2622_v29, 4  ;;  %v2743_v30 = vrot.slane %v6750_v48, 7  ;;  %v2746_v4 = vrot.slane %v6758_v31, 7  ;;  %v5094_v29 = vld [vmem:[#allocation11 + $0x68] sm:$0xff] }
 0x389   : > { %v2585_v49 = vmax.f32 %v6743_v12, 0.0  ;;  %2846 = vst [vmem:[#allocation2 + $0x2c] sm:$0xf] %v2801_v50  ;;  %v2632_v0 = vor.u32 %v2631_v16, %v2628_v63  ;;  %v6789_v7 = vor.u32 %v2641_v55, %v2638_v2  ;;  %v2742_v6 = vrot.slane %v2741_v17, 4  ;;  %v4723_v31 = vld [vmem:[#allocation2] sm:$0xf]  ;;  %3638 = vmatpush.bf16.msrb.mxu3 %v5094_v29 }
 0x38a   : > { %2847 = vst [vmem:[#allocation2 + $0x38] sm:$0xf] %v2805_v21  ;;  %v2745_v5 = vrot.slane %v2743_v30, 4  ;;  %v2748_v13 = vrot.slane %v2746_v4, 4  ;;  %v6793_v22 = vpack.c.bf16 %v6753_v38, %v6753_v38  ;;  %v6797_v62 = vpack.c.bf16 %v6756_v10, %v6756_v10  ;;  %v7046_v38 = vld [vmem:[#allocation11 + $0x1e0] sm:$0xff] }
 0x38b   : > { %v6802_v48 = vmul.f32 %v7473_v47, %v2582_v1  ;;  %v2633_v56 = vsel %vm6108_vm8, %v2624_v43, %v2632_v0  ;;  %v2634_v11 = vrot.slane %v2632_v0, 4  ;;  %2719 = vst [vmem:[#allocation2 + $0x18] sm:$0xf] %v2623_v41  ;;  %v2749_v51 = vrot.slane %v6760_v26, 7 }
 0x38c   : > { %2720 = vst [vmem:[#allocation2 + $0x24] sm:$0xf] %v2633_v56  ;;  %v2744_v42 = vsel %vm6118_vm11, %v2742_v6, %v2743_v30  ;;  %v2646_v10 = vshrl.u32 %v6793_v22, 16  ;;  %v2649_v25 = vshll.u32 %v6793_v22, 16  ;;  %v2806_v58 = vrot.slane %v6770_v24, 4 }
 0x38d   : > { %v5079_v47 = vld [vmem:[#allocation2 + $0x8] sm:$0xf0]  ;;  %v2643_v1 = vsel %vm6108_vm8, %v2634_v11, %v6789_v7  ;;  %v2747_v19 = vsel %vm6118_vm11, %v2745_v5, %v2746_v4  ;;  %2781 = vst [vmem:[#allocation2 + $0x10] sm:$0xe] %v2741_v17  ;;  %v2656_v26 = vshrl.u32 %v6797_v62, 16  ;;  %v2659_v53 = vshll.u32 %v6797_v62, 16 }
 0x38e   : > { %v4724_v23 = vor.u32 %v5079_v47, %v4723_v31  ;;  %v2926_v9 = vld [vmem:[#allocation2 + $0x14] sm:$0xe]  ;;  %2721 = vst [vmem:[#allocation2 + $0x30] sm:$0xf] %v2643_v1  ;;  %v2750_v46 = vsel %vm6118_vm11, %v2748_v13, %v2749_v51  ;;  %v2807_v24 = vrot.slane %v2646_v10, 7  ;;  %v2644_v40 = vrot.slane %v6789_v7, 4 }
 0x38f   : > { %v2593_v44 = vmul.f32 %v7475_v37, %v2583_v33  ;;  %v6825_v15 = vld [vmem:[#allocation2 + $0x20] sm:$0xf]  ;;  %v3004_v18 = vunpack.c.l.b16 %v2926_v9  ;;  %2782 = vst [vmem:[#allocation2 + $0x1c] sm:$0xf] %v2744_v42  ;;  %v6827_v61 = vrot.slane %v2656_v26, 7  ;;  %v2648_v8 = vrot.slane %v2646_v10, 6 }
 0x390   : > { %3610 = vmatmul.bf16.vlgmr.msrb.gmra.mxu1 %v4724_v23  ;;  %v6829_v45 = vld [vmem:[#allocation2 + $0x2c] sm:$0xf]  ;;  %v3007_v57 = vunpack.c.l.b16 %v6825_v15  ;;  %2783 = vst [vmem:[#allocation2 + $0x28] sm:$0xf] %v2747_v19  ;;  %v2808_v52 = vor.u32 %v2807_v24, %v2649_v25  ;;  %v2810_v60 = vrot.slane %v2807_v24, 4  ;;  %v2651_v35 = vrot.slane %v2649_v25, 7 }
 0x391   : > { %v6832_v34 = vld [vmem:[#allocation2 + $0x38] sm:$0xf]  ;;  %v3010_v37 = vunpack.c.l.b16 %v6829_v45  ;;  %2784 = vst [vmem:[#allocation2 + $0x34] sm:$0xf] %v2750_v46  ;;  %v2812_v32 = vor.u32 %v6827_v61, %v2659_v53  ;;  %v2658_v33 = vrot.slane %v2656_v26, 6  ;;  %v2661_v36 = vrot.slane %v2659_v53, 7 }
 0x392   : > { %v3013_v20 = vunpack.c.l.b16 %v6832_v34  ;;  %v3037_v27 = vpack.c.b16 %v3007_v57, %v3004_v18  ;;  %v2809_v50 = vsel %vm6091_vm5, %v2806_v58, %v2808_v52  ;;  %v2652_v21 = vor.u32 %v2651_v35, %v2648_v8  ;;  %v5093_v23 = vld [vmem:[#allocation11 + $0x60] sm:$0xff] }
 0x393   : > { %v2813_v63 = vsel %vm6091_vm5, %v2810_v60, %v2812_v32  ;;  %2848 = vst [vmem:[#allocation2 + $0x44] sm:$0xf] %v2809_v50  ;;  %v6843_v16 = vor.u32 %v2661_v36, %v2658_v33  ;;  %v2751_v2 = vrot.slane %v2749_v51, 4  ;;  %v2752_v55 = vrot.slane %v6793_v22, 7  ;;  %3639 = vmatpush.bf16.msrb.mxu3 %v5093_v23  ;;  %v5101_v15 = vld [vmem:[#allocation11 + $0xa0] sm:$0xff] }
 0x394   : > { %v6850_v17 = vpack.c.b16 %v3013_v20, %v3010_v37  ;;  %v3059_v41 = vrot.slane %v3037_v27, 1  ;;  %v2925_v43 = vld [vmem:[#allocation2 + $0xc] sm:$0xee]  ;;  %2849 = vst [vmem:[#allocation2 + $0x50] sm:$0xf] %v2813_v63  ;;  %v2653_v30 = vsel %vm6108_vm8, %v2644_v40, %v2652_v21  ;;  %v2654_v4 = vrot.slane %v2652_v21, 4 }
 0x395   : > { %v6857_v0 = vmul.f32 %v7477_v39, %v2584_v28  ;;  %v3002_v7 = vunpack.c.l.b16 %v2925_v43  ;;  %2722 = vst [vmem:[#allocation2 + $0x3c] sm:$0xf] %v2653_v30  ;;  %v2753_v6 = vsel %vm6118_vm11, %v2751_v2, %v2752_v55  ;;  %v2754_v5 = vrot.slane %v2752_v55, 4 }
 0x396   : > { %v3060_v13 = vrot.slane %v6850_v17, 1  ;;  %v6862_v22 = vld [vmem:[#allocation2 + $0x18] sm:$0xff]  ;;  %v2663_v31 = vsel %vm6108_vm8, %v2654_v4, %v6843_v16  ;;  %v2755_v56 = vrot.slane %v6797_v62, 7  ;;  %2785 = vst [vmem:[#allocation2 + $0x40] sm:$0xf] %v2753_v6  ;;  %v6870_v39 = vpack.c.bf16 %v6802_v48, %v6802_v48 }
 0x397   : > { %v6872_v3 = vld [vmem:[#allocation2 + $0x24] sm:$0xff]  ;;  %v3005_v28 = vunpack.c.l.b16 %v6862_v22  ;;  %v3003_v11 = vunpack.c.h.b16 %v2925_v43  ;;  %v3006_v51 = vunpack.c.h.b16 %v6862_v22  ;;  %2723 = vst [vmem:[#allocation2 + $0x48] sm:$0xf] %v2663_v31  ;;  %v6876_v42 = vpack.c.bf16 %v2593_v44, %v2593_v44 }
 0x398   : > { %v3061_v10 = vsel %vm1425_vm4, %v3059_v41, %v3060_v13  ;;  %v6881_v25 = vld [vmem:[#allocation2 + $0x30] sm:$0xff]  ;;  %v3008_v58 = vunpack.c.l.b16 %v6872_v3  ;;  %v3009_v48 = vunpack.c.h.b16 %v6872_v3  ;;  %v2756_v47 = vsel %vm6118_vm11, %v2754_v5, %v2755_v56  ;;  %v5148_v3 = vld [vmem:[#allocation11 + $0x1a0] sm:$0xff] }
 0x399   : > { %3321 = vmatmul.bf16.vlgmr.msrb.gmra.mxu2 %v3061_v10  ;;  %v3011_v1 = vunpack.c.l.b16 %v6881_v25  ;;  %v3035_v19 = vpack.c.b16 %v3005_v28, %v3002_v7  ;;  %v3012_v26 = vunpack.c.h.b16 %v6881_v25  ;;  %v3036_v53 = vpack.c.b16 %v3006_v51, %v3003_v11  ;;  %2786 = vst [vmem:[#allocation2 + $0x4c] sm:$0xf] %v2756_v47  ;;  %v7102_v25 = vld [vmem:[#allocation11 + $0x1d0] sm:$0xff] }
 0x39a   : > { %v2595_v9 = vmul.f32 %v7478_v54, %v2585_v49  ;;  %v6896_v46 = vld [vmem:[#allocation2 + $0x44] sm:$0xf]  ;;  %v2666_v24 = vshrl.u32 %v6870_v39, 16  ;;  %v2676_v40 = vshrl.u32 %v6876_v42, 16  ;;  %v2814_v44 = vrot.slane %v6827_v61, 4 }
 0x39b   : > { %v6903_v18 = vpack.c.b16 %v3011_v1, %v3008_v58  ;;  %v3053_v8 = vrot.slane %v3035_v19, 1  ;;  %v6909_v12 = vpack.c.b16 %v3012_v26, %v3009_v48  ;;  %v3056_v54 = vrot.slane %v3036_v53, 1  ;;  %v6911_v49 = vld [vmem:[#allocation2 + $0x50] sm:$0xf]  ;;  %v6947_v19 = vld [vmem:[#allocation11 + $0x1f8] sm:$0xff] }
 0x39c   : > { %v3016_v52 = vunpack.c.l.b16 %v6896_v46  ;;  %v7381_v60 = vunpack.c.l.b16 %v6911_v49  ;;  %v2669_v61 = vshll.u32 %v6870_v39, 16  ;;  %v2815_v35 = vrot.slane %v2666_v24, 7  ;;  %5168 = vmatpush.bf16.msra.mxu1 %v6947_v19 }
 0x39d   : > { %v3054_v32 = vrot.slane %v6903_v18, 1  ;;  %v3057_v33 = vrot.slane %v6909_v12, 1  ;;  %v6918_v36 = vld [vmem:[#allocation2 + $0x3c] sm:$0xff]  ;;  %v2679_v27 = vshll.u32 %v6876_v42, 16  ;;  %v6921_v50 = vrot.slane %v2676_v40, 7 }
 0x39e   : > { %v3431_v21 = vpack.c.b16 %v3008_v58, %v3005_v28  ;;  %v3014_v29 = vunpack.c.l.b16 %v6918_v36  ;;  %v3015_v63 = vunpack.c.h.b16 %v6918_v36  ;;  %v2816_v2 = vor.u32 %v2815_v35, %v2669_v61  ;;  %v5092_v28 = vld [vmem:[#allocation11 + $0x58] sm:$0xff] }
 0x39f   : > { %v3055_v55 = vsel %vm1425_vm4, %v3053_v8, %v3054_v32  ;;  %v3058_v41 = vsel %vm1425_vm4, %v3056_v54, %v3057_v33  ;;  %v2818_v43 = vrot.slane %v2815_v35, 4  ;;  %v2820_v30 = vor.u32 %v6921_v50, %v2679_v27  ;;  %3640 = vmatpush.bf16.msrb.mxu3 %v5092_v28  ;;  %v5147_v36 = vld [vmem:[#allocation11 + $0x198] sm:$0xff] }
 0x3a0   : > { %3253 = vmatmul.bf16.vlgmr.msra.gmra.mxu3 %v3055_v55  ;;  %3287 = vmatmul.bf16.vlgmr.msrb.gmra.mxu0 %v3058_v41  ;;  %v6936_v4 = vpack.c.b16 %v7381_v60, %v3016_v52  ;;  %v6938_v7 = vld [vmem:[#allocation2 + $0x48] sm:$0xff]  ;;  %v2817_v6 = vsel %vm6091_vm5, %v2814_v44, %v2816_v2  ;;  %v2664_v5 = vrot.slane %v6843_v16, 4  ;;  %v2668_v31 = vrot.slane %v2666_v24, 6 }
 0x3a1   : > { %3615 = vmatmul.bf16.gmra.mxu1 %v3431_v21  ;;  %v7380_v11 = vunpack.c.l.b16 %v6938_v7  ;;  %v3018_v10 = vunpack.c.h.b16 %v6938_v7  ;;  %v2821_v58 = vsel %vm6091_vm5, %v2818_v43, %v2820_v30  ;;  %2850 = vst [vmem:[#allocation2 + $0x5c] sm:$0xf] %v2817_v6  ;;  %v2671_v47 = vrot.slane %v2669_v61, 7 }
 0x3a2   : > { %2851 = vst [vmem:[#allocation2 + $0x68] sm:$0xf] %v2821_v58  ;;  %v2678_v53 = vrot.slane %v2676_v40, 6  ;;  %v2681_v23 = vrot.slane %v2679_v27, 7  ;;  %v2757_v16 = vrot.slane %v2755_v56, 4  ;;  %v2758_v40 = vrot.slane %v6870_v39, 7 }
 0x3a3   : > { %v6955_v24 = vpack.c.b16 %v7380_v11, %v3014_v29  ;;  %v6961_v44 = vpack.c.b16 %v3018_v10, %v3015_v63  ;;  %v2672_v8 = vor.u32 %v2671_v47, %v2668_v31  ;;  %v3066_v62 = vrot.slane %v6936_v4, 1 }
 0x3a4   : > { %v2604_v56 = vpack.c.bf16 %v6857_v0, %v6857_v0  ;;  %v6968_v54 = vpack.c.bf16 %v2595_v9, %v2595_v9  ;;  %v2682_v27 = vor.u32 %v2681_v23, %v2678_v53  ;;  %v2761_v21 = vrot.slane %v6876_v42, 7  ;;  %v6994_v23 = vld [vmem:[#allocation11 + $0x1f0] sm:$0xff] }
 0x3a5   : > { %v2673_v61 = vsel %vm6108_vm8, %v2664_v5, %v2672_v8  ;;  %v2674_v35 = vrot.slane %v2672_v8, 4  ;;  %v2759_v39 = vsel %vm6118_vm11, %v2757_v16, %v2758_v40  ;;  %v2760_v2 = vrot.slane %v2758_v40, 4  ;;  %5169 = vmatpush.bf16.msra.mxu1 %v6994_v23 }
 0x3a6   : > { %2724 = vst [vmem:[#allocation2 + $0x54] sm:$0xf] %v2673_v61  ;;  %v2686_v55 = vshrl.u32 %v2604_v56, 16  ;;  %v2689_v41 = vshll.u32 %v2604_v56, 16  ;;  %v3062_v43 = vrot.slane %v6955_v24, 1  ;;  %v3064_v0 = vrot.slane %v6961_v44, 1 }
 0x3a7   : > { %v2683_v9 = vsel %vm6108_vm8, %v2674_v35, %v2682_v27  ;;  %2787 = vst [vmem:[#allocation2 + $0x58] sm:$0xf] %v2759_v39  ;;  %v2696_v30 = vshrl.u32 %v6968_v54, 16  ;;  %v3067_v42 = vsel %vm1425_vm4, %v3060_v13, %v3066_v62  ;;  %v2762_v5 = vsel %vm6118_vm11, %v2760_v2, %v2761_v21  ;;  %v5151_v13 = vld [vmem:[#allocation11 + $0x1b8] sm:$0xff]  ;;  %v5146_v24 = vld [vmem:[#allocation11 + $0x190] sm:$0xff]  ;;  %v5089_v44 = vld [vmem:[#allocation11 + $0x40] sm:$0xff] }
 0x3a8   : > { %v6985_v6 = vld [vmem:[#allocation2 + $0x5c] sm:$0xf]  ;;  %2725 = vst [vmem:[#allocation2 + $0x60] sm:$0xf] %v2683_v9  ;;  %v2699_v31 = vshll.u32 %v6968_v54, 16  ;;  %v2822_v28 = vrot.slane %v6921_v50, 4  ;;  %3973 = vmatpush.bf16.msra.mxu2 %v5151_v13  ;;  %v3063_v14 = vsel %vm1425_vm4, %v3054_v32, %v3062_v43  ;;  %v7087_v4 = vpack.c.b16 %v3016_v52, %v3013_v20 }
 0x3a9   : > { %3326 = vmatmul.bf16.gmra.mxu2 %v3067_v42  ;;  %v6991_v58 = vld [vmem:[#allocation2 + $0x68] sm:$0xf]  ;;  %2788 = vst [vmem:[#allocation2 + $0x64] sm:$0xf] %v2762_v5  ;;  %v2823_v47 = vrot.slane %v2686_v55, 7  ;;  %v2827_v53 = vrot.slane %v2696_v30, 7  ;;  %v3022_v17 = vunpack.c.l.b16 %v6985_v6 }
 0x3aa   : > { %v2684_v16 = vrot.slane %v2682_v27, 4  ;;  %v2688_v8 = vrot.slane %v2686_v55, 6  ;;  %v2691_v40 = vrot.slane %v2689_v41, 7  ;;  %v3025_v61 = vunpack.c.l.b16 %v6991_v58  ;;  %v5104_v13 = vld [vmem:[#allocation11 + $0xb8] sm:$0xff]  ;;  %v5097_v58 = vld [vmem:[#allocation11 + $0x80] sm:$0xff] }
 0x3ab   : > { %v2824_v35 = vor.u32 %v2823_v47, %v2689_v41  ;;  %v2826_v39 = vrot.slane %v2823_v47, 4  ;;  %v2828_v2 = vor.u32 %v2827_v53, %v2699_v31  ;;  %v2830_v50 = vrot.slane %v2827_v53, 4  ;;  %3670 = vmatpush.bf16.msra.mxu0 %v5104_v13 }
 0x3ac   : > { %v2692_v9 = vor.u32 %v2691_v40, %v2688_v8  ;;  %v2698_v42 = vrot.slane %v2696_v30, 6  ;;  %v2701_v5 = vrot.slane %v2699_v31, 7  ;;  %v2763_v55 = vrot.slane %v2761_v21, 4  ;;  %v2854_v31 = vld [vmem:[#allocation2 + $0x8c] sm:$0x1]  ;;  %v5150_v8 = vld [vmem:[#allocation11 + $0x1b0] sm:$0xff] }
 0x3ad   : > { %v2825_v11 = vsel %vm6091_vm5, %v2822_v28, %v2824_v35  ;;  %v2829_v27 = vsel %vm6091_vm5, %v2826_v39, %v2828_v2  ;;  %v2764_v60 = vrot.slane %v2604_v56, 7  ;;  %v3434_v41 = vpack.c.b16 %v3014_v29, %v3011_v1  ;;  %v2728_v21 = vld [vmem:[#allocation2 + $0x84] sm:$0x3]  ;;  %3974 = vmatpush.bf16.msra.mxu2 %v5150_v8  ;;  %v5145_v40 = vld [vmem:[#allocation11 + $0x188] sm:$0xff] }
 0x3ae   : > { %2852 = vst [vmem:[#allocation2 + $0x74] sm:$0xf] %v2825_v11  ;;  %v2693_v47 = vsel %vm6108_vm8, %v2684_v16, %v2692_v9  ;;  %v2694_v53 = vrot.slane %v2692_v9, 4  ;;  %v2702_v30 = vor.u32 %v2701_v5, %v2698_v42  ;;  %v3065_v56 = vsel %vm1425_vm4, %v3057_v33, %v3064_v0  ;;  %v7018_v1 = vld [vmem:[#allocation2 + $0x54] sm:$0xff]  ;;  %v7033_v16 = vld [vmem:[#allocation11 + $0x1e8] sm:$0xff] }
 0x3af   : > { %2853 = vst [vmem:[#allocation2 + $0x80] sm:$0xf] %v2829_v27  ;;  %v2765_v29 = vsel %vm6118_vm11, %v2763_v55, %v2764_v60  ;;  %v2766_v11 = vrot.slane %v2764_v60, 4  ;;  %v7026_v18 = vpack.c.b16 %v3025_v61, %v3022_v17  ;;  %v2767_v28 = vrot.slane %v6968_v54, 7  ;;  %v5091_v60 = vld [vmem:[#allocation11 + $0x50] sm:$0xff]  ;;  %5170 = vmatpush.bf16.msra.mxu1 %v7033_v16  ;;  %3671 = vmatpush.bf16.msra.mxu0 %v5103_v59 }
 0x3b0   : > { %3258 = vmatmul.bf16.gmra.mxu3 %v3063_v14  ;;  %3292 = vmatmul.bf16.gmra.mxu0 %v3065_v56  ;;  %v7028_v32 = vld [vmem:[#allocation2 + $0x60] sm:$0xff]  ;;  %v2703_v12 = vsel %vm6108_vm8, %v2694_v53, %v2702_v30  ;;  %v2704_v33 = vrot.slane %v2702_v30, 4  ;;  %2726 = vst [vmem:[#allocation2 + $0x6c] sm:$0xf] %v2693_v47  ;;  %v2855_v35 = vsel %vm6508_vm9, %v2830_v50, %v2854_v31  ;;  %v3020_v42 = vunpack.c.l.b16 %v7018_v1  ;;  %v7064_v56 = vld [vmem:[#allocation11 + $0x1d8] sm:$0xff] }
 0x3b1   : > { %3620 = vmatmul.bf16.gmra.mxu1 %v3434_v41  ;;  %2727 = vst [vmem:[#allocation2 + $0x78] sm:$0xf] %v2703_v12  ;;  %v2768_v39 = vsel %vm6118_vm11, %v2766_v11, %v2767_v28  ;;  %v2769_v54 = vrot.slane %v2767_v28, 4  ;;  %v3023_v5 = vunpack.c.l.b16 %v7028_v32  ;;  %v3021_v27 = vunpack.c.h.b16 %v7018_v1  ;;  %3641 = vmatpush.bf16.msrb.mxu3 %v5091_v60  ;;  %v5149_v41 = vld [vmem:[#allocation11 + $0x1a8] sm:$0xff]  ;;  %v7118_v28 = vld [vmem:[#allocation11 + $0x1c0] sm:$0xff] }
 0x3b2   : > { %2789 = vst [vmem:[#allocation2 + $0x70] sm:$0xf] %v2765_v29  ;;  %v2729_v9 = vsel %vm5857_vm3, %v2704_v33, %v2728_v21  ;;  %v3024_v55 = vunpack.c.h.b16 %v7028_v32  ;;  %v3072_v50 = vrot.slane %v7026_v18, 1  ;;  %v5090_v47 = vld [vmem:[#allocation11 + $0x48] sm:$0xff]  ;;  %v7053_v30 = vpack.c.b16 %v3009_v48, %v3006_v51  ;;  %3975 = vmatpush.bf16.msra.mxu2 %v5149_v41  ;;  %v5100_v21 = vld [vmem:[#allocation11 + $0x98] sm:$0xff] }
 0x3b3   : > { %2790 = vst [vmem:[#allocation2 + $0x7c] sm:$0xf] %v2768_v39  ;;  %v5102_v53 = vld [vmem:[#allocation11 + $0xa8] sm:$0xff]  ;;  %v7057_v31 = vpack.c.b16 %v3023_v5, %v3020_v42  ;;  %5171 = vmatpush.bf16.msra.mxu1 %v7046_v38  ;;  %v7075_v51 = vpack.c.b16 %v3010_v37, %v3007_v57  ;;  %v7081_v48 = vpack.c.b16 %v3015_v63, %v3012_v26  ;;  %v7487_v57 = vunpack.c.l.b16 %v6911_v49 }
 0x3b4   : > { %2856 = vst [vmem:[#allocation2 + $0x8c] sm:$0x1] %v2855_v35  ;;  %v7061_v14 = vpack.c.b16 %v3024_v55, %v3021_v27  ;;  %v3073_v22 = vsel %vm1425_vm4, %v3066_v62, %v3072_v50  ;;  %3672 = vmatpush.bf16.msra.mxu0 %v5102_v53  ;;  %v7091_v45 = vpack.c.b16 %v3021_v27, %v3018_v10  ;;  %v7488_v10 = vunpack.c.l.b16 %v6938_v7  ;;  %v7115_v12 = vld [vmem:[#allocation11 + $0x1c8] sm:$0xff]  ;;  %v5167_v53 = vld [vmem:[#allocation11 + $0x238] sm:$0xff] }
 0x3b5   : > { %2730 = vst [vmem:[#allocation2 + $0x84] sm:$0x3] %v2729_v9  ;;  %3642 = vmatpush.bf16.msrb.mxu3 %v5090_v47  ;;  %v2876_v62 = vld [vmem:[#allocation2 + $0x74] sm:$0xf]  ;;  %v7097_v37 = vpack.c.b16 %v3022_v17, %v7487_v57  ;;  %v3068_v34 = vrot.slane %v7057_v31, 1  ;;  %v5098_v35 = vld [vmem:[#allocation11 + $0x88] sm:$0xff] }
 0x3b6   : > { %2791 = vst [vmem:[#allocation2 + $0x88] sm:$0x1] %v2769_v54  ;;  %v2928_v1 = vld [vmem:[#allocation2 + $0x80] sm:$0xf]  ;;  %v3070_v20 = vrot.slane %v7061_v14, 1  ;;  %v3028_v26 = vunpack.c.l.b16 %v2876_v62  ;;  %3976 = vmatpush.bf16.msra.mxu2 %v5148_v3  ;;  %v3437_v6 = vpack.c.b16 %v3020_v42, %v7488_v10  ;;  %v5166_v31 = vld [vmem:[#allocation11 + $0x230] sm:$0xff] }
 0x3b7   : > { %5172 = vmatpush.bf16.msra.mxu1 %v7064_v56  ;;  %v3031_v46 = vunpack.c.l.b16 %v2928_v1  ;;  %v3069_v49 = vsel %vm1425_vm4, %v3062_v43, %v3068_v34  ;;  %v5099_v43 = vld [vmem:[#allocation11 + $0x90] sm:$0xff]  ;;  %v5144_v54 = vld [vmem:[#allocation11 + $0x180] sm:$0xff] }
 0x3b8   : > { %3673 = vmatpush.bf16.msra.mxu0 %v5101_v15  ;;  %v3071_v63 = vsel %vm1425_vm4, %v3064_v0, %v3070_v20  ;;  %v7127_v8 = vpack.c.b16 %v3028_v26, %v3025_v61  ;;  %v5132_v62 = vld [vmem:[#allocation2 + $0x34] sm:$0xf]  ;;  %v4845_v1 = vld [vmem:[#allocation2 + $0x3c] sm:$0xf0]  ;;  %v5135_v32 = vld [vmem:[#allocation2 + $0x4c] sm:$0xf] }
 0x3b9   : > { %3331 = vmatmul.bf16.gmra.mxu2 %v3073_v22  ;;  %v2875_v52 = vld [vmem:[#allocation2 + $0x6c] sm:$0xff]  ;;  %v7113_v29 = vpack.c.b16 %v3031_v46, %v3028_v26  ;;  %3643 = vmatpush.bf16.msrb.mxu3 %v5089_v44  ;;  %v5133_v10 = vld [vmem:[#allocation2 + $0x38] sm:$0xf0]  ;;  %v5138_v44 = vld [vmem:[#allocation2 + $0x64] sm:$0xf] }
 0x3ba   : > { %v3027_v17 = vunpack.c.h.b16 %v2875_v52  ;;  %v2927_v11 = vld [vmem:[#allocation2 + $0x78] sm:$0xff]  ;;  %3977 = vmatpush.bf16.msra.mxu2 %v5147_v36  ;;  %v3026_v0 = vunpack.c.l.b16 %v2875_v52 }
 0x3bb   : > { %5173 = vmatpush.bf16.msra.mxu1 %v7102_v25  ;;  %v3029_v7 = vunpack.c.l.b16 %v2927_v11  ;;  %v3030_v33 = vunpack.c.h.b16 %v2927_v11  ;;  %v3078_v60 = vrot.slane %v7113_v29, 1  ;;  %v2930_v9 = vld [vmem:[#allocation2 + $0x8c] sm:$0x1]  ;;  %v4831_v36 = vld [vmem:[#allocation2 + $0x18] sm:$0xc] }
 0x3bc   : > { %3674 = vmatpush.bf16.msra.mxu0 %v5100_v21  ;;  %v7122_v13 = vpack.c.b16 %v3027_v17, %v3024_v55  ;;  %v3034_v27 = vunpack.c.l.b16 %v2930_v9  ;;  %v3440_v18 = vpack.c.b16 %v3026_v0, %v3023_v5  ;;  %v4857_v5 = vld [vmem:[#allocation2 + $0x54] sm:$0xf0]  ;;  %v5165_v11 = vld [vmem:[#allocation11 + $0x228] sm:$0xff] }
 0x3bd   : > { %v3047_v39 = vpack.c.b16 %v3029_v7, %v3026_v0  ;;  %v3048_v59 = vpack.c.b16 %v3030_v33, %v3027_v17  ;;  %v3079_v2 = vsel %vm1425_vm4, %v3072_v50, %v3078_v60  ;;  %v2929_v47 = vld [vmem:[#allocation2 + $0x84] sm:$0x11]  ;;  %5176 = vmatpush.bf16.msra.mxu3 %v5167_v53 }
 0x3be   : > { %3978 = vmatpush.bf16.msra.mxu2 %v5146_v24  ;;  %v3052_v50 = vpack.c.b16 %v3034_v27, %v3034_v27  ;;  %v3032_v14 = vunpack.c.l.b16 %v2929_v47  ;;  %v3033_v22 = vunpack.c.h.b16 %v2929_v47  ;;  %v5164_v7 = vld [vmem:[#allocation11 + $0x220] sm:$0xff]  ;;  %v4881_v27 = vld [vmem:[#allocation2 + $0x84] sm:$0xf0] }
 0x3bf   : > { %5174 = vmatpush.bf16.msra.mxu1 %v7115_v12  ;;  %v3074_v61 = vrot.slane %v3047_v39, 1  ;;  %v3076_v42 = vrot.slane %v3048_v59, 1  ;;  %v5078_v33 = vld [vmem:[#allocation2 + $0x4] sm:$0xf]  ;;  %v5136_v59 = vld [vmem:[#allocation2 + $0x50] sm:$0xf0] }
 0x3c0   : > { %3263 = vmatmul.bf16.gmra.mxu3 %v3069_v49  ;;  %3297 = vmatmul.bf16.gmra.mxu0 %v3071_v63  ;;  %v3084_v3 = vrot.slane %v3052_v50, 1  ;;  %v3051_v15 = vpack.c.b16 %v3033_v22, %v3033_v22  ;;  %v5130_v49 = vld [vmem:[#allocation2 + $0x20] sm:$0xf0]  ;;  %v4843_v63 = vld [vmem:[#allocation2 + $0x30] sm:$0xf] }
 0x3c1   : > { %3625 = vmatmul.bf16.gmra.mxu1 %v3437_v6  ;;  %3675 = vmatpush.bf16.msra.mxu0 %v5099_v43  ;;  %v3075_v55 = vsel %vm1425_vm4, %v3068_v34, %v3074_v61  ;;  %v3077_v41 = vsel %vm1425_vm4, %v3070_v20, %v3076_v42  ;;  %v4848_v34 = vor.u32 %v5132_v62, %v4845_v1  ;;  %v4869_v43 = vld [vmem:[#allocation2 + $0x6c] sm:$0xf0]  ;;  %v5139_v50 = vld [vmem:[#allocation2 + $0x68] sm:$0xf0] }
 0x3c2   : > { %3979 = vmatpush.bf16.msra.mxu2 %v5145_v40  ;;  %5177 = vmatpush.bf16.msra.mxu3 %v5166_v31  ;;  %v3085_v57 = vsel %vm1425_vm4, %v3078_v60, %v3084_v3  ;;  %v4860_v20 = vor.u32 %v5135_v32, %v4857_v5  ;;  %v3082_v46 = vrot.slane %v3051_v15, 1  ;;  %v4832_v29 = vor.u32 %v5130_v49, %v4831_v36  ;;  %v4725_v60 = vld [vmem:[#allocation2 + $0xc] sm:$0xf0]  ;;  %v4731_v40 = vld [vmem:[#allocation2 + $0x8] sm:$0xf] }
 0x3c3   : > { %5175 = vmatpush.bf16.msra.mxu1 %v7118_v28  ;;  %v4872_v0 = vor.u32 %v5138_v44, %v4869_v43  ;;  %v4879_v5 = vld [vmem:[#allocation2 + $0x78] sm:$0xf] }
 0x3c4   : > { %v3792_v52 = vrot.slane %v4860_v20, 2  ;;  %v3781_v21 = vrot.slane %v4832_v29, 2  ;;  %v4851_v44 = vld [vmem:[#allocation2 + $0x38] sm:$0xf] }
 0x3c5   : > { %3676 = vmatpush.bf16.msra.mxu0 %v5098_v35  ;;  %v5080_v35 = vld [vmem:[#allocation2 + $0x10] sm:$0xf0]  ;;  %v3798_v39 = vrot.slane %v4872_v0, 2 }
 0x3c6   : > { %3980 = vmatpush.bf16.msra.mxu2 %v5144_v54  ;;  %5178 = vmatpush.bf16.msra.mxu3 %v5165_v11  ;;  %v4732_v9 = vor.u32 %v5080_v35, %v4731_v40 }
 0x3c9   : > { %3336 = vmatmul.bf16.gmra.mxu2 %v3079_v2  ;;  %3677 = vmatpush.bf16.msra.mxu0 %v5097_v58  ;;  %v4728_v2 = vor.u32 %v5078_v33, %v4725_v60  ;;  %v5163_v58 = vld [vmem:[#allocation11 + $0x218] sm:$0xff]  ;;  %v4833_v33 = vld [vmem:[#allocation2 + $0x24] sm:$0xf0] }
 0x3ca   : > { %4041 = vmatpush.bf16.msrb.mxu2 %v5167_v53  ;;  %5179 = vmatpush.bf16.msra.mxu3 %v5164_v7 }
 0x3cd   : > { %4007 = vmatpush.bf16.msrb.mxu0 %v6947_v19  ;;  %v3050_v19 = vpack.c.b16 %v3032_v14, %v3032_v14  ;;  %v3367_v14 = vld [vmem:[#allocation2 + $0x90] sm:$0x33] }
 0x3ce   : > { %4042 = vmatpush.bf16.msrb.mxu2 %v5166_v31  ;;  %5180 = vmatpush.bf16.msra.mxu3 %v5163_v58  ;;  %v5162_v31 = vld [vmem:[#allocation11 + $0x210] sm:$0xff]  ;;  %v3761_v3 = vunpack.c.h.b16 %v3367_v14 }
 0x3cf   : > { %v3080_v26 = vrot.slane %v3050_v19, 1  ;;  %v5142_v19 = vld [vmem:[#allocation2 + $0x80] sm:$0xf0] }
 0x3d0   : > { %3268 = vmatmul.bf16.gmra.mxu3 %v3075_v55  ;;  %3302 = vmatmul.bf16.gmra.mxu0 %v3077_v41  ;;  %v3779_v1 = vpack.c.b16 %v3761_v3, %v3761_v3  ;;  %v4880_v15 = vor.u32 %v5142_v19, %v4879_v5 }
 0x3d1   : > { %3630 = vmatmul.bf16.gmra.mxu1 %v3440_v18  ;;  %4008 = vmatpush.bf16.msrb.mxu0 %v6994_v23  ;;  %v7142_v23 = vrot.slane %v4848_v34, 2  ;;  %v3081_v6 = vsel %vm1425_vm4, %v3074_v61, %v3080_v26  ;;  %v4867_v18 = vld [vmem:[#allocation2 + $0x60] sm:$0xf] }
 0x3d2   : > { %4043 = vmatpush.bf16.msrb.mxu2 %v5165_v11  ;;  %v4868_v53 = vor.u32 %v5139_v50, %v4867_v18  ;;  %5181 = vmatpush.bf16.msra.mxu3 %v5162_v31  ;;  %v3810_v32 = vrot.slane %v3779_v1, 2  ;;  %v5160_v34 = vld [vmem:[#allocation11 + $0x200] sm:$0xff]  ;;  %v5140_v1 = vld [vmem:[#allocation2 + $0x70] sm:$0xf0] }
 0x3d3   : > { %v3793_v17 = vsel %vm2154_vm13, %v7142_v23, %v3792_v52  ;;  %v4839_v11 = vld [vmem:[#allocation2 + $0x20] sm:$0xc] }
 0x3d4   : > { %v3796_v22 = vrot.slane %v4868_v53, 2 }
 0x3d5   : > { %4009 = vmatpush.bf16.msrb.mxu0 %v7033_v16  ;;  %v3083_v16 = vsel %vm1425_vm4, %v3076_v42, %v3082_v46  ;;  %v5141_v42 = vld [vmem:[#allocation2 + $0x7c] sm:$0xf]  ;;  %v3760_v46 = vunpack.c.l.b16 %v3367_v14 }
 0x3d6   : > { %4044 = vmatpush.bf16.msrb.mxu2 %v5164_v7  ;;  %v4884_v41 = vor.u32 %v5141_v42, %v4881_v27  ;;  %v5129_v7 = vld [vmem:[#allocation2 + $0x1c] sm:$0xc] }
 0x3d9   : > { %3341 = vmatmul.bf16.gmra.mxu2 %v3085_v57  ;;  %4010 = vmatpush.bf16.msrb.mxu0 %v7046_v38  ;;  %v4844_v38 = vor.u32 %v5133_v10, %v4843_v63  ;;  %v3802_v57 = vrot.slane %v4880_v15, 2 }
 0x3da   : > { %4045 = vmatpush.bf16.msrb.mxu2 %v5163_v58 }
 0x3db   : > { %v3782_v24 = vrot.slane %v4844_v38, 2  ;;  %v3803_v20 = vsel %vm2154_vm13, %v3796_v22, %v3802_v57 }
 0x3dd   : > { %4011 = vmatpush.bf16.msrb.mxu0 %v7064_v56  ;;  %v3783_v56 = vsel %vm2154_vm13, %v3781_v21, %v3782_v24 }
 0x3de   : > { %4046 = vmatpush.bf16.msrb.mxu2 %v5162_v31 }
 0x3e0   : > { %3273 = vmatmul.bf16.gmra.mxu3 %v3081_v6  ;;  %3307 = vmatmul.bf16.gmra.mxu0 %v3083_v16 }
 0x3e1   : > { %4020 = vmatmul.bf16.vlgmr.msra.gmra.mxu1 %v3793_v17  ;;  %4012 = vmatpush.bf16.msrb.mxu0 %v7102_v25  ;;  %v4855_v25 = vld [vmem:[#allocation2 + $0x48] sm:$0xf] }
 0x3e2   : > { %v4856_v54 = vor.u32 %v5136_v59, %v4855_v25  ;;  %v4863_v25 = vld [vmem:[#allocation2 + $0x50] sm:$0xf]  ;;  %v5137_v59 = vld [vmem:[#allocation2 + $0x58] sm:$0xf0] }
 0x3e3   : > { %v4864_v58 = vor.u32 %v5137_v59, %v4863_v25 }
 0x3e4   : > { %v3790_v61 = vrot.slane %v4856_v54, 2  ;;  %v4836_v54 = vor.u32 %v5129_v7, %v4833_v33 }
 0x3e5   : > { %4013 = vmatpush.bf16.msrb.mxu0 %v7115_v12  ;;  %v3799_v12 = vsel %vm2154_vm13, %v3792_v52, %v3798_v39  ;;  %v3794_v27 = vrot.slane %v4864_v58, 2 }
 0x3e6   : > { %v3791_v55 = vsel %vm2154_vm13, %v3782_v24, %v3790_v61  ;;  %v3797_v62 = vsel %vm2154_vm13, %v3790_v61, %v3796_v22  ;;  %v5131_v24 = vld [vmem:[#allocation2 + $0x28] sm:$0xf0]  ;;  %v3784_v42 = vrot.slane %v4836_v54, 2 }
 0x3e8   : > { %v3786_v50 = vsel %vm2154_vm13, %v3784_v42, %v7142_v23 }
 0x3e9   : > { %3981 = vmatmul.bf16.vlgmr.msra.gmra.mxu2 %v3783_v56  ;;  %4014 = vmatpush.bf16.msrb.mxu0 %v7118_v28  ;;  %v3804_v28 = vrot.slane %v4884_v41, 2 }
 0x3eb   : > { %v3805_v47 = vsel %vm2154_vm13, %v3798_v39, %v3804_v28 }
 0x3f0   : > { %3644 = vmatmul.bf16.vlgmr.msrb.gmra.mxu3 %v4728_v2  ;;  %3678 = vmatmul.bf16.vlgmr.msra.gmra.mxu0 %v4732_v9 }
 0x3f1   : > { %4025 = vmatmul.bf16.gmra.mxu1 %v3799_v12 }
 0x3f9   : > { %3986 = vmatmul.bf16.gmra.mxu2 %v3791_v55 }
 0x400   : > { %3649 = vmatmul.bf16.gmra.mxu3 %v7053_v30  ;;  %3683 = vmatmul.bf16.gmra.mxu0 %v7075_v51  ;;  %v5161_v30 = vld [vmem:[#allocation11 + $0x208] sm:$0xff]  ;;  %v3811_v51 = vsel %vm2154_vm13, %v3804_v28, %v3810_v32 }
 0x401   : > { %4030 = vmatmul.bf16.gmra.mxu1 %v3805_v47  ;;  %5182 = vmatpush.bf16.msra.mxu3 %v5161_v30 }
 0x402   : > { %4047 = vmatpush.bf16.msrb.mxu2 %v5161_v30 }
 0x405   : > { %5183 = vmatpush.bf16.msra.mxu3 %v5160_v34 }
 0x406   : > { %4048 = vmatpush.bf16.msrb.mxu2 %v5160_v34 }
 0x409   : > { %3991 = vmatmul.bf16.gmra.mxu2 %v3797_v62  ;;  %v4875_v62 = vld [vmem:[#allocation2 + $0x68] sm:$0xf] }
 0x40a   : > { %v4876_v19 = vor.u32 %v5140_v1, %v4875_v62 }
 0x40d   : > { %v3611_v12 = vpop.f32.mrf.mxu1 }
 0x410   : > { %3654 = vmatmul.bf16.gmra.mxu3 %v7081_v48  ;;  %3688 = vmatmul.bf16.gmra.mxu0 %v7087_v4  ;;  %v3778_v48 = vpack.c.b16 %v3760_v46, %v3760_v46 }
 0x411   : > { %4035 = vmatmul.bf16.gmra.mxu1 %v3811_v51  ;;  %v3800_v51 = vrot.slane %v4876_v19, 2 }
 0x412   : > { %v3808_v63 = vrot.slane %v3778_v48, 2  ;;  %v4887_v48 = vld [vmem:[#allocation2 + $0x80] sm:$0xf] }
 0x414   : > { %v3809_v16 = vsel %vm2154_vm13, %v3802_v57, %v3808_v63 }
 0x415   : > { %v3613_v53 = vpop.f32.mrf.mxu1 }
 0x419   : > { %3996 = vmatmul.bf16.gmra.mxu2 %v3803_v20  ;;  %v3801_v20 = vsel %vm2154_vm13, %v3794_v27, %v3800_v51 }
 0x41c   : > { %v3322_v26 = vpop.f32.mrf.mxu2 }
 0x41d   : > { %v3288_v52 = vpop.f32.mrf.mxu0 }
 0x420   : > { %3659 = vmatmul.bf16.gmra.mxu3 %v7091_v45  ;;  %3693 = vmatmul.bf16.gmra.mxu0 %v7097_v37  ;;  %v5134_v45 = vld [vmem:[#allocation2 + $0x40] sm:$0xf0]  ;;  %v4840_v37 = vor.u32 %v5131_v24, %v4839_v11  ;;  %v3616_v24 = vpop.f32.mrf.mxu1 }
 0x421   : > { %v4852_v56 = vor.u32 %v5134_v45, %v4851_v44 }
 0x422   : > { %v3787_v35 = vrot.slane %v4840_v37, 2 }
 0x423   : > { %v3254_v4 = vpop.f32.mrf.mxu3  ;;  %v3788_v39 = vrot.slane %v4852_v56, 2 }
 0x424   : > { %v3289_v36 = vadd.f32 %v3288_v52, %v3254_v4  ;;  %v3324_v49 = vpop.f32.mrf.mxu2  ;;  %v5143_v4 = vld [vmem:[#allocation2 + $0x88] sm:$0xf0] }
 0x425   : > { %v3290_v10 = vpop.f32.mrf.mxu0  ;;  %v3795_v47 = vsel %vm2154_vm13, %v3788_v39, %v3794_v27  ;;  %v4888_v63 = vor.u32 %v5143_v4, %v4887_v48 }
 0x426   : > { %v3323_v6 = vadd.f32 %v3322_v26, %v3289_v36 }
 0x429   : > { %4001 = vmatmul.bf16.gmra.mxu2 %v3809_v16 }
 0x42b   : > { %v3256_v17 = vpop.f32.mrf.mxu3 }
 0x42c   : > { %v3291_v29 = vadd.f32 %v3290_v10, %v3256_v17  ;;  %v3327_v38 = vpop.f32.mrf.mxu2 }
 0x42d   : > { %v3293_v21 = vpop.f32.mrf.mxu0 }
 0x42e   : > { %v3325_v43 = vadd.f32 %v3324_v49, %v3291_v29 }
 0x430   : > { %3664 = vmatmul.bf16.gmra.mxu3 %v7122_v13  ;;  %3698 = vmatmul.bf16.gmra.mxu0 %v7127_v8  ;;  %v3789_v13 = vsel %vm2154_vm13, %v3787_v35, %v3788_v39  ;;  %v7171_v8 = vadd.f32 %v3611_v12, %v3323_v6  ;;  %v3614_v31 = vadd.f32 %v3613_v53, %v3325_v43  ;;  %v3806_v6 = vrot.slane %v4888_v63, 2  ;;  %v3618_v39 = vpop.f32.mrf.mxu1 }
 0x432   : > { %v3807_v11 = vsel %vm2154_vm13, %v3800_v51, %v3806_v6 }
 0x433   : > { %v3259_v0 = vpop.f32.mrf.mxu3 }
 0x434   : > { %v3294_v60 = vadd.f32 %v3293_v21, %v3259_v0  ;;  %v3329_v40 = vpop.f32.mrf.mxu2  ;;  %v3368_v21 = vld [vmem:[#allocation2 + $0x98] sm:$0x3] }
 0x435   : > { %v3295_v2 = vpop.f32.mrf.mxu0  ;;  %v3762_v45 = vunpack.c.l.b16 %v3368_v21 }
 0x436   : > { %v7168_v9 = vadd.f32 %v3327_v38, %v3294_v60 }
 0x437   : > { %v3780_v7 = vpack.c.b16 %v3762_v45, %v3762_v45 }
 0x438   : > { %v3621_v42 = vpop.f32.mrf.mxu1  ;;  %v3617_v53 = vadd.f32 %v3616_v24, %v7168_v9 }
 0x439   : > { %4049 = vmatmul.bf16.vlgmr.msrb.gmra.mxu2 %v3789_v13  ;;  %v3812_v60 = vrot.slane %v3780_v7, 2 }
 0x43b   : > { %v3261_v61 = vpop.f32.mrf.mxu3 }
 0x43c   : > { %v3296_v55 = vadd.f32 %v3295_v2, %v3261_v61  ;;  %v3332_v41 = vpop.f32.mrf.mxu2  ;;  %v3813_v2 = vsel %vm2154_vm13, %v3806_v6, %v3812_v60 }
 0x43d   : > { %v3298_v28 = vpop.f32.mrf.mxu0 }
 0x43e   : > { %v7173_v18 = vadd.f32 %v3329_v40, %v3296_v55 }
 0x440   : > { %4015 = vmatmul.bf16.vlgmr.msrb.gmra.mxu0 %v3786_v50  ;;  %4054 = vmatmul.bf16.vlgmr.msra.gmra.mxu3 %v3795_v47  ;;  %v3623_v47 = vpop.f32.mrf.mxu1  ;;  %v3619_v1 = vadd.f32 %v3618_v39, %v7173_v18 }
 0x443   : > { %v3264_v14 = vpop.f32.mrf.mxu3 }
 0x444   : > { %v3299_v22 = vadd.f32 %v3298_v28, %v3264_v14  ;;  %v3334_v3 = vpop.f32.mrf.mxu2 }
 0x445   : > { %v3300_v32 = vpop.f32.mrf.mxu0 }
 0x446   : > { %v7178_v5 = vadd.f32 %v3332_v41, %v3299_v22 }
 0x44b   : > { %v3266_v30 = vpop.f32.mrf.mxu3 }
 0x44c   : > { %v3301_v15 = vadd.f32 %v3300_v32, %v3266_v30  ;;  %v3337_v57 = vpop.f32.mrf.mxu2  ;;  %v3626_v32 = vpop.f32.mrf.mxu1 }
 0x44d   : > { %v3303_v23 = vpop.f32.mrf.mxu0 }
 0x44e   : > { %v7180_v34 = vadd.f32 %v3334_v3, %v3301_v15 }
 0x450   : > { %4059 = vmatmul.bf16.gmra.mxu3 %v3801_v20  ;;  %v3624_v18 = vadd.f32 %v3623_v47, %v7180_v34 }
 0x453   : > { %v3269_v26 = vpop.f32.mrf.mxu3 }
 0x454   : > { %v3304_v46 = vadd.f32 %v3303_v23, %v3269_v26  ;;  %v3339_v52 = vpop.f32.mrf.mxu2  ;;  %v3628_v26 = vpop.f32.mrf.mxu1 }
 0x455   : > { %v3305_v36 = vpop.f32.mrf.mxu0 }
 0x456   : > { %v7183_v49 = vadd.f32 %v3337_v57, %v3304_v46  ;;  %v3622_v57 = vadd.f32 %v3621_v42, %v7178_v5 }
 0x458   : > { %v3627_v5 = vadd.f32 %v3626_v32, %v7183_v49 }
 0x45b   : > { %v3271_v10 = vpop.f32.mrf.mxu3 }
 0x45c   : > { %v3306_v16 = vadd.f32 %v3305_v36, %v3271_v10  ;;  %v3342_v17 = vpop.f32.mrf.mxu2  ;;  %v3631_v6 = vpop.f32.mrf.mxu1 }
 0x45d   : > { %v3308_v29 = vpop.f32.mrf.mxu0 }
 0x45e   : > { %v7185_v38 = vadd.f32 %v3339_v52, %v3306_v16 }
 0x460   : > { %4064 = vmatmul.bf16.gmra.mxu3 %v3807_v11  ;;  %v3629_v34 = vadd.f32 %v3628_v26, %v7185_v38  ;;  %v7240_v38 = vld [vmem:[%s7339_s7] ss:$0 sm:$0xff]  ;;  %v4086_v26 = vld [vmem:[%s5719_s6 + $0x8] sm:$0xff] }
 0x463   : > { %v3274_v44 = vpop.f32.mrf.mxu3 }
 0x464   : > { %v3309_v43 = vadd.f32 %v3308_v29, %v3274_v44  ;;  %v3344_v37 = vpop.f32.mrf.mxu2  ;;  %v3633_v24 = vpop.f32.mrf.mxu1 }
 0x465   : > { %v3310_v56 = vpop.f32.mrf.mxu0 }
 0x466   : > { %v7188_v0 = vadd.f32 %v3342_v17, %v3309_v43 }
 0x468   : > { %v3632_v7 = vadd.f32 %v3631_v6, %v7188_v0 }
 0x46b   : > { %v3276_v33 = vpop.f32.mrf.mxu3 }
 0x46c   : > { %v3311_v40 = vadd.f32 %v3310_v56, %v3276_v33  ;;  %v7190_v35 = vpop.f32.mrf.mxu2  ;;  %v4021_v49 = vpop.f32.mrf.mxu1 }
 0x46d   : > { %v3679_v25 = vpop.f32.mrf.mxu0  ;;  %v3983_v0 = vadd.f32 %v7240_v38, %v7190_v35 }
 0x46e   : > { %v7192_v59 = vadd.f32 %v3344_v37, %v3311_v40 }
 0x470   : > { %4069 = vmatmul.bf16.gmra.mxu3 %v3813_v2  ;;  %v3634_v2 = vadd.f32 %v3633_v24, %v7192_v59  ;;  %v4089_v24 = vld [vmem:[%s5719_s6 + $0x20] sm:$0xff] }
 0x473   : > { %v3645_v12 = vpop.f32.mrf.mxu3 }
 0x474   : > { %v3646_v54 = vadd.f32 %v3645_v12, %v7171_v8  ;;  %v7196_v58 = vpop.f32.mrf.mxu2  ;;  %v4023_v42 = vpop.f32.mrf.mxu1 }
 0x475   : > { %v3681_v13 = vpop.f32.mrf.mxu0  ;;  %v3985_v35 = vadd.f32 %v7240_v38, %v7196_v58 }
 0x476   : > { %v7198_v61 = vadd.f32 %v3679_v25, %v3646_v54 }
 0x47b   : > { %v3647_v27 = vpop.f32.mrf.mxu3 }
 0x47c   : > { %v3648_v55 = vadd.f32 %v3647_v27, %v3614_v31  ;;  %v3987_v41 = vpop.f32.mrf.mxu2  ;;  %v4026_v58 = vpop.f32.mrf.mxu1 }
 0x47d   : > { %v3684_v28 = vpop.f32.mrf.mxu0 }
 0x47e   : > { %v7200_v50 = vadd.f32 %v3681_v13, %v3648_v55  ;;  %v3988_v55 = vadd.f32 %v7240_v38, %v3987_v41 }
 0x480   : > { %v4022_v59 = vadd.f32 %v4021_v49, %v3988_v55  ;;  %v4090_v49 = vld [vmem:[%s5719_s6 + $0x28] sm:$0xff]  ;;  %v4092_v55 = vld [vmem:[%s5719_s6 + $0x38] sm:$0xff] }
 0x483   : > { %v3650_v14 = vpop.f32.mrf.mxu3 }
 0x484   : > { %v3651_v22 = vadd.f32 %v3650_v14, %v3617_v53  ;;  %v7203_v3 = vpop.f32.mrf.mxu2  ;;  %v4085_v14 = vld [vmem:[%s5719_s6] sm:$0xff] }
 0x485   : > { %v3686_v8 = vpop.f32.mrf.mxu0  ;;  %v3990_v41 = vadd.f32 %v7240_v38, %v7203_v3 }
 0x486   : > { %v7205_v62 = vadd.f32 %v3684_v28, %v3651_v22 }
 0x487   : > { %v4024_v3 = vadd.f32 %v4023_v42, %v3990_v41 }
 0x48b   : > { %v3652_v19 = vpop.f32.mrf.mxu3 }
 0x48c   : > { %v3653_v30 = vadd.f32 %v3652_v19, %v3619_v1  ;;  %v7208_v31 = vpop.f32.mrf.mxu2  ;;  %v4087_v19 = vld [vmem:[%s5719_s6 + $0x10] sm:$0xff] }
 0x48d   : > { %v3689_v51 = vpop.f32.mrf.mxu0  ;;  %v3993_v6 = vadd.f32 %v7240_v38, %v7208_v31 }
 0x48e   : > { %v7210_v15 = vadd.f32 %v3686_v8, %v3653_v30 }
 0x493   : > { %v3655_v9 = vpop.f32.mrf.mxu3 }
 0x494   : > { %v3656_v23 = vadd.f32 %v3655_v9, %v3622_v57  ;;  %v7213_v20 = vpop.f32.mrf.mxu2 }
 0x495   : > { %v3691_v46 = vpop.f32.mrf.mxu0 }
 0x496   : > { %v7215_v52 = vadd.f32 %v3689_v51, %v3656_v23 }
 0x49b   : > { %v3657_v48 = vpop.f32.mrf.mxu3 }
 0x49c   : > { %v3658_v4 = vadd.f32 %v3657_v48, %v3624_v18  ;;  %v7218_v36 = vpop.f32.mrf.mxu2 }
 0x49d   : > { %v3694_v63 = vpop.f32.mrf.mxu0 }
 0x49e   : > { %v7220_v10 = vadd.f32 %v3691_v46, %v3658_v4 }
 0x4a3   : > { %v3660_v16 = vpop.f32.mrf.mxu3 }
 0x4a4   : > { %v3661_v17 = vadd.f32 %v3660_v16, %v3627_v5  ;;  %v7223_v29 = vpop.f32.mrf.mxu2  ;;  %v4028_v16 = vpop.f32.mrf.mxu1 }
 0x4a5   : > { %v3696_v11 = vpop.f32.mrf.mxu0 }
 0x4a6   : > { %v7225_v21 = vadd.f32 %v3694_v63, %v3661_v17  ;;  %v4088_v63 = vld [vmem:[%s5719_s6 + $0x18] sm:$0xff]  ;;  %v4027_v17 = vadd.f32 %v4026_v58, %v3993_v6 }
 0x4ab   : > { %v3662_v44 = vpop.f32.mrf.mxu3 }
 0x4ac   : > { %v3663_v45 = vadd.f32 %v3662_v44, %v3629_v34  ;;  %v7228_v43 = vpop.f32.mrf.mxu2  ;;  %v3995_v34 = vadd.f32 %v7240_v38, %v7213_v20 }
 0x4ad   : > { %v3699_v37 = vpop.f32.mrf.mxu0 }
 0x4ae   : > { %v7230_v56 = vadd.f32 %v3696_v11, %v3663_v45  ;;  %v4029_v31 = vadd.f32 %v4028_v16, %v3995_v34 }
 0x4b3   : > { %v3665_v33 = vpop.f32.mrf.mxu3 }
 0x4b4   : > { %v3666_v60 = vadd.f32 %v3665_v33, %v3632_v7  ;;  %v7233_v40 = vpop.f32.mrf.mxu2  ;;  %v3998_v33 = vadd.f32 %v7240_v38, %v7218_v36 }
 0x4b5   : > { %v3701_v39 = vpop.f32.mrf.mxu0 }
 0x4b6   : > { %v7235_v25 = vadd.f32 %v3699_v37, %v3666_v60  ;;  %v4031_v37 = vpop.f32.mrf.mxu1 }
 0x4b7   : > { %v4032_v20 = vadd.f32 %v4031_v37, %v3998_v33 }
 0x4bb   : > { %v3667_v12 = vpop.f32.mrf.mxu3 }
 0x4bc   : > { %v3668_v54 = vadd.f32 %v3667_v12, %v3634_v2  ;;  %v4050_v13 = vpop.f32.mrf.mxu2 }
 0x4bd   : > { %v4016_v27 = vpop.f32.mrf.mxu0 }
 0x4be   : > { %v7246_v28 = vadd.f32 %v3701_v39, %v3668_v54  ;;  %v4017_v47 = vadd.f32 %v4016_v27, %v3983_v0  ;;  %v4033_v12 = vpop.f32.mrf.mxu1  ;;  %v4091_v0 = vld [vmem:[%s5719_s6 + $0x30] sm:$0xff]  ;;  %v4000_v54 = vadd.f32 %v7240_v38, %v7223_v29 }
 0x4c0   : > { %v4051_v53 = vadd.f32 %v4050_v13, %v4017_v47  ;;  %v4034_v36 = vadd.f32 %v4033_v12, %v4000_v54  ;;  %v4003_v47 = vadd.f32 %v7240_v38, %v7228_v43 }
 0x4c2   : > { %v4075_v22 = vadd.f32 %v4051_v53, %v7198_v61 }
 0x4c3   : > { %v4055_v8 = vpop.f32.mrf.mxu3 }
 0x4c4   : > { %v4095_v1 = vadd.f32 %v4085_v14, %v4075_v22  ;;  %v4056_v32 = vadd.f32 %v4055_v8, %v4022_v59  ;;  %v4052_v51 = vpop.f32.mrf.mxu2  ;;  %v4093_v8 = vld [vmem:[%s5719_s6 + $0x40] sm:$0xff] }
 0x4c5   : > { %v4018_v30 = vpop.f32.mrf.mxu0 }
 0x4c6   : > { %4105 = vst [vmem:[%s7257_s13] sm:$0xff] %v4095_v1  ;;  %v4077_v61 = vadd.f32 %v4056_v32, %v7205_v62  ;;  %v4019_v57 = vadd.f32 %v4018_v30, %v3985_v35  ;;  %v4036_v14 = vpop.f32.mrf.mxu1  ;;  %v4005_v35 = vadd.f32 %v7240_v38, %v7233_v40 }
 0x4c7   : > { %v4037_v29 = vadd.f32 %v4036_v14, %v4003_v47 }
 0x4c8   : > { %v4097_v9 = vadd.f32 %v4087_v19, %v4077_v61  ;;  %v4053_v23 = vadd.f32 %v4052_v51, %v4019_v57  ;;  %v4094_v51 = vld [vmem:[%s5719_s6 + $0x48] sm:$0xff] }
 0x4ca   : > { %4107 = vst [vmem:[%s7257_s13 + $0x10] sm:$0xff] %v4097_v9  ;;  %v4076_v46 = vadd.f32 %v4053_v23, %v7200_v50 }
 0x4cb   : > { %v4057_v18 = vpop.f32.mrf.mxu3 }
 0x4cc   : > { %v4096_v48 = vadd.f32 %v4086_v26, %v4076_v46  ;;  %v4058_v4 = vadd.f32 %v4057_v18, %v4024_v3 }
 0x4ce   : > { %4106 = vst [vmem:[%s7257_s13 + $0x8] sm:$0xff] %v4096_v48  ;;  %v4078_v62 = vadd.f32 %v4058_v4, %v7210_v15  ;;  %v4038_v32 = vpop.f32.mrf.mxu1 }
 0x4d0   : > { %v4098_v5 = vadd.f32 %v4088_v63, %v4078_v62 }
 0x4d2   : > { %4108 = vst [vmem:[%s7257_s13 + $0x18] sm:$0xff] %v4098_v5 }
 0x4d3   : > { %v4060_v11 = vpop.f32.mrf.mxu3 }
 0x4d4   : > { %v4061_v50 = vadd.f32 %v4060_v11, %v4027_v17 }
 0x4d6   : > { %v4079_v44 = vadd.f32 %v4061_v50, %v7215_v52 }
 0x4d8   : > { %v4099_v45 = vadd.f32 %v4089_v24, %v4079_v44 }
 0x4da   : > { %4109 = vst [vmem:[%s7257_s13 + $0x20] sm:$0xff] %v4099_v45 }
 0x4db   : > { %v4062_v15 = vpop.f32.mrf.mxu3 }
 0x4dc   : > { %v4063_v7 = vadd.f32 %v4062_v15, %v4029_v31 }
 0x4de   : > { %v4080_v60 = vadd.f32 %v4063_v7, %v7220_v10 }
 0x4e0   : > { %v4100_v39 = vadd.f32 %v4090_v49, %v4080_v60 }
 0x4e2   : > { %4110 = vst [vmem:[%s7257_s13 + $0x28] sm:$0xff] %v4100_v39 }
 0x4e3   : > { %v4065_v2 = vpop.f32.mrf.mxu3 }
 0x4e4   : > { %v4066_v52 = vadd.f32 %v4065_v2, %v4032_v20 }
 0x4e6   : > { %v4081_v13 = vadd.f32 %v4066_v52, %v7225_v21 }
 0x4e8   : > { %v4101_v42 = vadd.f32 %v4091_v0, %v4081_v13 }
 0x4ea   : > { %4111 = vst [vmem:[%s7257_s13 + $0x30] sm:$0xff] %v4101_v42 }
 0x4eb   : > { %v4067_v27 = vpop.f32.mrf.mxu3 }
 0x4ec   : > { %v4068_v10 = vadd.f32 %v4067_v27, %v4034_v36 }
 0x4ee   : > { %v4082_v53 = vadd.f32 %v4068_v10, %v7230_v56  ;;  %v4039_v56 = vadd.f32 %v4038_v32, %v4005_v35 }
 0x4f0   : > { %v4102_v22 = vadd.f32 %v4092_v55, %v4082_v53 }
 0x4f2   : > { %4112 = vst [vmem:[%s7257_s13 + $0x38] sm:$0xff] %v4102_v22 }
 0x4f3   : > { %v4070_v21 = vpop.f32.mrf.mxu3 }
 0x4f4   : > { %v4071_v59 = vadd.f32 %v4070_v21, %v4037_v29 }
 0x4f6   : > { %v4083_v1 = vadd.f32 %v4071_v59, %v7235_v25 }
 0x4f8   : > { %v4103_v43 = vadd.f32 %v4093_v8, %v4083_v1 }
 0x4fa   : > { %4113 = vst [vmem:[%s7257_s13 + $0x40] sm:$0xff] %v4103_v43 }
 0x4fb   : > { %v4072_v19 = vpop.f32.mrf.mxu3 }
 0x4fc   : > { %v4073_v30 = vadd.f32 %v4072_v19, %v4039_v56 }
 0x4fe   : > { %v4084_v40 = vadd.f32 %v4073_v30, %v7246_v28 }
 0x500   : > { %v4104_v25 = vadd.f32 %v4094_v51, %v4084_v40 }
 0x502   : > { %4114 = vst [vmem:[%s7257_s13 + $0x48] sm:$0xff] %v4104_v25 }
 0x503   : > { %5487 = shalt.err (!%p5484_p10)
}
 0x504   : > { %s5546_s3 = smov 128   ;;  %s5547_s15 = smov 8  }
 0x505   : > { %5206 = dma.vmem_to_hbm [thread:$0]  (%p5680_p3), %s4129_s1, 1280, %s4131_s2, %s4116_s9, %s5546_s3, %s5546_s3, %s5547_s15  }
 0x506 PF: > { %s4145_s17 = sand.u32 1, %s5522_s27   ;;  %p7489_p12 = scmp.ge.s32.totalorder %s5534_s30, 2 }
 0x507   : > { %s4146_s13 = scalar_lea.sflag [#allocation5], %s4145_s17 }
 0x508   : > { %p5226_p13 = pnand %p7489_p12, %p5628_p6 }
 0x50a   : > { %p5227_p0 = pneg %p5226_p13 }
 0x50c   : > { %5517 = dma.done.wait (%p5227_p0), %s4146_s13, 1280  }
 0x50d   : > { %5519 = vsyncadd (%p5227_p0), %s4146_s13, 4294966016  ;;  %p23_p5 = scmp.ge.s32.totalorder %s5670_s14, 4   ;;  %s7490_s27 = smov %s5526_s28 }
 0x50e   : > { %s7491_s28 = smov %s5530_s29  ;;  %s7492_s29 = smov %s5686_s20 }
 0x50f   : > { %s7493_s30 = smov %s5670_s14  ;;  %25 = sbr.rel (!%p23_p5) target bundleno = 12 (0xc), region = 117 }
 0x514   :  { %4152 = vsyncpa [#allocation4], 1 }
 0x515   :  { %4154 = vsyncpa [#allocation4 + $0x1], 1 }
 0x516   :  { %4155 = vsyncpa [#allocation7], 1 }
 0x517   :  { %4156 = vsyncpa [#allocation10], 1 }
 0x518   :  { %4157 = vsyncpa [#allocation5], 1 }
 0x519   :  { %4159 = vsyncpa [#allocation5 + $0x1], 1 }

</bundles_post_ra>
